<compile_context>
chip_gen: v5e
topology: v5e:2x2
jax: 0.10.0
libtpu: 0.0.40
codegen_flags: <defaults>
</compile_context>

<pallas_src>
import jax
import jax.numpy as jnp
from jax.experimental import pallas as pl
from jax.experimental.pallas import tpu as pltpu

LN_EPS = 1e-5                     # nn.LayerNorm default eps
_GELU_C = 0.7978845608028654      # sqrt(2/pi)


def _gelu(x):
    # TODO(synk): PyTorch nn.GELU() defaults to the exact erf form; the tanh approximation
    # is used in-kernel because it lowers cleanly to the TPU EUP (difference ~1e-3).
    return 0.5 * x * (1.0 + jnp.tanh(_GELU_C * (x + 0.044715 * x * x * x)))


def _layer_norm(x, gamma, beta):
    mu = jnp.mean(x, axis=-1, keepdims=True)
    d = x - mu
    var = jnp.mean(d * d, axis=-1, keepdims=True)           # biased var, like nn.LayerNorm
    return d * jax.lax.rsqrt(var + LN_EPS) * gamma + beta   # rsqrt -> EUP slot


def _pick_act_dtype():
    # bf16 VPU/EUP exists on v6e / v7x; keep f32 elementwise math on v5e and older.
    try:
        kind = jax.devices()[0].device_kind.lower()
    except Exception:
        return jnp.float32
    if ("v6" in kind) or ("v7" in kind) or ("7x" in kind):
        return jnp.bfloat16
    return jnp.float32


# ----------------------------------------------------------------------------------
# Single fused kernel: message MLP + fused scatter + node path epilogue
# ----------------------------------------------------------------------------------
def _make_fused_kernel(num_msg, num_dense, inv_scale, n_nodes, n_edges, tm, act_dtype):
    def kernel(src_ref, he_ref, hv_ref, *refs):
        o_ref, acc_ref = refs[-2], refs[-1]
        prefs = refs[:-2]
        idx = 0
        msg_W = prefs[idx:idx + num_msg]; idx += num_msg
        msg_b = prefs[idx][...]; idx += 1                       # (L, H) f32
        dense_W = prefs[idx:idx + num_dense]; idx += num_dense
        if num_dense > 0:
            dense_b = prefs[idx][...]; idx += 1                 # (D, dd) f32
        out_W = prefs[idx]
        out_b = prefs[idx + 1][...]                             # (1, H) f32
        ln = prefs[idx + 2][...]                                # (4, H) f32

        i = pl.program_id(0)
        last = pl.num_programs(0) - 1

        @pl.when(i == 0)
        def _():
            acc_ref[...] = jnp.zeros_like(acc_ref)

        # ---- message MLP over this tile of edge rows (bf16 MXU, f32 accumulation) ----
        h = he_ref[...]                                         # (tm, Din) bf16
        for l in range(num_msg):
            z = jnp.dot(h.astype(jnp.bfloat16), msg_W[l][...],
                        preferred_element_type=jnp.float32) + msg_b[l:l + 1, :]
            h = _gelu(z.astype(act_dtype))
            # TODO(synk): nn.Dropout is identity in eval/inference mode; not applied.

        # ---- fused scatter-add: one-hot (N, tm) @ h_message (tm, H) on the MXU ----
        row_ids = i * tm + jax.lax.broadcasted_iota(jnp.int32, (tm, 1), 0)
        h = jnp.where(row_ids < n_edges, h, 0).astype(jnp.bfloat16)   # mask OOB tail rows
        onehot = (jax.lax.broadcasted_iota(jnp.int32, (n_nodes, tm), 0)
                  == src_ref[...]).astype(jnp.bfloat16)               # (N, tm)
        acc_ref[...] += jnp.dot(onehot, h, preferred_element_type=jnp.float32)

        # ---- node path epilogue on the final grid step (tiny: N x H rows) ----
        @pl.when(i == last)
        def _():
            x = _layer_norm(hv_ref[...] + acc_ref[...] * inv_scale,
                            ln[0:1, :], ln[1:2, :])                   # f32
            g = x
            for d in range(num_dense):
                z = jnp.dot(g.astype(jnp.bfloat16), dense_W[d][...],
                            preferred_element_type=jnp.float32) + dense_b[d:d + 1, :]
                g = _gelu(z.astype(act_dtype))
                # TODO(synk): nn.Dropout is identity in eval/inference mode; not applied.
            dh2 = jnp.dot(g.astype(jnp.bfloat16), out_W[...],
                          preferred_element_type=jnp.float32) + out_b
            o_ref[...] = _layer_norm(x + dh2, ln[2:3, :], ln[3:4, :])
    return kernel


def mpnn_fused(h_V, h_E_bf16, src_idx, kp, *, scale, num_msg, num_dense,
               tm=512, act_dtype=jnp.float32):
    """Whole MPNNLayer forward in one pallas_call."""
    N, H = h_V.shape
    E, Din = h_E_bf16.shape
    tm_eff = E if E <= tm else tm                 # tm is a multiple of 128 (lane-dim rule)
    grid = (pl.cdiv(E, tm_eff),)
    src_2d = src_idx.reshape(1, E).astype(jnp.int32)

    def full_spec(t):
        return pl.BlockSpec(t.shape, lambda i: (0,) * t.ndim)

    in_specs = [
        pl.BlockSpec((1, tm_eff), lambda i: (0, i)),        # src ids tile
        pl.BlockSpec((tm_eff, Din), lambda i: (i, 0)),      # h_E tile (bf16)
        pl.BlockSpec((N, H), lambda i: (0, 0)),             # h_V (resident, used in epilogue)
    ]
    args = [src_2d, h_E_bf16, h_V]
    flat = list(kp["msg_W"]) + [kp["msg_b"]] + list(kp["dense_W"])
    if num_dense > 0:
        flat.append(kp["dense_b"])
    flat += [kp["out_W"], kp["out_b"], kp["ln"]]
    for t in flat:
        in_specs.append(full_spec(t))
        args.append(t)

    return pl.pallas_call(
        _make_fused_kernel(num_msg, num_dense, 1.0 / scale, N, E, tm_eff, act_dtype),
        out_shape=jax.ShapeDtypeStruct((N, H), jnp.float32),
        grid=grid,
        in_specs=in_specs,
        out_specs=pl.BlockSpec((N, H), lambda i: (0, 0)),   # resident output, written last step
        scratch_shapes=[pltpu.VMEM((N, H), jnp.float32)],   # dh_sum accumulator
        compiler_params=pltpu.CompilerParams(
            # Accumulator + resident output across the grid axis -> must be "arbitrary"
            # (a shared accumulator under "parallel" would race on v7x's two TensorCores).
            dimension_semantics=("arbitrary",)),
    )(*args)


# ----------------------------------------------------------------------------------
# MPNNLayer (JAX + Pallas)
# ----------------------------------------------------------------------------------
class MPNNLayerJAX:
    def __init__(self, num_hidden, num_in, num_message_layers, num_dense_layers,
                 dim_dense_layers, dropout=0.1, scale=30, key=None, tm=512,
                 act_dtype=None):
        assert num_message_layers >= 1
        assert tm % 128 == 0
        self.num_hidden = num_hidden
        self.num_in = num_in
        self.num_message_layers = num_message_layers
        self.num_dense_layers = num_dense_layers
        self.dim_dense_layers = dim_dense_layers
        self.scale = scale
        self.tm = tm
        self.act_dtype = _pick_act_dtype() if act_dtype is None else act_dtype

        key = jax.random.PRNGKey(0) if key is None else key

        def linear(k, fan_in, fan_out):
            kw, kb = jax.random.split(k)
            bound = 1.0 / (fan_in ** 0.5)          # nn.Linear default init
            W = jax.random.uniform(kw, (fan_in, fan_out), jnp.float32, -bound, bound)
            b = jax.random.uniform(kb, (1, fan_out), jnp.float32, -bound, bound)
            return W, b

        msg_W, msg_b = [], []
        d = num_hidden + num_in
        for _ in range(num_message_layers):
            key, sub = jax.random.split(key)
            W, b = linear(sub, d, num_hidden)
            msg_W.append(W); msg_b.append(b)
            d = num_hidden

        dense_W, dense_b = [], []
        for _ in range(num_dense_layers):
            key, sub = jax.random.split(key)
            W, b = linear(sub, d, dim_dense_layers)
            dense_W.append(W); dense_b.append(b)
            d = dim_dense_layers
        key, sub = jax.random.split(key)
        out_W, out_b = linear(sub, d, num_hidden)

        ln1_g = jnp.ones((1, num_hidden), jnp.float32)
        ln1_b = jnp.zeros((1, num_hidden), jnp.float32)
        ln2_g = jnp.ones((1, num_hidden), jnp.float32)
        ln2_b = jnp.zeros((1, num_hidden), jnp.float32)

        # f32 originals (used by the pure-JAX reference).
        self.params = dict(msg_W=msg_W, msg_b=msg_b, dense_W=dense_W, dense_b=dense_b,
                           out_W=out_W, out_b=out_b,
                           ln1_g=ln1_g, ln1_b=ln1_b, ln2_g=ln2_g, ln2_b=ln2_b)

        # Kernel params: weights pre-cast to bf16 ONCE, biases / LN params stacked.
        self.kernel_params = dict(
            msg_W=[w.astype(jnp.bfloat16) for w in msg_W],
            msg_b=jnp.concatenate(msg_b, axis=0),                       # (L, H) f32
            dense_W=[w.astype(jnp.bfloat16) for w in dense_W],
            dense_b=(jnp.concatenate(dense_b, axis=0) if num_dense_layers > 0
                     else jnp.zeros((1, dim_dense_layers), jnp.float32)),
            out_W=out_W.astype(jnp.bfloat16),
            out_b=out_b,
            ln=jnp.concatenate([ln1_g, ln1_b, ln2_g, ln2_b], axis=0),   # (4, H) f32
        )
        self._fwd = jax.jit(self._forward)

    def _forward(self, kernel_params, h_V, h_E, edge_idx):
        src_idx = edge_idx[0]
        # Single bf16 cast of the dominant HBM stream; everything else is fused in-kernel.
        h_E_bf16 = h_E.astype(jnp.bfloat16)
        return mpnn_fused(h_V, h_E_bf16, src_idx, kernel_params,
                          scale=self.scale,
                          num_msg=self.num_message_layers,
                          num_dense=self.num_dense_layers,
                          tm=self.tm, act_dtype=self.act_dtype)

    def __call__(self, h_V, h_E, edge_idx):
        return self._fwd(self.kernel_params, h_V, h_E, edge_idx)

    # ---- pure-JAX f32 reference (same math, no Pallas / no bf16) for validation ----
    def reference(self, h_V, h_E, edge_idx):
        p = self.params
        h = h_E
        for W, b in zip(p["msg_W"], p["msg_b"]):
            h = _gelu(h @ W + b)
        dh = jnp.zeros_like(h_V).at[edge_idx[0]].add(h) / self.scale
        x = _layer_norm(h_V + dh, p["ln1_g"], p["ln1_b"])
        h = x
        for W, b in zip(p["dense_W"], p["dense_b"]):
            h = _gelu(h @ W + b)
        h = h @ p["out_W"] + p["out_b"]
        return _layer_norm(x + h, p["ln2_g"], p["ln2_b"])


if __name__ == "__main__":
    root = jax.random.PRNGKey(0)
    k_param, k_hv, k_he, k_src, k_dst = jax.random.split(root, 5)

    num_nodes, num_edges = 64, 1024
    num_hidden, num_in = 128, 128          # 128-wide features -> lane-dense loads/stores

    layer = MPNNLayerJAX(num_hidden=num_hidden, num_in=num_in,
                         num_message_layers=2, num_dense_layers=2,
                         dim_dense_layers=128, dropout=0.1, scale=30,
                         key=k_param, tm=512)

    h_V = jax.random.normal(k_hv, (num_nodes, num_hidden), jnp.float32)
    h_E = jax.random.normal(k_he, (num_edges, num_hidden + num_in), jnp.float32)
    src = jax.random.randint(k_src, (num_edges,), 0, num_nodes, jnp.int32)
    dst = jax.random.randint(k_dst, (num_edges,), 0, num_nodes, jnp.int32)
    edge_idx = jnp.stack([src, dst], axis=0)

    out = jax.block_until_ready(layer(h_V, h_E, edge_idx))
    ref = jax.block_until_ready(layer.reference(h_V, h_E, edge_idx))

    assert out.shape == (num_nodes, num_hidden)
    assert bool(jnp.all(jnp.isfinite(out)))
    max_err = float(jnp.max(jnp.abs(out - ref)))
    assert max_err < 0.25, f"max abs err vs reference: {max_err}"
    print("KERNEL_OK")
</pallas_src>

<mosaic_0001>
module attributes {stable_mosaic.version = 11 : i64} {
  func.func @kernel(%arg0: i32, %arg1: memref<1x512xi32, #tpu.memory_space<vmem>>, %arg2: memref<512x256xbf16, #tpu.memory_space<vmem>>, %arg3: memref<64x128xf32, #tpu.memory_space<vmem>>, %arg4: memref<256x128xbf16, #tpu.memory_space<vmem>>, %arg5: memref<128x128xbf16, #tpu.memory_space<vmem>>, %arg6: memref<2x128xf32, #tpu.memory_space<vmem>>, %arg7: memref<128x128xbf16, #tpu.memory_space<vmem>>, %arg8: memref<128x128xbf16, #tpu.memory_space<vmem>>, %arg9: memref<2x128xf32, #tpu.memory_space<vmem>>, %arg10: memref<128x128xbf16, #tpu.memory_space<vmem>>, %arg11: memref<1x128xf32, #tpu.memory_space<vmem>>, %arg12: memref<4x128xf32, #tpu.memory_space<vmem>>, %arg13: memref<64x128xf32, #tpu.memory_space<vmem>>, %arg14: memref<64x128xf32, #tpu.memory_space<vmem>>) attributes {dimension_semantics = [#tpu.dimension_semantics<arbitrary>], iteration_bounds = array<i64: 2>, scalar_prefetch = 0 : i64, scratch_operands = 1 : i64, tpu.core_type = #tpu.core_type<tc>, window_params = [{transform_indices = @transform_0, window_bounds = array<i64: 1, 512>}, {transform_indices = @transform_1, window_bounds = array<i64: 512, 256>}, {pipeline_mode = #tpu.pipeline_mode<synchronous>, transform_indices = @transform_2, window_bounds = array<i64: 64, 128>}, {pipeline_mode = #tpu.pipeline_mode<synchronous>, transform_indices = @transform_3, window_bounds = array<i64: 256, 128>}, {pipeline_mode = #tpu.pipeline_mode<synchronous>, transform_indices = @transform_4, window_bounds = array<i64: 128, 128>}, {pipeline_mode = #tpu.pipeline_mode<synchronous>, transform_indices = @transform_5, window_bounds = array<i64: 2, 128>}, {pipeline_mode = #tpu.pipeline_mode<synchronous>, transform_indices = @transform_6, window_bounds = array<i64: 128, 128>}, {pipeline_mode = #tpu.pipeline_mode<synchronous>, transform_indices = @transform_7, window_bounds = array<i64: 128, 128>}, {pipeline_mode = #tpu.pipeline_mode<synchronous>, transform_indices = @transform_8, window_bounds = array<i64: 2, 128>}, {pipeline_mode = #tpu.pipeline_mode<synchronous>, transform_indices = @transform_9, window_bounds = array<i64: 128, 128>}, {pipeline_mode = #tpu.pipeline_mode<synchronous>, transform_indices = @transform_10, window_bounds = array<i64: 1, 128>}, {pipeline_mode = #tpu.pipeline_mode<synchronous>, transform_indices = @transform_11, window_bounds = array<i64: 4, 128>}, {pipeline_mode = #tpu.pipeline_mode<synchronous>, transform_indices = @transform_12, window_bounds = array<i64: 64, 128>}]} {
    %c0 = arith.constant 0 : index
    %c0_0 = arith.constant 0 : index
    %0 = vector.load %arg6[%c0, %c0_0] : memref<2x128xf32, #tpu.memory_space<vmem>>, vector<2x128xf32>
    %c0_1 = arith.constant 0 : index
    %c0_2 = arith.constant 0 : index
    %1 = vector.load %arg9[%c0_1, %c0_2] : memref<2x128xf32, #tpu.memory_space<vmem>>, vector<2x128xf32>
    %c0_3 = arith.constant 0 : index
    %c0_4 = arith.constant 0 : index
    %2 = vector.load %arg11[%c0_3, %c0_4] : memref<1x128xf32, #tpu.memory_space<vmem>>, vector<1x128xf32>
    %c0_5 = arith.constant 0 : index
    %c0_6 = arith.constant 0 : index
    %3 = vector.load %arg12[%c0_5, %c0_6] : memref<4x128xf32, #tpu.memory_space<vmem>>, vector<4x128xf32>
    %c0_i32 = arith.constant 0 : i32
    %4 = arith.cmpi eq, %arg0, %c0_i32 : i32
    %5 = arith.extui %4 : i1 to i32
    %c0_i32_7 = arith.constant 0 : i32
    %6 = arith.cmpi ne, %5, %c0_i32_7 : i32
    scf.if %6 {
      %cst_32 = arith.constant 0.000000e+00 : f32
      %71 = vector.broadcast %cst_32 : f32 to vector<64x128xf32>
      %c0_33 = arith.constant 0 : index
      %c0_34 = arith.constant 0 : index
      %72 = vector.load %arg14[%c0_33, %c0_34] : memref<64x128xf32, #tpu.memory_space<vmem>>, vector<64x128xf32>
      tpu.vector_store %arg14[%c0_33, %c0_34], %71 {strides = array<i32>} : memref<64x128xf32, #tpu.memory_space<vmem>>, vector<64x128xf32>,
    } else {
    }
    %c0_8 = arith.constant 0 : index
    %c0_9 = arith.constant 0 : index
    %7 = vector.load %arg2[%c0_8, %c0_9] : memref<512x256xbf16, #tpu.memory_space<vmem>>, vector<512x256xbf16>
    %c0_10 = arith.constant 0 : index
    %c0_11 = arith.constant 0 : index
    %8 = vector.load %arg4[%c0_10, %c0_11] : memref<256x128xbf16, #tpu.memory_space<vmem>>, vector<256x128xbf16>
    %cst = arith.constant dense<0.000000e+00> : vector<512x128xf32>
    %9 = tpu.matmul %7, %8, %cst {dimension_numbers = #tpu.dot_dimension_numbers<[1], [0], [0], [1], [0, 0, 1, 1], [], []>} : vector<512x256xbf16>, vector<256x128xbf16>, vector<512x128xf32> -> vector<512x128xf32>
    %10 = vector.extract_strided_slice %0 {offsets = [0, 0], sizes = [1, 128], strides = [1, 1]} : vector<2x128xf32> to vector<1x128xf32>
    %11 = vector.broadcast %10 : vector<1x128xf32> to vector<512x128xf32>
    %12 = arith.addf %9, %11 : vector<512x128xf32>
    %cst_12 = arith.constant 5.000000e-01 : f32
    %13 = vector.broadcast %cst_12 : f32 to vector<512x128xf32>
    %14 = arith.mulf %13, %12 : vector<512x128xf32>
    %cst_13 = arith.constant 4.471500e-02 : f32
    %15 = vector.broadcast %cst_13 : f32 to vector<512x128xf32>
    %16 = arith.mulf %15, %12 : vector<512x128xf32>
    %17 = arith.mulf %16, %12 : vector<512x128xf32>
    %18 = arith.mulf %17, %12 : vector<512x128xf32>
    %19 = arith.addf %12, %18 : vector<512x128xf32>
    %cst_14 = arith.constant 0.797884583 : f32
    %20 = vector.broadcast %cst_14 : f32 to vector<512x128xf32>
    %21 = arith.mulf %20, %19 : vector<512x128xf32>
    %22 = math.tanh %21 : vector<512x128xf32>
    %cst_15 = arith.constant 1.000000e+00 : f32
    %23 = vector.broadcast %cst_15 : f32 to vector<512x128xf32>
    %24 = arith.addf %23, %22 : vector<512x128xf32>
    %25 = arith.mulf %14, %24 : vector<512x128xf32>
    %26 = arith.truncf %25 : vector<512x128xf32> to vector<512x128xbf16>
    %c0_16 = arith.constant 0 : index
    %c0_17 = arith.constant 0 : index
    %27 = vector.load %arg5[%c0_16, %c0_17] : memref<128x128xbf16, #tpu.memory_space<vmem>>, vector<128x128xbf16>
    %cst_18 = arith.constant dense<0.000000e+00> : vector<512x128xf32>
    %28 = tpu.matmul %26, %27, %cst_18 {dimension_numbers = #tpu.dot_dimension_numbers<[1], [0], [0], [1], [0, 0, 1, 1], [], []>} : vector<512x128xbf16>, vector<128x128xbf16>, vector<512x128xf32> -> vector<512x128xf32>
    %29 = vector.extract_strided_slice %0 {offsets = [1, 0], sizes = [1, 128], strides = [1, 1]} : vector<2x128xf32> to vector<1x128xf32>
    %30 = vector.broadcast %29 : vector<1x128xf32> to vector<512x128xf32>
    %31 = arith.addf %28, %30 : vector<512x128xf32>
    %cst_19 = arith.constant 5.000000e-01 : f32
    %32 = vector.broadcast %cst_19 : f32 to vector<512x128xf32>
    %33 = arith.mulf %32, %31 : vector<512x128xf32>
    %cst_20 = arith.constant 4.471500e-02 : f32
    %34 = vector.broadcast %cst_20 : f32 to vector<512x128xf32>
    %35 = arith.mulf %34, %31 : vector<512x128xf32>
    %36 = arith.mulf %35, %31 : vector<512x128xf32>
    %37 = arith.mulf %36, %31 : vector<512x128xf32>
    %38 = arith.addf %31, %37 : vector<512x128xf32>
    %cst_21 = arith.constant 0.797884583 : f32
    %39 = vector.broadcast %cst_21 : f32 to vector<512x128xf32>
    %40 = arith.mulf %39, %38 : vector<512x128xf32>
    %41 = math.tanh %40 : vector<512x128xf32>
    %cst_22 = arith.constant 1.000000e+00 : f32
    %42 = vector.broadcast %cst_22 : f32 to vector<512x128xf32>
    %43 = arith.addf %42, %41 : vector<512x128xf32>
    %44 = arith.mulf %33, %43 : vector<512x128xf32>
    %c512_i32 = arith.constant 512 : i32
    %45 = arith.muli %arg0, %c512_i32 : i32
    %46 = tpu.iota {dimensions = array<i32: 0>} : vector<512x1xi32>
    %47 = vector.broadcast %45 : i32 to vector<512x1xi32>
    %48 = arith.addi %47, %46 : vector<512x1xi32>
    %c1024_i32 = arith.constant 1024 : i32
    %49 = vector.broadcast %c1024_i32 : i32 to vector<512x1xi32>
    %50 = arith.cmpi slt, %48, %49 : vector<512x1xi32>
    %c0_i32_23 = arith.constant 0 : i32
    %51 = arith.sitofp %c0_i32_23 : i32 to f32
    %52 = vector.shape_cast %50 : vector<512x1xi1> to vector<512x1xi1>
    %53 = vector.broadcast %52 : vector<512x1xi1> to vector<512x128xi1>
    %54 = vector.broadcast %51 : f32 to vector<512x128xf32>
    %55 = arith.select %53, %44, %54 : vector<512x128xi1>, vector<512x128xf32>
    %56 = arith.truncf %55 : vector<512x128xf32> to vector<512x128xbf16>
    %57 = tpu.iota {dimensions = array<i32: 0>} : vector<64x512xi32>
    %c0_24 = arith.constant 0 : index
    %c0_25 = arith.constant 0 : index
    %58 = vector.load %arg1[%c0_24, %c0_25] : memref<1x512xi32, #tpu.memory_space<vmem>>, vector<1x512xi32>
    %59 = vector.broadcast %58 : vector<1x512xi32> to vector<64x512xi32>
    %60 = arith.cmpi eq, %57, %59 : vector<64x512xi32>
    %61 = arith.extui %60 : vector<64x512xi1> to vector<64x512xi32>
    %62 = arith.sitofp %61 : vector<64x512xi32> to vector<64x512xf32>
    %63 = arith.truncf %62 : vector<64x512xf32> to vector<64x512xbf16>
    %c0_26 = arith.constant 0 : index
    %c0_27 = arith.constant 0 : index
    %64 = vector.load %arg14[%c0_26, %c0_27] : memref<64x128xf32, #tpu.memory_space<vmem>>, vector<64x128xf32>
    %cst_28 = arith.constant dense<0.000000e+00> : vector<64x128xf32>
    %65 = tpu.matmul %63, %56, %cst_28 {dimension_numbers = #tpu.dot_dimension_numbers<[1], [0], [0], [1], [0, 0, 1, 1], [], []>} : vector<64x512xbf16>, vector<512x128xbf16>, vector<64x128xf32> -> vector<64x128xf32>
    %66 = arith.addf %64, %65 : vector<64x128xf32>
    %c0_29 = arith.constant 0 : index
    %c0_30 = arith.constant 0 : index
    %67 = vector.load %arg14[%c0_29, %c0_30] : memref<64x128xf32, #tpu.memory_space<vmem>>, vector<64x128xf32>
    tpu.vector_store %arg14[%c0_29, %c0_30], %66 {strides = array<i32>} : memref<64x128xf32, #tpu.memory_space<vmem>>, vector<64x128xf32>,
    %c1_i32 = arith.constant 1 : i32
    %68 = arith.cmpi eq, %arg0, %c1_i32 : i32
    %69 = arith.extui %68 : i1 to i32
    %c0_i32_31 = arith.constant 0 : i32
    %70 = arith.cmpi ne, %69, %c0_i32_31 : i32
    scf.if %70 {
      %c0_32 = arith.constant 0 : index
      %c0_33 = arith.constant 0 : index
      %71 = vector.load %arg3[%c0_32, %c0_33] : memref<64x128xf32, #tpu.memory_space<vmem>>, vector<64x128xf32>
      %c0_34 = arith.constant 0 : index
      %c0_35 = arith.constant 0 : index
      %72 = vector.load %arg14[%c0_34, %c0_35] : memref<64x128xf32, #tpu.memory_space<vmem>>, vector<64x128xf32>
      %cst_36 = arith.constant 0.0333333351 : f32
      %73 = vector.broadcast %cst_36 : f32 to vector<64x128xf32>
      %74 = arith.mulf %72, %73 : vector<64x128xf32>
      %75 = arith.addf %71, %74 : vector<64x128xf32>
      %76 = vector.extract_strided_slice %3 {offsets = [0, 0], sizes = [1, 128], strides = [1, 1]} : vector<4x128xf32> to vector<1x128xf32>
      %77 = vector.extract_strided_slice %3 {offsets = [1, 0], sizes = [1, 128], strides = [1, 1]} : vector<4x128xf32> to vector<1x128xf32>
      %cst_37 = arith.constant dense<0.000000e+00> : vector<64xf32>
      %78 = vector.multi_reduction <add>, %75, %cst_37 [1] : vector<64x128xf32> to vector<64xf32>
      %79 = vector.shape_cast %78 : vector<64xf32> to vector<64x1xf32>
      %cst_38 = arith.constant 1.280000e+02 : f32
      %80 = vector.broadcast %cst_38 : f32 to vector<64x1xf32>
      %81 = arith.divf %79, %80 : vector<64x1xf32>
      %82 = vector.broadcast %81 : vector<64x1xf32> to vector<64x128xf32>
      %83 = arith.subf %75, %82 : vector<64x128xf32>
      %84 = arith.mulf %83, %83 : vector<64x128xf32>
      %cst_39 = arith.constant dense<0.000000e+00> : vector<64xf32>
      %85 = vector.multi_reduction <add>, %84, %cst_39 [1] : vector<64x128xf32> to vector<64xf32>
      %86 = vector.shape_cast %85 : vector<64xf32> to vector<64x1xf32>
      %cst_40 = arith.constant 1.280000e+02 : f32
      %87 = vector.broadcast %cst_40 : f32 to vector<64x1xf32>
      %88 = arith.divf %86, %87 : vector<64x1xf32>
      %cst_41 = arith.constant 9.99999974E-6 : f32
      %89 = vector.broadcast %cst_41 : f32 to vector<64x1xf32>
      %90 = arith.addf %88, %89 : vector<64x1xf32>
      %91 = math.rsqrt %90 : vector<64x1xf32>
      %92 = vector.broadcast %91 : vector<64x1xf32> to vector<64x128xf32>
      %93 = arith.mulf %83, %92 : vector<64x128xf32>
      %94 = vector.broadcast %76 : vector<1x128xf32> to vector<64x128xf32>
      %95 = arith.mulf %93, %94 : vector<64x128xf32>
      %96 = vector.broadcast %77 : vector<1x128xf32> to vector<64x128xf32>
      %97 = arith.addf %95, %96 : vector<64x128xf32>
      %98 = arith.truncf %97 : vector<64x128xf32> to vector<64x128xbf16>
      %c0_42 = arith.constant 0 : index
      %c0_43 = arith.constant 0 : index
      %99 = vector.load %arg7[%c0_42, %c0_43] : memref<128x128xbf16, #tpu.memory_space<vmem>>, vector<128x128xbf16>
      %cst_44 = arith.constant dense<0.000000e+00> : vector<64x128xf32>
      %100 = tpu.matmul %98, %99, %cst_44 {dimension_numbers = #tpu.dot_dimension_numbers<[1], [0], [0], [1], [0, 0, 1, 1], [], []>} : vector<64x128xbf16>, vector<128x128xbf16>, vector<64x128xf32> -> vector<64x128xf32>
      %101 = vector.extract_strided_slice %1 {offsets = [0, 0], sizes = [1, 128], strides = [1, 1]} : vector<2x128xf32> to vector<1x128xf32>
      %102 = vector.broadcast %101 : vector<1x128xf32> to vector<64x128xf32>
      %103 = arith.addf %100, %102 : vector<64x128xf32>
      %cst_45 = arith.constant 5.000000e-01 : f32
      %104 = vector.broadcast %cst_45 : f32 to vector<64x128xf32>
      %105 = arith.mulf %104, %103 : vector<64x128xf32>
      %cst_46 = arith.constant 4.471500e-02 : f32
      %106 = vector.broadcast %cst_46 : f32 to vector<64x128xf32>
      %107 = arith.mulf %106, %103 : vector<64x128xf32>
      %108 = arith.mulf %107, %103 : vector<64x128xf32>
      %109 = arith.mulf %108, %103 : vector<64x128xf32>
      %110 = arith.addf %103, %109 : vector<64x128xf32>
      %cst_47 = arith.constant 0.797884583 : f32
      %111 = vector.broadcast %cst_47 : f32 to vector<64x128xf32>
      %112 = arith.mulf %111, %110 : vector<64x128xf32>
      %113 = math.tanh %112 : vector<64x128xf32>
      %cst_48 = arith.constant 1.000000e+00 : f32
      %114 = vector.broadcast %cst_48 : f32 to vector<64x128xf32>
      %115 = arith.addf %114, %113 : vector<64x128xf32>
      %116 = arith.mulf %105, %115 : vector<64x128xf32>
      %117 = arith.truncf %116 : vector<64x128xf32> to vector<64x128xbf16>
      %c0_49 = arith.constant 0 : index
      %c0_50 = arith.constant 0 : index
      %118 = vector.load %arg8[%c0_49, %c0_50] : memref<128x128xbf16, #tpu.memory_space<vmem>>, vector<128x128xbf16>
      %cst_51 = arith.constant dense<0.000000e+00> : vector<64x128xf32>
      %119 = tpu.matmul %117, %118, %cst_51 {dimension_numbers = #tpu.dot_dimension_numbers<[1], [0], [0], [1], [0, 0, 1, 1], [], []>} : vector<64x128xbf16>, vector<128x128xbf16>, vector<64x128xf32> -> vector<64x128xf32>
      %120 = vector.extract_strided_slice %1 {offsets = [1, 0], sizes = [1, 128], strides = [1, 1]} : vector<2x128xf32> to vector<1x128xf32>
      %121 = vector.broadcast %120 : vector<1x128xf32> to vector<64x128xf32>
      %122 = arith.addf %119, %121 : vector<64x128xf32>
      %cst_52 = arith.constant 5.000000e-01 : f32
      %123 = vector.broadcast %cst_52 : f32 to vector<64x128xf32>
      %124 = arith.mulf %123, %122 : vector<64x128xf32>
      %cst_53 = arith.constant 4.471500e-02 : f32
      %125 = vector.broadcast %cst_53 : f32 to vector<64x128xf32>
      %126 = arith.mulf %125, %122 : vector<64x128xf32>
      %127 = arith.mulf %126, %122 : vector<64x128xf32>
      %128 = arith.mulf %127, %122 : vector<64x128xf32>
      %129 = arith.addf %122, %128 : vector<64x128xf32>
      %cst_54 = arith.constant 0.797884583 : f32
      %130 = vector.broadcast %cst_54 : f32 to vector<64x128xf32>
      %131 = arith.mulf %130, %129 : vector<64x128xf32>
      %132 = math.tanh %131 : vector<64x128xf32>
      %cst_55 = arith.constant 1.000000e+00 : f32
      %133 = vector.broadcast %cst_55 : f32 to vector<64x128xf32>
      %134 = arith.addf %133, %132 : vector<64x128xf32>
      %135 = arith.mulf %124, %134 : vector<64x128xf32>
      %136 = arith.truncf %135 : vector<64x128xf32> to vector<64x128xbf16>
      %c0_56 = arith.constant 0 : index
      %c0_57 = arith.constant 0 : index
      %137 = vector.load %arg10[%c0_56, %c0_57] : memref<128x128xbf16, #tpu.memory_space<vmem>>, vector<128x128xbf16>
      %cst_58 = arith.constant dense<0.000000e+00> : vector<64x128xf32>
      %138 = tpu.matmul %136, %137, %cst_58 {dimension_numbers = #tpu.dot_dimension_numbers<[1], [0], [0], [1], [0, 0, 1, 1], [], []>} : vector<64x128xbf16>, vector<128x128xbf16>, vector<64x128xf32> -> vector<64x128xf32>
      %139 = vector.broadcast %2 : vector<1x128xf32> to vector<64x128xf32>
      %140 = arith.addf %138, %139 : vector<64x128xf32>
      %141 = arith.addf %97, %140 : vector<64x128xf32>
      %142 = vector.extract_strided_slice %3 {offsets = [2, 0], sizes = [1, 128], strides = [1, 1]} : vector<4x128xf32> to vector<1x128xf32>
      %143 = vector.extract_strided_slice %3 {offsets = [3, 0], sizes = [1, 128], strides = [1, 1]} : vector<4x128xf32> to vector<1x128xf32>
      %cst_59 = arith.constant dense<0.000000e+00> : vector<64xf32>
      %144 = vector.multi_reduction <add>, %141, %cst_59 [1] : vector<64x128xf32> to vector<64xf32>
      %145 = vector.shape_cast %144 : vector<64xf32> to vector<64x1xf32>
      %cst_60 = arith.constant 1.280000e+02 : f32
      %146 = vector.broadcast %cst_60 : f32 to vector<64x1xf32>
      %147 = arith.divf %145, %146 : vector<64x1xf32>
      %148 = vector.broadcast %147 : vector<64x1xf32> to vector<64x128xf32>
      %149 = arith.subf %141, %148 : vector<64x128xf32>
      %150 = arith.mulf %149, %149 : vector<64x128xf32>
      %cst_61 = arith.constant dense<0.000000e+00> : vector<64xf32>
      %151 = vector.multi_reduction <add>, %150, %cst_61 [1] : vector<64x128xf32> to vector<64xf32>
      %152 = vector.shape_cast %151 : vector<64xf32> to vector<64x1xf32>
      %cst_62 = arith.constant 1.280000e+02 : f32
      %153 = vector.broadcast %cst_62 : f32 to vector<64x1xf32>
      %154 = arith.divf %152, %153 : vector<64x1xf32>
      %cst_63 = arith.constant 9.99999974E-6 : f32
      %155 = vector.broadcast %cst_63 : f32 to vector<64x1xf32>
      %156 = arith.addf %154, %155 : vector<64x1xf32>
      %157 = math.rsqrt %156 : vector<64x1xf32>
      %158 = vector.broadcast %157 : vector<64x1xf32> to vector<64x128xf32>
      %159 = arith.mulf %149, %158 : vector<64x128xf32>
      %160 = vector.broadcast %142 : vector<1x128xf32> to vector<64x128xf32>
      %161 = arith.mulf %159, %160 : vector<64x128xf32>
      %162 = vector.broadcast %143 : vector<1x128xf32> to vector<64x128xf32>
      %163 = arith.addf %161, %162 : vector<64x128xf32>
      %c0_64 = arith.constant 0 : index
      %c0_65 = arith.constant 0 : index
      %164 = vector.load %arg13[%c0_64, %c0_65] : memref<64x128xf32, #tpu.memory_space<vmem>>, vector<64x128xf32>
      tpu.vector_store %arg13[%c0_64, %c0_65], %163 {strides = array<i32>} : memref<64x128xf32, #tpu.memory_space<vmem>>, vector<64x128xf32>,
    } else {
    }
    return
  }
  func.func @transform_0(%arg0: i32) -> (i32, i32) {
    %c0_i32 = arith.constant 0 : i32
    %c0_i32_0 = arith.constant 0 : i32
    return %c0_i32, %arg0 : i32, i32
  }
  func.func @transform_1(%arg0: i32) -> (i32, i32) {
    %c0_i32 = arith.constant 0 : i32
    %c0_i32_0 = arith.constant 0 : i32
    return %arg0, %c0_i32 : i32, i32
  }
  func.func @transform_2(%arg0: i32) -> (i32, i32) {
    %c0_i32 = arith.constant 0 : i32
    %c0_i32_0 = arith.constant 0 : i32
    %c0_i32_1 = arith.constant 0 : i32
    return %c0_i32, %c0_i32_0 : i32, i32
  }
  func.func @transform_3(%arg0: i32) -> (i32, i32) {
    %c0_i32 = arith.constant 0 : i32
    %c0_i32_0 = arith.constant 0 : i32
    %c0_i32_1 = arith.constant 0 : i32
    return %c0_i32, %c0_i32_0 : i32, i32
  }
  func.func @transform_4(%arg0: i32) -> (i32, i32) {
    %c0_i32 = arith.constant 0 : i32
    %c0_i32_0 = arith.constant 0 : i32
    %c0_i32_1 = arith.constant 0 : i32
    return %c0_i32, %c0_i32_0 : i32, i32
  }
  func.func @transform_5(%arg0: i32) -> (i32, i32) {
    %c0_i32 = arith.constant 0 : i32
    %c0_i32_0 = arith.constant 0 : i32
    %c0_i32_1 = arith.constant 0 : i32
    return %c0_i32, %c0_i32_0 : i32, i32
  }
  func.func @transform_6(%arg0: i32) -> (i32, i32) {
    %c0_i32 = arith.constant 0 : i32
    %c0_i32_0 = arith.constant 0 : i32
    %c0_i32_1 = arith.constant 0 : i32
    return %c0_i32, %c0_i32_0 : i32, i32
  }
  func.func @transform_7(%arg0: i32) -> (i32, i32) {
    %c0_i32 = arith.constant 0 : i32
    %c0_i32_0 = arith.constant 0 : i32
    %c0_i32_1 = arith.constant 0 : i32
    return %c0_i32, %c0_i32_0 : i32, i32
  }
  func.func @transform_8(%arg0: i32) -> (i32, i32) {
    %c0_i32 = arith.constant 0 : i32
    %c0_i32_0 = arith.constant 0 : i32
    %c0_i32_1 = arith.constant 0 : i32
    return %c0_i32, %c0_i32_0 : i32, i32
  }
  func.func @transform_9(%arg0: i32) -> (i32, i32) {
    %c0_i32 = arith.constant 0 : i32
    %c0_i32_0 = arith.constant 0 : i32
    %c0_i32_1 = arith.constant 0 : i32
    return %c0_i32, %c0_i32_0 : i32, i32
  }
  func.func @transform_10(%arg0: i32) -> (i32, i32) {
    %c0_i32 = arith.constant 0 : i32
    %c0_i32_0 = arith.constant 0 : i32
    %c0_i32_1 = arith.constant 0 : i32
    return %c0_i32, %c0_i32_0 : i32, i32
  }
  func.func @transform_11(%arg0: i32) -> (i32, i32) {
    %c0_i32 = arith.constant 0 : i32
    %c0_i32_0 = arith.constant 0 : i32
    %c0_i32_1 = arith.constant 0 : i32
    return %c0_i32, %c0_i32_0 : i32, i32
  }
  func.func @transform_12(%arg0: i32) -> (i32, i32) {
    %c0_i32 = arith.constant 0 : i32
    %c0_i32_0 = arith.constant 0 : i32
    %c0_i32_1 = arith.constant 0 : i32
    return %c0_i32, %c0_i32_0 : i32, i32
  }
}

</mosaic_0001>

<bundles_post_ra>
// kernel: _forward.1
= control target key start
LH: loop header
LB: loop body
LE: loop exit
PB: predicated region body
PF: predicated region fallthrough
CT: control target
= control target key end

     0   :  { %17 = vsyncpa [#allocation4], 0  ;;  %s5521_s21 = smov 0   ;;  %s7823_s0 = inlined_call_operand.vmem [shape: s32[1,1024], index: 0, kind: input, shape index: {}]   ;;  %s7824_s1 = inlined_call_operand.vmem [shape: bf16[1024,256], index: 1, kind: input, shape index: {}]   ;;  %s7825_s2 = inlined_call_operand.vmem [shape: f32[64,128], index: 2, kind: input, shape index: {}]   ;;  %s7826_s3 = inlined_call_operand.vmem [shape: bf16[256,128], index: 3, kind: input, shape index: {}]   ;;  %s7827_s4 = inlined_call_operand.vmem [shape: bf16[128,128], index: 4, kind: input, shape index: {}]   ;;  %s7828_s5 = inlined_call_operand.vmem [shape: f32[2,128], index: 5, kind: input, shape index: {}]   ;;  %s7829_s6 = inlined_call_operand.vmem [shape: bf16[128,128], index: 6, kind: input, shape index: {}]   ;;  %s7830_s7 = inlined_call_operand.vmem [shape: bf16[128,128], index: 7, kind: input, shape index: {}]   ;;  %s7831_s8 = inlined_call_operand.vmem [shape: f32[2,128], index: 8, kind: input, shape index: {}]   ;;  %s7832_s9 = inlined_call_operand.vmem [shape: bf16[128,128], index: 9, kind: input, shape index: {}]   ;;  %s7833_s10 = inlined_call_operand.vmem [shape: f32[1,128], index: 10, kind: input, shape index: {}]   ;;  %s7834_s11 = inlined_call_operand.vmem [shape: f32[4,128], index: 11, kind: input, shape index: {}]   ;;  %s7835_s12 = inlined_call_operand.hbm [shape: f32[64,128], index: 12, kind: output, shape index: {}]  }
   0x1 LB: > { %s5527_s22 = sadd.s32 4294967295, %s5448_s21   ;;  %p4302_p0 = scmp.ge.s32.totalorder %s5448_s21, 1  ;;  %s5448_s21 = sphi %s5521_s21, %s23_s21  }
   0x2   : > { %p370_p1 = scmp.lt.s32.totalorder %s5448_s21, 3 }
   0x4   : > { %p371_p2 = pnand %p4302_p0, %p370_p1 }
   0x6   : > { %374 = sbr.rel (%p371_p2) target bundleno = 2113 (0x841), region = 68 }
   0xb   : > { %s4303_s23 = sshll.u32 %s5527_s22, 2  ;;  %s4304_s24 = sshll.u32 %s5527_s22, 6  ;;  %v5536_v0 = vld [vmem:[%s7828_s5] sm:$0x3] }
   0xc   : > { %v5541_v1 = vld [vmem:[%s7831_s8] sm:$0x3]  ;;  %p413_p3 = scmp.lt.s32.totalorder %s4303_s23, 7  ;;  %p418_p4 = scmp.lt.s32.totalorder %s4304_s24, 127 }
   0xd   : > { %7845 = vst [vmem:[#allocation6_spill] sm:$0xff] %v5541_v1  ;;  %v5546_v2 = vld [vmem:[%s7833_s10] sm:$0x1]  ;;  %p4307_p5 = scmp.ne.s32.totalorder %s5527_s22, 0 }
   0xe   : > { %7846 = vst [vmem:[#allocation7_spill] sm:$0xff] %v5546_v2  ;;  %v5551_v3 = vld [vmem:[%s7834_s11] sm:$0xf]  ;;  %s7906_s23 = smov (!%p413_p3, %s4303_s23), 7  ;;  %s7908_s24 = smov (!%p418_p4, %s4304_s24), 127 }
   0xf   : > { %7847 = vst [vmem:[#allocation8_spill] sm:$0xff] %v5551_v3  ;;  %s5556_s17 = scalar_lea.vmem %s7823_s0, %s7906_s23  ;;  %s4922_s18 = sshll.u32 %s7908_s24, 3 }
  0x10   : > { %s5561_s25 = scalar_lea.vmem %s7824_s1, %s4922_s18  ;;  %431 = sbr.rel (%p4307_p5) target bundleno = 30 (0x1e), region = 72 }
  0x15   : > { %v5450_v4 = vmov 0.0  }
  0x16   : > { %432 = vst [vmem:[#allocation2 + $0x30] sm:$0xff] %v5450_v4 }
  0x17   : > { %433 = vst [vmem:[#allocation2] sm:$0xff] %v5450_v4 }
  0x18   : > { %434 = vst [vmem:[#allocation2 + $0x18] sm:$0xff] %v5450_v4 }
  0x19   : > { %435 = vst [vmem:[#allocation2 + $0x10] sm:$0xff] %v5450_v4 }
  0x1a   : > { %436 = vst [vmem:[#allocation2 + $0x8] sm:$0xff] %v5450_v4 }
  0x1b   : > { %437 = vst [vmem:[#allocation2 + $0x20] sm:$0xff] %v5450_v4 }
  0x1c   : > { %438 = vst [vmem:[#allocation2 + $0x28] sm:$0xff] %v5450_v4 }
  0x1d   : > { %439 = vst [vmem:[#allocation2 + $0x38] sm:$0xff] %v5450_v4 }
  0x1e PF: > { %v4994_v5 = vld [vmem:[%s7826_s3 + $0x38] sm:$0xff]  ;;  %v4993_v7 = vld [vmem:[%s7826_s3 + $0x30] sm:$0xff]  ;;  %v4992_v9 = vld [vmem:[%s7826_s3 + $0x28] sm:$0xff]  ;;  %s4660_s30 = sshll.u32 %s5527_s22, 9  ;;  %p4821_p6 = scmp.ne.s32.totalorder %s5527_s22, 1 }
  0x1f   : > { %v5002_v6 = vld [vmem:[%s7826_s3 + $0x78] sm:$0xff]  ;;  %953 = vmatpush.bf16.msra.mxu0 %v4994_v5  ;;  %v5001_v8 = vld [vmem:[%s7826_s3 + $0x70] sm:$0xff]  ;;  %5035 = vmatpush.bf16.msra.mxu3 %v4994_v5  ;;  %v5000_v10 = vld [vmem:[%s7826_s3 + $0x68] sm:$0xff] }
  0x20   : > { %1122 = vmatpush.bf16.msra.mxu1 %v5002_v6  ;;  %v4991_v11 = vld [vmem:[%s7826_s3 + $0x20] sm:$0xff]  ;;  %v4990_v13 = vld [vmem:[%s7826_s3 + $0x18] sm:$0xff]  ;;  %v4989_v15 = vld [vmem:[%s7826_s3 + $0x10] sm:$0xff] }
  0x21   : > { %v4999_v12 = vld [vmem:[%s7826_s3 + $0x60] sm:$0xff]  ;;  %v4998_v14 = vld [vmem:[%s7826_s3 + $0x58] sm:$0xff]  ;;  %v4997_v16 = vld [vmem:[%s7826_s3 + $0x50] sm:$0xff] }
  0x22   : > { %v4988_v17 = vld [vmem:[%s7826_s3 + $0x8] sm:$0xff]  ;;  %v4987_v19 = vld [vmem:[%s7826_s3] sm:$0xff]  ;;  %v4318_v27 = vld [vmem:[%s5561_s25 + $0x10] sm:$0xf] }
  0x23   : > { %954 = vmatpush.bf16.msra.mxu0 %v4993_v7  ;;  %5036 = vmatpush.bf16.msra.mxu3 %v4993_v7  ;;  %v4996_v18 = vld [vmem:[%s7826_s3 + $0x48] sm:$0xff]  ;;  %v4995_v20 = vld [vmem:[%s7826_s3 + $0x40] sm:$0xff]  ;;  %v4926_v28 = vld [vmem:[%s5561_s25 + $0x14] sm:$0xf0] }
  0x24   : > { %1123 = vmatpush.bf16.msra.mxu1 %v5001_v8  ;;  %v4310_v21 = vld [vmem:[%s5561_s25] sm:$0xf]  ;;  %v4924_v22 = vld [vmem:[%s5561_s25 + $0x4] sm:$0xf0]  ;;  %v4923_v23 = vld [vmem:[%s5561_s25 + $0x4] sm:$0xf]  ;;  %v4319_v31 = vor.u32 %v4926_v28, %v4318_v27 }
  0x25   : > { %v4312_v24 = vld [vmem:[%s5561_s25 + $0x8] sm:$0xf0]  ;;  %v4311_v25 = vor.u32 %v4924_v22, %v4310_v21  ;;  %v4925_v29 = vld [vmem:[%s5561_s25 + $0x14] sm:$0xf]  ;;  %v4320_v30 = vld [vmem:[%s5561_s25 + $0x18] sm:$0xf0] }
  0x26   : > { %v4315_v26 = vor.u32 %v4923_v23, %v4312_v24  ;;  %v4323_v32 = vor.u32 %v4925_v29, %v4320_v30  ;;  %v4326_v33 = vld [vmem:[%s5561_s25 + $0x20] sm:$0xf]  ;;  %v4928_v34 = vld [vmem:[%s5561_s25 + $0x24] sm:$0xf0]  ;;  %v4927_v35 = vld [vmem:[%s5561_s25 + $0x24] sm:$0xf] }
  0x27   : > { %955 = vmatpush.bf16.msra.mxu0 %v4992_v9  ;;  %5037 = vmatpush.bf16.msra.mxu3 %v4992_v9  ;;  %v4328_v36 = vld [vmem:[%s5561_s25 + $0x28] sm:$0xf0]  ;;  %v4327_v37 = vor.u32 %v4928_v34, %v4326_v33  ;;  %v4334_v39 = vld [vmem:[%s5561_s25 + $0x30] sm:$0xf]  ;;  %v4930_v40 = vld [vmem:[%s5561_s25 + $0x34] sm:$0xf0] }
  0x28   : > { %1124 = vmatpush.bf16.msra.mxu1 %v5000_v10  ;;  %v4331_v38 = vor.u32 %v4927_v35, %v4328_v36  ;;  %v4929_v41 = vld [vmem:[%s5561_s25 + $0x34] sm:$0xf]  ;;  %v4336_v42 = vld [vmem:[%s5561_s25 + $0x38] sm:$0xf0]  ;;  %v4335_v43 = vor.u32 %v4930_v40, %v4334_v39  ;;  %v4342_v45 = vld [vmem:[%s5561_s25 + $0x40] sm:$0xf] }
  0x29   : > { %v4339_v44 = vor.u32 %v4929_v41, %v4336_v42  ;;  %v4932_v46 = vld [vmem:[%s5561_s25 + $0x44] sm:$0xf0]  ;;  %v4931_v47 = vld [vmem:[%s5561_s25 + $0x44] sm:$0xf]  ;;  %v4344_v48 = vld [vmem:[%s5561_s25 + $0x48] sm:$0xf0] }
  0x2a   : > { %v4343_v49 = vor.u32 %v4932_v46, %v4342_v45  ;;  %v4347_v50 = vor.u32 %v4931_v47, %v4344_v48  ;;  %v4350_v51 = vld [vmem:[%s5561_s25 + $0x50] sm:$0xf]  ;;  %v4934_v52 = vld [vmem:[%s5561_s25 + $0x54] sm:$0xf0]  ;;  %v4933_v53 = vld [vmem:[%s5561_s25 + $0x54] sm:$0xf] }
  0x2b   : > { %956 = vmatpush.bf16.msra.mxu0 %v4991_v11  ;;  %5038 = vmatpush.bf16.msra.mxu3 %v4991_v11  ;;  %v4352_v54 = vld [vmem:[%s5561_s25 + $0x58] sm:$0xf0]  ;;  %v4351_v55 = vor.u32 %v4934_v52, %v4350_v51  ;;  %v4358_v57 = vld [vmem:[%s5561_s25 + $0x60] sm:$0xf]  ;;  %v4936_v58 = vld [vmem:[%s5561_s25 + $0x64] sm:$0xf0] }
  0x2c   : > { %1125 = vmatpush.bf16.msra.mxu1 %v4999_v12  ;;  %v4355_v56 = vor.u32 %v4933_v53, %v4352_v54  ;;  %v4935_v59 = vld [vmem:[%s5561_s25 + $0x64] sm:$0xf]  ;;  %v4360_v60 = vld [vmem:[%s5561_s25 + $0x68] sm:$0xf0]  ;;  %v4359_v61 = vor.u32 %v4936_v58, %v4358_v57  ;;  %v5643_v63 = vld [vmem:[%s7827_s4 + $0x38] sm:$0xff] }
  0x2d   : > { %v4363_v62 = vor.u32 %v4935_v59, %v4360_v60  ;;  %1964 = vmatpush.bf16.msra.mxu2 %v5643_v63  ;;  %v5649_v4 = vld [vmem:[%s7827_s4 + $0x30] sm:$0xff]  ;;  %v4938_v7 = vld [vmem:[%s5561_s25 + $0x74] sm:$0xf0]  ;;  %v4368_v9 = vld [vmem:[%s5561_s25 + $0x78] sm:$0xf0] }
  0x2e   : > { %v4366_v5 = vld [vmem:[%s5561_s25 + $0x70] sm:$0xf]  ;;  %v5696_v23 = vld [vmem:[%s7827_s4] sm:$0xff]  ;;  %v4384_v39 = vld [vmem:[%s5561_s25 + $0x98] sm:$0xf0] }
  0x2f   : > { %957 = vmatpush.bf16.msra.mxu0 %v4990_v13  ;;  %5039 = vmatpush.bf16.msra.mxu3 %v4990_v13  ;;  %v5671_v13 = vld [vmem:[%s7827_s4 + $0x18] sm:$0xff]  ;;  %v4382_v35 = vld [vmem:[%s5561_s25 + $0x90] sm:$0xf]  ;;  %v4390_v60 = vld [vmem:[%s5561_s25 + $0xa0] sm:$0xf] }
  0x30   : > { %1126 = vmatpush.bf16.msra.mxu1 %v4998_v14 }
  0x31   : > { %1965 = vmatpush.bf16.msra.mxu2 %v5649_v4 }
  0x33   : > { %958 = vmatpush.bf16.msra.mxu0 %v4989_v15  ;;  %5040 = vmatpush.bf16.msra.mxu3 %v4989_v15  ;;  %v4374_v15 = vld [vmem:[%s5561_s25 + $0x80] sm:$0xf] }
  0x34   : > { %1127 = vmatpush.bf16.msra.mxu1 %v4997_v16 }
  0x37   : > { %959 = vmatpush.bf16.msra.mxu0 %v4988_v17  ;;  %5041 = vmatpush.bf16.msra.mxu3 %v4988_v17  ;;  %v4940_v17 = vld [vmem:[%s5561_s25 + $0x84] sm:$0xf0] }
  0x38   : > { %1128 = vmatpush.bf16.msra.mxu1 %v4996_v18  ;;  %v4375_v21 = vor.u32 %v4940_v17, %v4374_v15 }
  0x3b   : > { %960 = vmatpush.bf16.msra.mxu0 %v4987_v19  ;;  %5042 = vmatpush.bf16.msra.mxu3 %v4987_v19  ;;  %v4376_v19 = vld [vmem:[%s5561_s25 + $0x88] sm:$0xf0] }
  0x3c   : > { %1129 = vmatpush.bf16.msra.mxu1 %v4995_v20 }
  0x3e   : > { %961 = vmatmul.bf16.vlgmr.msra.gmra.mxu0 %v4311_v25 }
  0x3f   : > { %5043 = vmatpush.bf16.msrb.mxu3 %v5002_v6  ;;  %1130 = vmatmul.bf16.vlgmr.msra.gmra.mxu1 %v4315_v26  ;;  %v5656_v6 = vld [vmem:[%s7827_s4 + $0x28] sm:$0xff] }
  0x40   : > { %1966 = vmatpush.bf16.msra.mxu2 %v5656_v6 }
  0x43   : > { %5044 = vmatpush.bf16.msrb.mxu3 %v5001_v8  ;;  %v4937_v8 = vld [vmem:[%s5561_s25 + $0x74] sm:$0xf] }
  0x44   : > { %v4371_v11 = vor.u32 %v4937_v8, %v4368_v9 }
  0x47   : > { %5045 = vmatpush.bf16.msrb.mxu3 %v5000_v10  ;;  %v4367_v10 = vor.u32 %v4938_v7, %v4366_v5  ;;  %v4943_v5 = vld [vmem:[%s5561_s25 + $0xa4] sm:$0xf]  ;;  %v4392_v7 = vld [vmem:[%s5561_s25 + $0xa8] sm:$0xf0] }
  0x4b   : > { %5046 = vmatpush.bf16.msrb.mxu3 %v4999_v12  ;;  %v5665_v12 = vld [vmem:[%s7827_s4 + $0x20] sm:$0xff] }
  0x4c   : > { %1967 = vmatpush.bf16.msra.mxu2 %v5665_v12 }
  0x4e   : > { %966 = vmatmul.bf16.gmra.mxu0 %v4319_v31 }
  0x4f   : > { %5047 = vmatpush.bf16.msrb.mxu3 %v4998_v14  ;;  %1135 = vmatmul.bf16.gmra.mxu1 %v4323_v32  ;;  %v5677_v14 = vld [vmem:[%s7827_s4 + $0x10] sm:$0xff] }
  0x50   : > { %1968 = vmatpush.bf16.msra.mxu2 %v5671_v13 }
  0x53   : > { %5048 = vmatpush.bf16.msrb.mxu3 %v4997_v16  ;;  %v5684_v16 = vld [vmem:[%s7827_s4 + $0x8] sm:$0xff] }
  0x54   : > { %1969 = vmatpush.bf16.msra.mxu2 %v5677_v14 }
  0x57   : > { %5049 = vmatpush.bf16.msrb.mxu3 %v4996_v18  ;;  %v4939_v18 = vld [vmem:[%s5561_s25 + $0x84] sm:$0xf] }
  0x58   : > { %1970 = vmatpush.bf16.msra.mxu2 %v5684_v16  ;;  %v4379_v22 = vor.u32 %v4939_v18, %v4376_v19  ;;  %v4395_v19 = vor.u32 %v4943_v5, %v4392_v7 }
  0x5b   : > { %5050 = vmatpush.bf16.msrb.mxu3 %v4995_v20  ;;  %v5690_v20 = vperm.slane %v5536_v0, 0 }
  0x5c   : > { %1971 = vmatpush.bf16.msra.mxu2 %v5696_v23 }
  0x5e   : > { %971 = vmatmul.bf16.gmra.mxu0 %v4327_v37  ;;  %v4942_v37 = vld [vmem:[%s5561_s25 + $0x94] sm:$0xf0] }
  0x5f   : > { %1140 = vmatmul.bf16.gmra.mxu1 %v4331_v38  ;;  %v4941_v38 = vld [vmem:[%s5561_s25 + $0x94] sm:$0xf]  ;;  %v4383_v41 = vor.u32 %v4942_v37, %v4382_v35 }
  0x60   : > { %v4387_v42 = vor.u32 %v4941_v38, %v4384_v39 }
  0x6e   : > { %976 = vmatmul.bf16.gmra.mxu0 %v4335_v43 }
  0x6f   : > { %1145 = vmatmul.bf16.gmra.mxu1 %v4339_v44 }
  0x7e   : > { %981 = vmatmul.bf16.gmra.mxu0 %v4343_v49 }
  0x7f   : > { %1150 = vmatmul.bf16.gmra.mxu1 %v4347_v50 }
  0x8e   : > { %986 = vmatmul.bf16.gmra.mxu0 %v4351_v55 }
  0x8f   : > { %1155 = vmatmul.bf16.gmra.mxu1 %v4355_v56 }
  0x9e   : > { %991 = vmatmul.bf16.gmra.mxu0 %v4359_v61  ;;  %v4944_v61 = vld [vmem:[%s5561_s25 + $0xa4] sm:$0xf0] }
  0x9f   : > { %1160 = vmatmul.bf16.gmra.mxu1 %v4363_v62  ;;  %v4391_v18 = vor.u32 %v4944_v61, %v4390_v60 }
  0xae   : > { %996 = vmatmul.bf16.gmra.mxu0 %v4367_v10 }
  0xaf   : > { %1165 = vmatmul.bf16.gmra.mxu1 %v4371_v11 }
  0xbb   : > { %v962_v24 = vpop.f32.mrf.mxu0 }
  0xbc   : > { %v1131_v25 = vpop.f32.mrf.mxu1  ;;  %v963_v26 = vadd.f32 %v962_v24, %v5690_v20 }
  0xbe   : > { %v1132_v27 = vadd.f32 %v1131_v25, %v963_v26  ;;  %1001 = vmatmul.bf16.gmra.mxu0 %v4375_v21 }
  0xbf   : > { %1170 = vmatmul.bf16.gmra.mxu1 %v4379_v22 }
  0xc0   : > { %v1355_v28 = vmul.f32 0.044715, %v1132_v27  ;;  %v1291_v11 = vmul.f32 0.5, %v1132_v27 }
  0xc2   : > { %v1419_v29 = vmul.f32 %v1355_v28, %v1132_v27 }
  0xc3   : > { %v964_v30 = vpop.f32.mrf.mxu0 }
  0xc4   : > { %v1133_v31 = vpop.f32.mrf.mxu1  ;;  %v965_v32 = vadd.f32 %v964_v30, %v5690_v20  ;;  %v1483_v33 = vmul.f32 %v1419_v29, %v1132_v27 }
  0xc6   : > { %v1134_v34 = vadd.f32 %v1133_v31, %v965_v32  ;;  %v1547_v36 = vadd.f32 %v1483_v33, %v1132_v27  ;;  %v4534_v31 = vld [vmem:[%s5561_s25 + $0x1c0] sm:$0xf]  ;;  %v4980_v32 = vld [vmem:[%s5561_s25 + $0x1c4] sm:$0xf0] }
  0xc7   : > { %v4535_v35 = vor.u32 %v4980_v32, %v4534_v31  ;;  %v4408_v31 = vld [vmem:[%s5561_s25 + $0xc8] sm:$0xf0] }
  0xc8   : > { %v1356_v40 = vmul.f32 0.044715, %v1134_v34  ;;  %v1611_v44 = vmul.f32 0.7978846, %v1547_v36  ;;  %v1292_v15 = vmul.f32 0.5, %v1134_v34 }
  0xc9   : > { %1101 = vmatmul.bf16.vlgmr.msra.gmra.mxu3 %v4535_v35 }
  0xca   : > { %v1420_v43 = vmul.f32 %v1356_v40, %v1134_v34  ;;  %5087 = vtanh.f32 %v1611_v44  ;;  %5051 = vmatpush.bf16.msra.mxu3 %v5643_v63 }
  0xcb   : > { %v967_v45 = vpop.f32.mrf.mxu0 }
  0xcc   : > { %v1136_v46 = vpop.f32.mrf.mxu1  ;;  %v968_v47 = vadd.f32 %v967_v45, %v5690_v20  ;;  %v1484_v48 = vmul.f32 %v1420_v43, %v1134_v34  ;;  %v4398_v45 = vld [vmem:[%s5561_s25 + $0xb0] sm:$0xf] }
  0xce   : > { %v5706_v49 = vadd.f32 %v1136_v46, %v968_v47  ;;  %1006 = vmatmul.bf16.gmra.mxu0 %v4383_v41  ;;  %v1548_v50 = vadd.f32 %v1484_v48, %v1134_v34  ;;  %5052 = vmatpush.bf16.msra.mxu3 %v5649_v4  ;;  %v4946_v46 = vld [vmem:[%s5561_s25 + $0xb4] sm:$0xf0]  ;;  %v4945_v48 = vld [vmem:[%s5561_s25 + $0xb4] sm:$0xf] }
  0xcf   : > { %1175 = vmatmul.bf16.gmra.mxu1 %v4387_v42 }
  0xd0   : > { %v1357_v51 = vmul.f32 0.044715, %v5706_v49  ;;  %v1612_v52 = vmul.f32 0.7978846, %v1548_v50  ;;  %v5088_v56 = vpop.eup %5087  ;;  %v4400_v50 = vld [vmem:[%s5561_s25 + $0xb8] sm:$0xf0] }
  0xd1   : > { %v1739_v8 = vadd.f32 1.0, %v5088_v56  ;;  %v4399_v56 = vor.u32 %v4946_v46, %v4398_v45  ;;  %v4403_v4 = vor.u32 %v4945_v48, %v4400_v50  ;;  %v4984_v48 = vld [vmem:[%s5561_s25 + $0x1e4] sm:$0xf0] }
  0xd2   : > { %5089 = vtanh.f32 %v1612_v52  ;;  %v1421_v53 = vmul.f32 %v1357_v51, %v5706_v49  ;;  %5053 = vmatpush.bf16.msra.mxu3 %v5656_v6 }
  0xd3   : > { %v969_v54 = vpop.f32.mrf.mxu0  ;;  %v1803_v26 = vmul.f32 %v1739_v8, %v1291_v11 }
  0xd4   : > { %v1138_v55 = vpop.f32.mrf.mxu1  ;;  %v970_v57 = vadd.f32 %v969_v54, %v5690_v20  ;;  %v1485_v58 = vmul.f32 %v1421_v53, %v5706_v49  ;;  %v1293_v53 = vmul.f32 0.5, %v5706_v49 }
  0xd6   : > { %v1139_v59 = vadd.f32 %v1138_v55, %v970_v57  ;;  %v1549_v62 = vadd.f32 %v1485_v58, %v5706_v49  ;;  %5054 = vmatpush.bf16.msra.mxu3 %v5665_v12 }
  0xd8   : > { %v5090_v9 = vpop.eup %5089  ;;  %v1358_v10 = vmul.f32 0.044715, %v1139_v59  ;;  %v1613_v22 = vmul.f32 0.7978846, %v1549_v62  ;;  %v1294_v54 = vmul.f32 0.5, %v1139_v59 }
  0xd9   : > { %v1740_v17 = vadd.f32 1.0, %v5090_v9  ;;  %v4542_v9 = vld [vmem:[%s5561_s25 + $0x1d0] sm:$0xf] }
  0xda   : > { %v1422_v21 = vmul.f32 %v1358_v10, %v1139_v59  ;;  %5091 = vtanh.f32 %v1613_v22  ;;  %v4982_v10 = vld [vmem:[%s5561_s25 + $0x1d4] sm:$0xf0]  ;;  %5055 = vmatpush.bf16.msra.mxu3 %v5671_v13 }
  0xdb   : > { %v972_v24 = vpop.f32.mrf.mxu0  ;;  %v1804_v28 = vmul.f32 %v1740_v17, %v1292_v15  ;;  %v4543_v11 = vor.u32 %v4982_v10, %v4542_v9 }
  0xdc   : > { %v1141_v25 = vpop.f32.mrf.mxu1  ;;  %v973_v29 = vadd.f32 %v972_v24, %v5690_v20  ;;  %v1486_v30 = vmul.f32 %v1422_v21, %v1139_v59 }
  0xdd   : > { %v1867_v33 = vpack.c.bf16 %v1804_v28, %v1803_v26  ;;  %1106 = vmatmul.bf16.gmra.mxu3 %v4543_v11  ;;  %v4406_v26 = vld [vmem:[%s5561_s25 + $0xc0] sm:$0xf]  ;;  %v4948_v28 = vld [vmem:[%s5561_s25 + $0xc4] sm:$0xf0] }
  0xde   : > { %v5720_v36 = vadd.f32 %v1141_v25, %v973_v29  ;;  %1011 = vmatmul.bf16.gmra.mxu0 %v4391_v18  ;;  %v1550_v27 = vadd.f32 %v1486_v30, %v1139_v59  ;;  %5056 = vmatpush.bf16.msra.mxu3 %v5677_v14  ;;  %v4947_v30 = vld [vmem:[%s5561_s25 + $0xc4] sm:$0xf] }
  0xdf   : > { %1180 = vmatmul.bf16.gmra.mxu1 %v4395_v19  ;;  %1972 = vmatmul.bf16.vlgmr.msra.gmra.mxu2 %v1867_v33  ;;  %v4411_v14 = vor.u32 %v4947_v30, %v4408_v31 }
  0xe0   : > { %v1359_v34 = vmul.f32 0.044715, %v5720_v36  ;;  %v1614_v37 = vmul.f32 0.7978846, %v1550_v27  ;;  %v5092_v41 = vpop.eup %5091  ;;  %v1295_v35 = vmul.f32 0.5, %v5720_v36 }
  0xe1   : > { %v1741_v63 = vadd.f32 1.0, %v5092_v41 }
  0xe2   : > { %5093 = vtanh.f32 %v1614_v37  ;;  %v1423_v38 = vmul.f32 %v1359_v34, %v5720_v36  ;;  %5057 = vmatpush.bf16.msra.mxu3 %v5684_v16  ;;  %v4407_v37 = vor.u32 %v4948_v28, %v4406_v26  ;;  %v4558_v26 = vld [vmem:[%s5561_s25 + $0x1f0] sm:$0xf]  ;;  %v4986_v28 = vld [vmem:[%s5561_s25 + $0x1f4] sm:$0xf0] }
  0xe3   : > { %v974_v39 = vpop.f32.mrf.mxu0  ;;  %v1805_v62 = vmul.f32 %v1741_v63, %v1293_v53  ;;  %v4559_v30 = vor.u32 %v4986_v28, %v4558_v26 }
  0xe4   : > { %v1143_v40 = vpop.f32.mrf.mxu1  ;;  %v975_v42 = vadd.f32 %v974_v39, %v5690_v20  ;;  %v1487_v43 = vmul.f32 %v1423_v38, %v5720_v36 }
  0xe6   : > { %v1144_v44 = vadd.f32 %v1143_v40, %v975_v42  ;;  %v1551_v47 = vadd.f32 %v1487_v43, %v5720_v36  ;;  %5058 = vmatpush.bf16.msra.mxu3 %v5696_v23 }
  0xe8   : > { %v5094_v51 = vpop.eup %5093  ;;  %v1360_v52 = vmul.f32 0.044715, %v1144_v44  ;;  %v1615_v58 = vmul.f32 0.7978846, %v1551_v47  ;;  %v1296_v27 = vmul.f32 0.5, %v1144_v44 }
  0xe9   : > { %v1742_v55 = vadd.f32 1.0, %v5094_v51  ;;  %v4550_v47 = vld [vmem:[%s5561_s25 + $0x1e0] sm:$0xf] }
  0xea   : > { %v1424_v57 = vmul.f32 %v1360_v52, %v1144_v44  ;;  %5095 = vtanh.f32 %v1615_v58  ;;  %v4551_v50 = vor.u32 %v4984_v48, %v4550_v47  ;;  %v4950_v58 = vld [vmem:[%s5561_s25 + $0xd4] sm:$0xf0] }
  0xeb   : > { %v977_v60 = vpop.f32.mrf.mxu0  ;;  %v1806_v5 = vmul.f32 %v1742_v55, %v1294_v54 }
  0xec   : > { %v1146_v61 = vpop.f32.mrf.mxu1  ;;  %v978_v7 = vadd.f32 %v977_v60, %v5690_v20  ;;  %v1488_v8 = vmul.f32 %v1424_v57, %v1144_v44  ;;  %v4414_v57 = vld [vmem:[%s5561_s25 + $0xd0] sm:$0xf] }
  0xed   : > { %v1868_v6 = vpack.c.bf16 %v1806_v5, %v1805_v62  ;;  %1111 = vmatmul.bf16.gmra.mxu3 %v4551_v50  ;;  %v4416_v62 = vld [vmem:[%s5561_s25 + $0xd8] sm:$0xf0]  ;;  %v4415_v11 = vor.u32 %v4950_v58, %v4414_v57  ;;  %v4979_v57 = vld [vmem:[%s5561_s25 + $0x1c4] sm:$0xf]  ;;  %v4536_v58 = vld [vmem:[%s5561_s25 + $0x1c8] sm:$0xf0] }
  0xee   : > { %v5739_v49 = vadd.f32 %v1146_v61, %v978_v7  ;;  %1016 = vmatmul.bf16.gmra.mxu0 %v4399_v56  ;;  %v1552_v59 = vadd.f32 %v1488_v8, %v1144_v44  ;;  %v4949_v61 = vld [vmem:[%s5561_s25 + $0xd4] sm:$0xf] }
  0xef   : > { %1185 = vmatmul.bf16.gmra.mxu1 %v4403_v4  ;;  %1977 = vmatmul.bf16.gmra.mxu2 %v1868_v6 }
  0xf0   : > { %v1361_v15 = vmul.f32 0.044715, %v5739_v49  ;;  %v1616_v17 = vmul.f32 0.7978846, %v1552_v59  ;;  %v5096_v21 = vpop.eup %5095  ;;  %v1297_v9 = vmul.f32 0.5, %v5739_v49  ;;  %v4419_v59 = vor.u32 %v4949_v61, %v4416_v62 }
  0xf1   : > { %v1743_v13 = vadd.f32 1.0, %v5096_v21  ;;  %v4539_v61 = vor.u32 %v4979_v57, %v4536_v58 }
  0xf2   : > { %5097 = vtanh.f32 %v1616_v17  ;;  %v1425_v12 = vmul.f32 %v1361_v15, %v5739_v49 }
  0xf3   : > { %v979_v18 = vpop.f32.mrf.mxu0  ;;  %v1807_v42 = vmul.f32 %v1743_v13, %v1295_v35 }
  0xf4   : > { %v1148_v19 = vpop.f32.mrf.mxu1  ;;  %v980_v22 = vadd.f32 %v979_v18, %v5690_v20  ;;  %v1489_v24 = vmul.f32 %v1425_v12, %v5739_v49 }
  0xf6   : > { %v1149_v25 = vadd.f32 %v1148_v19, %v980_v22  ;;  %v1553_v29 = vadd.f32 %v1489_v24, %v5739_v49 }
  0xf8   : > { %v5098_v32 = vpop.eup %5097  ;;  %v1362_v33 = vmul.f32 0.044715, %v1149_v25  ;;  %v1617_v39 = vmul.f32 0.7978846, %v1553_v29  ;;  %v1298_v10 = vmul.f32 0.5, %v1149_v25 }
  0xf9   : > { %v1744_v34 = vadd.f32 1.0, %v5098_v32 }
  0xfa   : > { %v1426_v38 = vmul.f32 %v1362_v33, %v1149_v25  ;;  %5099 = vtanh.f32 %v1617_v39  ;;  %v4952_v39 = vld [vmem:[%s5561_s25 + $0xe4] sm:$0xf0] }
  0xfb   : > { %v982_v40 = vpop.f32.mrf.mxu0  ;;  %v1808_v43 = vmul.f32 %v1744_v34, %v1296_v27 }
  0xfc   : > { %v1151_v41 = vpop.f32.mrf.mxu1  ;;  %v983_v45 = vadd.f32 %v982_v40, %v5690_v20  ;;  %v1490_v46 = vmul.f32 %v1426_v38, %v1149_v25  ;;  %v4422_v38 = vld [vmem:[%s5561_s25 + $0xe0] sm:$0xf] }
  0xfd   : > { %v1869_v16 = vpack.c.bf16 %v1808_v43, %v1807_v42  ;;  %1116 = vmatmul.bf16.gmra.mxu3 %v4559_v30  ;;  %v4424_v42 = vld [vmem:[%s5561_s25 + $0xe8] sm:$0xf0]  ;;  %v4423_v50 = vor.u32 %v4952_v39, %v4422_v38  ;;  %v4981_v38 = vld [vmem:[%s5561_s25 + $0x1d4] sm:$0xf]  ;;  %v4544_v39 = vld [vmem:[%s5561_s25 + $0x1d8] sm:$0xf0] }
  0xfe   : > { %v5758_v36 = vadd.f32 %v1151_v41, %v983_v45  ;;  %1021 = vmatmul.bf16.gmra.mxu0 %v4407_v37  ;;  %v1554_v44 = vadd.f32 %v1490_v46, %v1149_v25  ;;  %v4951_v41 = vld [vmem:[%s5561_s25 + $0xe4] sm:$0xf] }
  0xff   : > { %1190 = vmatmul.bf16.gmra.mxu1 %v4411_v14  ;;  %1982 = vmatmul.bf16.gmra.mxu2 %v1869_v16 }
 0x100   : > { %v1363_v63 = vmul.f32 0.044715, %v5758_v36  ;;  %v1618_v51 = vmul.f32 0.7978846, %v1554_v44  ;;  %v5100_v54 = vpop.eup %5099  ;;  %v1299_v47 = vmul.f32 0.5, %v5758_v36  ;;  %v4427_v44 = vor.u32 %v4951_v41, %v4424_v42 }
 0x101   : > { %v1745_v5 = vadd.f32 1.0, %v5100_v54  ;;  %v4547_v41 = vor.u32 %v4981_v38, %v4544_v39 }
 0x102   : > { %5101 = vtanh.f32 %v1618_v51  ;;  %v1427_v23 = vmul.f32 %v1363_v63, %v5758_v36 }
 0x103   : > { %v984_v52 = vpop.f32.mrf.mxu0  ;;  %v1809_v19 = vmul.f32 %v1745_v5, %v1297_v9 }
 0x104   : > { %v1153_v53 = vpop.f32.mrf.mxu1  ;;  %v985_v55 = vadd.f32 %v984_v52, %v5690_v20  ;;  %v1491_v56 = vmul.f32 %v1427_v23, %v5758_v36 }
 0x106   : > { %v1154_v4 = vadd.f32 %v1153_v53, %v985_v55  ;;  %v1555_v60 = vadd.f32 %v1491_v56, %v5758_v36 }
 0x108   : > { %v5102_v7 = vpop.eup %5101  ;;  %v1364_v8 = vmul.f32 0.044715, %v1154_v4  ;;  %v1619_v17 = vmul.f32 0.7978846, %v1555_v60  ;;  %v1300_v48 = vmul.f32 0.5, %v1154_v4 }
 0x109   : > { %v1746_v6 = vadd.f32 1.0, %v5102_v7 }
 0x10a   : > { %v1428_v15 = vmul.f32 %v1364_v8, %v1154_v4  ;;  %5103 = vtanh.f32 %v1619_v17  ;;  %v4954_v17 = vld [vmem:[%s5561_s25 + $0xf4] sm:$0xf0] }
 0x10b   : > { %v987_v12 = vpop.f32.mrf.mxu0  ;;  %v1810_v21 = vmul.f32 %v1746_v6, %v1298_v10 }
 0x10c   : > { %v1156_v18 = vpop.f32.mrf.mxu1  ;;  %v988_v22 = vadd.f32 %v987_v12, %v5690_v20  ;;  %v1492_v24 = vmul.f32 %v1428_v15, %v1154_v4  ;;  %v4430_v15 = vld [vmem:[%s5561_s25 + $0xf0] sm:$0xf] }
 0x10d   : > { %v1870_v29 = vpack.c.bf16 %v1810_v21, %v1809_v19  ;;  %1270 = vmatmul.bf16.vlgmr.msrb.gmra.mxu3 %v4539_v61  ;;  %v4432_v19 = vld [vmem:[%s5561_s25 + $0xf8] sm:$0xf0]  ;;  %v4431_v30 = vor.u32 %v4954_v17, %v4430_v15  ;;  %v4983_v15 = vld [vmem:[%s5561_s25 + $0x1e4] sm:$0xf]  ;;  %v4552_v17 = vld [vmem:[%s5561_s25 + $0x1e8] sm:$0xf0] }
 0x10e   : > { %v5773_v31 = vadd.f32 %v1156_v18, %v988_v22  ;;  %1026 = vmatmul.bf16.gmra.mxu0 %v4415_v11  ;;  %v1556_v49 = vadd.f32 %v1492_v24, %v1154_v4  ;;  %v4953_v18 = vld [vmem:[%s5561_s25 + $0xf4] sm:$0xf] }
 0x10f   : > { %1195 = vmatmul.bf16.gmra.mxu1 %v4419_v59  ;;  %1987 = vmatmul.bf16.gmra.mxu2 %v1870_v29 }
 0x110   : > { %v1365_v25 = vmul.f32 0.044715, %v5773_v31  ;;  %v1620_v13 = vmul.f32 0.7978846, %v1556_v49  ;;  %v5104_v27 = vpop.eup %5103  ;;  %v1301_v26 = vmul.f32 0.5, %v5773_v31  ;;  %v4435_v49 = vor.u32 %v4953_v18, %v4432_v19 }
 0x111   : > { %v1747_v43 = vadd.f32 1.0, %v5104_v27  ;;  %v4555_v18 = vor.u32 %v4983_v15, %v4552_v17 }
 0x112   : > { %5105 = vtanh.f32 %v1620_v13  ;;  %v1429_v32 = vmul.f32 %v1365_v25, %v5773_v31 }
 0x113   : > { %v989_v33 = vpop.f32.mrf.mxu0  ;;  %v1811_v53 = vmul.f32 %v1747_v43, %v1299_v47 }
 0x114   : > { %v1158_v35 = vpop.f32.mrf.mxu1  ;;  %v990_v34 = vadd.f32 %v989_v33, %v5690_v20  ;;  %v1493_v37 = vmul.f32 %v1429_v32, %v5773_v31 }
 0x116   : > { %v1159_v14 = vadd.f32 %v1158_v35, %v990_v34  ;;  %v1557_v40 = vadd.f32 %v1493_v37, %v5773_v31 }
 0x118   : > { %v5106_v45 = vpop.eup %5105  ;;  %v1366_v46 = vmul.f32 0.044715, %v1159_v14  ;;  %v1621_v51 = vmul.f32 0.7978846, %v1557_v40  ;;  %v1302_v28 = vmul.f32 0.5, %v1159_v14 }
 0x119   : > { %v1748_v16 = vadd.f32 1.0, %v5106_v45 }
 0x11a   : > { %v1430_v63 = vmul.f32 %v1366_v46, %v1159_v14  ;;  %5107 = vtanh.f32 %v1621_v51  ;;  %v4956_v51 = vld [vmem:[%s5561_s25 + $0x104] sm:$0xf0] }
 0x11b   : > { %v992_v23 = vpop.f32.mrf.mxu0  ;;  %v1812_v54 = vmul.f32 %v1748_v16, %v1300_v48 }
 0x11c   : > { %v1161_v52 = vpop.f32.mrf.mxu1  ;;  %v993_v55 = vadd.f32 %v992_v23, %v5690_v20  ;;  %v1494_v56 = vmul.f32 %v1430_v63, %v1159_v14  ;;  %v4438_v63 = vld [vmem:[%s5561_s25 + $0x100] sm:$0xf] }
 0x11d   : > { %v1871_v60 = vpack.c.bf16 %v1812_v54, %v1811_v53  ;;  %1275 = vmatmul.bf16.gmra.mxu3 %v4547_v41  ;;  %v4440_v53 = vld [vmem:[%s5561_s25 + $0x108] sm:$0xf0]  ;;  %v4439_v61 = vor.u32 %v4956_v51, %v4438_v63  ;;  %v4985_v63 = vld [vmem:[%s5561_s25 + $0x1f4] sm:$0xf]  ;;  %v4560_v51 = vld [vmem:[%s5561_s25 + $0x1f8] sm:$0xf0] }
 0x11e   : > { %v5788_v62 = vadd.f32 %v1161_v52, %v993_v55  ;;  %1031 = vmatmul.bf16.gmra.mxu0 %v4423_v50  ;;  %v1558_v36 = vadd.f32 %v1494_v56, %v1159_v14  ;;  %v4955_v52 = vld [vmem:[%s5561_s25 + $0x104] sm:$0xf] }
 0x11f   : > { %1200 = vmatmul.bf16.gmra.mxu1 %v4427_v44  ;;  %1992 = vmatmul.bf16.gmra.mxu2 %v1871_v60 }
 0x120   : > { %v1367_v4 = vmul.f32 0.044715, %v5788_v62  ;;  %v1622_v5 = vmul.f32 0.7978846, %v1558_v36  ;;  %v5108_v10 = vpop.eup %5107  ;;  %v1303_v57 = vmul.f32 0.5, %v5788_v62  ;;  %v4443_v36 = vor.u32 %v4955_v52, %v4440_v53 }
 0x121   : > { %v1749_v21 = vadd.f32 1.0, %v5108_v10  ;;  %v4563_v52 = vor.u32 %v4985_v63, %v4560_v51 }
 0x122   : > { %5109 = vtanh.f32 %v1622_v5  ;;  %v1431_v7 = vmul.f32 %v1367_v4, %v5788_v62 }
 0x123   : > { %v994_v8 = vpop.f32.mrf.mxu0  ;;  %v1813_v35 = vmul.f32 %v1749_v21, %v1301_v26 }
 0x124   : > { %v1163_v9 = vpop.f32.mrf.mxu1  ;;  %v995_v6 = vadd.f32 %v994_v8, %v5690_v20  ;;  %v1495_v11 = vmul.f32 %v1431_v7, %v5788_v62 }
 0x126   : > { %v1164_v59 = vadd.f32 %v1163_v9, %v995_v6  ;;  %v1559_v12 = vadd.f32 %v1495_v11, %v5788_v62 }
 0x128   : > { %v5110_v22 = vpop.eup %5109  ;;  %v1368_v24 = vmul.f32 0.044715, %v1164_v59  ;;  %v1623_v13 = vmul.f32 0.7978846, %v1559_v12  ;;  %v1304_v58 = vmul.f32 0.5, %v1164_v59 }
 0x129   : > { %v1750_v29 = vadd.f32 1.0, %v5110_v22 }
 0x12a   : > { %v1432_v25 = vmul.f32 %v1368_v24, %v1164_v59  ;;  %5111 = vtanh.f32 %v1623_v13  ;;  %v4958_v13 = vld [vmem:[%s5561_s25 + $0x114] sm:$0xf0] }
 0x12b   : > { %v997_v32 = vpop.f32.mrf.mxu0  ;;  %v1814_v27 = vmul.f32 %v1750_v29, %v1302_v28 }
 0x12c   : > { %v1166_v33 = vpop.f32.mrf.mxu1  ;;  %v998_v34 = vadd.f32 %v997_v32, %v5690_v20  ;;  %v1496_v37 = vmul.f32 %v1432_v25, %v1164_v59  ;;  %v4446_v25 = vld [vmem:[%s5561_s25 + $0x110] sm:$0xf] }
 0x12d   : > { %v1872_v40 = vpack.c.bf16 %v1814_v27, %v1813_v35  ;;  %1280 = vmatmul.bf16.gmra.mxu3 %v4555_v18  ;;  %v4448_v35 = vld [vmem:[%s5561_s25 + $0x118] sm:$0xf0]  ;;  %v4447_v41 = vor.u32 %v4958_v13, %v4446_v25 }
 0x12e   : > { %v5803_v42 = vadd.f32 %v1166_v33, %v998_v34  ;;  %1036 = vmatmul.bf16.gmra.mxu0 %v4431_v30  ;;  %v1560_v31 = vadd.f32 %v1496_v37, %v1164_v59  ;;  %v4957_v33 = vld [vmem:[%s5561_s25 + $0x114] sm:$0xf] }
 0x12f   : > { %1205 = vmatmul.bf16.gmra.mxu1 %v4435_v49  ;;  %1997 = vmatmul.bf16.gmra.mxu2 %v1872_v40 }
 0x130   : > { %v1369_v14 = vmul.f32 0.044715, %v5803_v42  ;;  %v1624_v43 = vmul.f32 0.7978846, %v1560_v31  ;;  %v5112_v48 = vpop.eup %5111  ;;  %v1305_v38 = vmul.f32 0.5, %v5803_v42  ;;  %v4451_v31 = vor.u32 %v4957_v33, %v4448_v35 }
 0x131   : > { %v1751_v54 = vadd.f32 1.0, %v5112_v48 }
 0x132   : > { %5113 = vtanh.f32 %v1624_v43  ;;  %v1433_v45 = vmul.f32 %v1369_v14, %v5803_v42 }
 0x133   : > { %v999_v46 = vpop.f32.mrf.mxu0  ;;  %v1815_v9 = vmul.f32 %v1751_v54, %v1303_v57 }
 0x134   : > { %v1168_v47 = vpop.f32.mrf.mxu1  ;;  %v1000_v16 = vadd.f32 %v999_v46, %v5690_v20  ;;  %v1497_v50 = vmul.f32 %v1433_v45, %v5803_v42 }
 0x136   : > { %v1169_v44 = vadd.f32 %v1168_v47, %v1000_v16  ;;  %v1561_v23 = vadd.f32 %v1497_v50, %v5803_v42 }
 0x138   : > { %v5114_v55 = vpop.eup %5113  ;;  %v1370_v56 = vmul.f32 0.044715, %v1169_v44  ;;  %v1625_v5 = vmul.f32 0.7978846, %v1561_v23  ;;  %v1306_v39 = vmul.f32 0.5, %v1169_v44 }
 0x139   : > { %v1752_v60 = vadd.f32 1.0, %v5114_v55 }
 0x13a   : > { %v1434_v4 = vmul.f32 %v1370_v56, %v1169_v44  ;;  %5115 = vtanh.f32 %v1625_v5  ;;  %v4960_v5 = vld [vmem:[%s5561_s25 + $0x124] sm:$0xf0] }
 0x13b   : > { %v1002_v7 = vpop.f32.mrf.mxu0  ;;  %v1816_v10 = vmul.f32 %v1752_v60, %v1304_v58 }
 0x13c   : > { %v1171_v8 = vpop.f32.mrf.mxu1  ;;  %v1003_v6 = vadd.f32 %v1002_v7, %v5690_v20  ;;  %v1498_v11 = vmul.f32 %v1434_v4, %v1169_v44  ;;  %v4454_v4 = vld [vmem:[%s5561_s25 + $0x120] sm:$0xf] }
 0x13d   : > { %v1873_v12 = vpack.c.bf16 %v1816_v10, %v1815_v9  ;;  %1285 = vmatmul.bf16.gmra.mxu3 %v4563_v52  ;;  %v4456_v9 = vld [vmem:[%s5561_s25 + $0x128] sm:$0xf0]  ;;  %v4455_v18 = vor.u32 %v4960_v5, %v4454_v4 }
 0x13e   : > { %v5818_v19 = vadd.f32 %v1171_v8, %v1003_v6  ;;  %1041 = vmatmul.bf16.gmra.mxu0 %v4439_v61  ;;  %v1562_v62 = vadd.f32 %v1498_v11, %v1169_v44  ;;  %v4959_v8 = vld [vmem:[%s5561_s25 + $0x124] sm:$0xf] }
 0x13f   : > { %1210 = vmatmul.bf16.gmra.mxu1 %v4443_v36  ;;  %2002 = vmatmul.bf16.gmra.mxu2 %v1873_v12 }
 0x140   : > { %v1371_v59 = vmul.f32 0.044715, %v5818_v19  ;;  %v1626_v21 = vmul.f32 0.7978846, %v1562_v62  ;;  %v5116_v28 = vpop.eup %5115  ;;  %v1307_v15 = vmul.f32 0.5, %v5818_v19  ;;  %v4459_v62 = vor.u32 %v4959_v8, %v4456_v9 }
 0x141   : > { %v1753_v27 = vadd.f32 1.0, %v5116_v28 }
 0x142   : > { %5117 = vtanh.f32 %v1626_v21  ;;  %v1435_v22 = vmul.f32 %v1371_v59, %v5818_v19 }
 0x143   : > { %v1004_v24 = vpop.f32.mrf.mxu0  ;;  %v1817_v47 = vmul.f32 %v1753_v27, %v1305_v38 }
 0x144   : > { %v1173_v26 = vpop.f32.mrf.mxu1  ;;  %v1005_v29 = vadd.f32 %v1004_v24, %v5690_v20  ;;  %v1499_v30 = vmul.f32 %v1435_v22, %v5818_v19 }
 0x146   : > { %v1174_v49 = vadd.f32 %v1173_v26, %v1005_v29  ;;  %v1563_v32 = vadd.f32 %v1499_v30, %v5818_v19  ;;  %v5849_v19 = vperm.slane %v5536_v0, 1 }
 0x148   : > { %v5118_v34 = vpop.eup %5117  ;;  %v1372_v37 = vmul.f32 0.044715, %v1174_v49  ;;  %v1627_v43 = vmul.f32 0.7978846, %v1563_v32  ;;  %v1308_v17 = vmul.f32 0.5, %v1174_v49 }
 0x149   : > { %v1754_v40 = vadd.f32 1.0, %v5118_v34 }
 0x14a   : > { %v1436_v14 = vmul.f32 %v1372_v37, %v1174_v49  ;;  %5119 = vtanh.f32 %v1627_v43  ;;  %v4462_v43 = vld [vmem:[%s5561_s25 + $0x130] sm:$0xf] }
 0x14b   : > { %v1007_v45 = vpop.f32.mrf.mxu0  ;;  %v1818_v48 = vmul.f32 %v1754_v40, %v1306_v39 }
 0x14c   : > { %v1176_v46 = vpop.f32.mrf.mxu1  ;;  %v1008_v16 = vadd.f32 %v1007_v45, %v5690_v20  ;;  %v1500_v50 = vmul.f32 %v1436_v14, %v1174_v49  ;;  %v5853_v34 = vpop.f32.mrf.mxu3  ;;  %v4962_v45 = vld [vmem:[%s5561_s25 + $0x134] sm:$0xf0] }
 0x14d   : > { %v1874_v23 = vpack.c.bf16 %v1818_v48, %v1817_v47  ;;  %v4961_v48 = vld [vmem:[%s5561_s25 + $0x134] sm:$0xf] }
 0x14e   : > { %v5833_v53 = vadd.f32 %v1176_v46, %v1008_v16  ;;  %1046 = vmatmul.bf16.gmra.mxu0 %v4447_v41  ;;  %v1564_v42 = vadd.f32 %v1500_v50, %v1174_v49  ;;  %v4464_v16 = vld [vmem:[%s5561_s25 + $0x138] sm:$0xf0] }
 0x14f   : > { %1215 = vmatmul.bf16.gmra.mxu1 %v4451_v31  ;;  %2007 = vmatmul.bf16.gmra.mxu2 %v1874_v23 }
 0x150   : > { %v1373_v44 = vmul.f32 0.044715, %v5833_v53  ;;  %v1628_v54 = vmul.f32 0.7978846, %v1564_v42  ;;  %v5120_v58 = vpop.eup %5119  ;;  %v1309_v52 = vmul.f32 0.5, %v5833_v53 }
 0x151   : > { %v1755_v10 = vadd.f32 1.0, %v5120_v58 }
 0x152   : > { %5121 = vtanh.f32 %v1628_v54  ;;  %v1437_v55 = vmul.f32 %v1373_v44, %v5833_v53 }
 0x153   : > { %v1009_v56 = vpop.f32.mrf.mxu0  ;;  %v1819_v26 = vmul.f32 %v1755_v10, %v1307_v15 }
 0x154   : > { %v1178_v57 = vpop.f32.mrf.mxu1  ;;  %v1010_v60 = vadd.f32 %v1009_v56, %v5690_v20  ;;  %v1501_v61 = vmul.f32 %v1437_v55, %v5833_v53  ;;  %v4463_v55 = vor.u32 %v4962_v45, %v4462_v43  ;;  %v4467_v56 = vor.u32 %v4961_v48, %v4464_v16 }
 0x156   : > { %v1179_v36 = vadd.f32 %v1178_v57, %v1010_v60  ;;  %v1565_v7 = vadd.f32 %v1501_v61, %v5833_v53  ;;  %v5873_v60 = vpop.f32.mrf.mxu3 }
 0x158   : > { %v5122_v6 = vpop.eup %5121  ;;  %v1374_v11 = vmul.f32 0.044715, %v1179_v36  ;;  %v1629_v21 = vmul.f32 0.7978846, %v1565_v7  ;;  %v1310_v42 = vmul.f32 0.5, %v1179_v36 }
 0x159   : > { %v1756_v12 = vadd.f32 1.0, %v5122_v6 }
 0x15a   : > { %v1438_v59 = vmul.f32 %v1374_v11, %v1179_v36  ;;  %5123 = vtanh.f32 %v1629_v21 }
 0x15b   : > { %v1012_v22 = vpop.f32.mrf.mxu0  ;;  %v1820_v28 = vmul.f32 %v1756_v12, %v1308_v17 }
 0x15c   : > { %v1181_v24 = vpop.f32.mrf.mxu1  ;;  %v1013_v29 = vadd.f32 %v1012_v22, %v5690_v20  ;;  %v1502_v30 = vmul.f32 %v1438_v59, %v1179_v36 }
 0x15d   : > { %v1875_v25 = vpack.c.bf16 %v1820_v28, %v1819_v26 }
 0x15e   : > { %v5846_v13 = vadd.f32 %v1181_v24, %v1013_v29  ;;  %1051 = vmatmul.bf16.gmra.mxu0 %v4455_v18  ;;  %v1566_v32 = vadd.f32 %v1502_v30, %v1179_v36 }
 0x15f   : > { %1220 = vmatmul.bf16.gmra.mxu1 %v4459_v62  ;;  %2012 = vmatmul.bf16.gmra.mxu2 %v1875_v25 }
 0x160   : > { %v1375_v49 = vmul.f32 0.044715, %v5846_v13  ;;  %v1630_v33 = vmul.f32 0.7978846, %v1566_v32  ;;  %v5124_v40 = vpop.eup %5123  ;;  %v5889_v24 = vpop.f32.mrf.mxu3  ;;  %v1311_v48 = vmul.f32 0.5, %v5846_v13 }
 0x161   : > { %v1757_v50 = vadd.f32 1.0, %v5124_v40 }
 0x162   : > { %v1973_v35 = vpop.f32.mrf.mxu2  ;;  %5125 = vtanh.f32 %v1630_v33  ;;  %v1439_v27 = vmul.f32 %v1375_v49, %v5846_v13 }
 0x163   : > { %v5856_v37 = vadd.f32 %v1973_v35, %v5849_v19  ;;  %v1014_v38 = vpop.f32.mrf.mxu0  ;;  %v1821_v7 = vmul.f32 %v1757_v50, %v1309_v52 }
 0x164   : > { %v1183_v39 = vpop.f32.mrf.mxu1  ;;  %v1015_v0 = vadd.f32 %v1014_v38, %v5690_v20  ;;  %v1503_v41 = vmul.f32 %v1439_v27, %v5846_v13  ;;  %v4470_v38 = vld [vmem:[%s5561_s25 + $0x140] sm:$0xf] }
 0x165   : > { %v2197_v31 = vmul.f32 0.044715, %v5856_v37 }
 0x166   : > { %v5861_v14 = vadd.f32 %v1183_v39, %v1015_v0  ;;  %v1567_v46 = vadd.f32 %v1503_v41, %v5846_v13  ;;  %v4964_v39 = vld [vmem:[%s5561_s25 + $0x144] sm:$0xf0]  ;;  %v4963_v41 = vld [vmem:[%s5561_s25 + $0x144] sm:$0xf] }
 0x167   : > { %v2261_v47 = vmul.f32 %v2197_v31, %v5856_v37  ;;  %v4472_v31 = vld [vmem:[%s5561_s25 + $0x148] sm:$0xf0] }
 0x168   : > { %v5126_v63 = vpop.eup %5125  ;;  %v1376_v51 = vmul.f32 0.044715, %v5861_v14  ;;  %v1631_v58 = vmul.f32 0.7978846, %v1567_v46  ;;  %v1312_v16 = vmul.f32 0.5, %v5861_v14  ;;  %v4475_v52 = vor.u32 %v4963_v41, %v4472_v31 }
 0x169   : > { %v2325_v23 = vmul.f32 %v2261_v47, %v5856_v37  ;;  %v1758_v44 = vadd.f32 1.0, %v5126_v63  ;;  %v4478_v31 = vld [vmem:[%s5561_s25 + $0x150] sm:$0xf] }
 0x16a   : > { %v1975_v54 = vpop.f32.mrf.mxu2  ;;  %v1440_v57 = vmul.f32 %v1376_v51, %v5861_v14  ;;  %5127 = vtanh.f32 %v1631_v58 }
 0x16b   : > { %v5876_v61 = vadd.f32 %v1975_v54, %v5849_v19  ;;  %v1017_v4 = vpop.f32.mrf.mxu0  ;;  %v1822_v8 = vmul.f32 %v1758_v44, %v1310_v42  ;;  %v2389_v9 = vadd.f32 %v2325_v23, %v5856_v37  ;;  %v4471_v23 = vor.u32 %v4964_v39, %v4470_v38  ;;  %v5911_v54 = vpop.f32.mrf.mxu3 }
 0x16c   : > { %v1186_v5 = vpop.f32.mrf.mxu1  ;;  %v1018_v53 = vadd.f32 %v1017_v4, %v5690_v20  ;;  %v1504_v36 = vmul.f32 %v1440_v57, %v5861_v14 }
 0x16d   : > { %v2198_v10 = vmul.f32 0.044715, %v5876_v61  ;;  %v1876_v6 = vpack.c.bf16 %v1822_v8, %v1821_v7  ;;  %v2453_v12 = vmul.f32 0.7978846, %v2389_v9 }
 0x16e   : > { %v5882_v11 = vadd.f32 %v1186_v5, %v1018_v53  ;;  %1056 = vmatmul.bf16.gmra.mxu0 %v4463_v55  ;;  %v1568_v15 = vadd.f32 %v1504_v36, %v5861_v14 }
 0x16f   : > { %1225 = vmatmul.bf16.gmra.mxu1 %v4467_v56  ;;  %v2262_v17 = vmul.f32 %v2198_v10, %v5876_v61  ;;  %2017 = vmatmul.bf16.gmra.mxu2 %v1876_v6 }
 0x170   : > { %v1377_v18 = vmul.f32 0.044715, %v5882_v11  ;;  %v1632_v62 = vmul.f32 0.7978846, %v1568_v15  ;;  %v5128_v25 = vpop.eup %5127  ;;  %v2133_v15 = vmul.f32 0.5, %v5856_v37 }
 0x171   : > { %v2326_v59 = vmul.f32 %v2262_v17, %v5876_v61  ;;  %v1759_v43 = vadd.f32 1.0, %v5128_v25  ;;  %v2134_v17 = vmul.f32 0.5, %v5876_v61 }
 0x172   : > { %v1978_v21 = vpop.f32.mrf.mxu2  ;;  %5129 = vtanh.f32 %v1632_v62  ;;  %v1441_v22 = vmul.f32 %v1377_v18, %v5882_v11 }
 0x173   : > { %v5892_v26 = vadd.f32 %v1978_v21, %v5849_v19  ;;  %v1019_v28 = vpop.f32.mrf.mxu0  ;;  %v2390_v30 = vadd.f32 %v2326_v59, %v5876_v61  ;;  %5131 = vtanh.f32 %v2453_v12  ;;  %v1823_v58 = vmul.f32 %v1759_v43, %v1311_v48  ;;  %v5933_v37 = vpop.f32.mrf.mxu3  ;;  %v4966_v43 = vld [vmem:[%s5561_s25 + $0x154] sm:$0xf0]  ;;  %v4480_v48 = vld [vmem:[%s5561_s25 + $0x158] sm:$0xf0] }
 0x174   : > { %v1188_v29 = vpop.f32.mrf.mxu1  ;;  %v1020_v32 = vadd.f32 %v1019_v28, %v5690_v20  ;;  %v1505_v49 = vmul.f32 %v1441_v22, %v5882_v11 }
 0x175   : > { %v2199_v33 = vmul.f32 0.044715, %v5892_v26  ;;  %v2454_v35 = vmul.f32 0.7978846, %v2390_v30 }
 0x176   : > { %v5898_v27 = vadd.f32 %v1188_v29, %v1020_v32  ;;  %v1569_v40 = vadd.f32 %v1505_v49, %v5882_v11 }
 0x177   : > { %v2263_v0 = vmul.f32 %v2199_v33, %v5892_v26  ;;  %5133 = vtanh.f32 %v2454_v35 }
 0x178   : > { %v5130_v45 = vpop.eup %5129  ;;  %v1378_v46 = vmul.f32 0.044715, %v5898_v27  ;;  %v1633_v44 = vmul.f32 0.7978846, %v1569_v40 }
 0x179   : > { %v2327_v47 = vmul.f32 %v2263_v0, %v5892_v26  ;;  %v1760_v50 = vadd.f32 1.0, %v5130_v45  ;;  %v5132_v63 = vpop.eup %5131 }
 0x17a   : > { %v1980_v51 = vpop.f32.mrf.mxu2  ;;  %v1442_v42 = vmul.f32 %v1378_v46, %v5898_v27  ;;  %v2581_v53 = vadd.f32 1.0, %v5132_v63  ;;  %5135 = vtanh.f32 %v1633_v44 }
 0x17b   : > { %v5914_v55 = vadd.f32 %v1980_v51, %v5849_v19  ;;  %v1022_v56 = vpop.f32.mrf.mxu0  ;;  %v1824_v4 = vmul.f32 %v1760_v50, %v1312_v16  ;;  %v2391_v13 = vadd.f32 %v2327_v47, %v5892_v26  ;;  %v4965_v47 = vld [vmem:[%s5561_s25 + $0x154] sm:$0xf] }
 0x17c   : > { %v1191_v57 = vpop.f32.mrf.mxu1  ;;  %v1023_v14 = vadd.f32 %v1022_v56, %v5690_v20  ;;  %v1506_v5 = vmul.f32 %v1442_v42, %v5898_v27  ;;  %v5928_v22 = vmul.f32 %v2581_v53, %v2133_v15 }
 0x17d   : > { %v5134_v7 = vpop.eup %5133  ;;  %v2200_v8 = vmul.f32 0.044715, %v5914_v55  ;;  %v1877_v9 = vpack.c.bf16 %v1824_v4, %v1823_v58  ;;  %v2455_v18 = vmul.f32 0.7978846, %v2391_v13  ;;  %v4479_v58 = vor.u32 %v4966_v43, %v4478_v31 }
 0x17e   : > { %v5920_v36 = vadd.f32 %v1191_v57, %v1023_v14  ;;  %1061 = vmatmul.bf16.gmra.mxu0 %v4471_v23  ;;  %v1570_v10 = vadd.f32 %v1506_v5, %v5898_v27  ;;  %v2582_v12 = vadd.f32 1.0, %v5134_v7  ;;  %7848 = vst [vmem:[#allocation9_spill] sm:$0xff] %v5928_v22  ;;  %v1313_v23 = vmul.f32 0.5, %v5882_v11  ;;  %v5957_v14 = vpop.f32.mrf.mxu3 }
 0x17f   : > { %1230 = vmatmul.bf16.gmra.mxu1 %v4475_v52  ;;  %v2264_v6 = vmul.f32 %v2200_v8, %v5914_v55  ;;  %2022 = vmatmul.bf16.gmra.mxu2 %v1877_v9  ;;  %v1314_v52 = vmul.f32 0.5, %v5898_v27  ;;  %v4483_v4 = vor.u32 %v4965_v47, %v4480_v48 }
 0x180   : > { %v1379_v62 = vmul.f32 0.044715, %v5920_v36  ;;  %v1634_v59 = vmul.f32 0.7978846, %v1570_v10  ;;  %v5930_v28 = vmul.f32 %v2582_v12, %v2134_v17  ;;  %v5136_v35 = vpop.eup %5135 }
 0x181   : > { %v2328_v21 = vmul.f32 %v2264_v6, %v5914_v55  ;;  %v1761_v16 = vadd.f32 1.0, %v5136_v35 }
 0x182   : > { %v1443_v29 = vmul.f32 %v1379_v62, %v5920_v36  ;;  %v1983_v30 = vpop.f32.mrf.mxu2  ;;  %5137 = vtanh.f32 %v1634_v59  ;;  %v2135_v59 = vmul.f32 0.5, %v5892_v26 }
 0x183   : > { %v5936_v61 = vadd.f32 %v1983_v30, %v5849_v19  ;;  %v1024_v25 = vpop.f32.mrf.mxu0  ;;  %v2392_v49 = vadd.f32 %v2328_v21, %v5914_v55  ;;  %5139 = vtanh.f32 %v2455_v18  ;;  %v1825_v11 = vmul.f32 %v1761_v16, %v1313_v23  ;;  %v4486_v23 = vld [vmem:[%s5561_s25 + $0x160] sm:$0xf] }
 0x184   : > { %v1193_v32 = vpop.f32.mrf.mxu1  ;;  %v1025_v38 = vadd.f32 %v1024_v25, %v5690_v20  ;;  %v1507_v39 = vmul.f32 %v1443_v29, %v5920_v36  ;;  %v2136_v30 = vmul.f32 0.5, %v5914_v55 }
 0x185   : > { %v2201_v40 = vmul.f32 0.044715, %v5936_v61  ;;  %v2456_v0 = vmul.f32 0.7978846, %v2392_v49 }
 0x186   : > { %v5944_v41 = vadd.f32 %v1193_v32, %v1025_v38  ;;  %v1571_v45 = vadd.f32 %v1507_v39, %v5920_v36 }
 0x187   : > { %v2265_v46 = vmul.f32 %v2201_v40, %v5936_v61  ;;  %5141 = vtanh.f32 %v2456_v0  ;;  %v5979_v0 = vpop.f32.mrf.mxu3 }
 0x188   : > { %v5138_v50 = vpop.eup %5137  ;;  %v1380_v63 = vmul.f32 0.044715, %v5944_v41  ;;  %v1635_v13 = vmul.f32 0.7978846, %v1571_v45 }
 0x189   : > { %v2329_v51 = vmul.f32 %v2265_v46, %v5936_v61  ;;  %v1762_v42 = vadd.f32 1.0, %v5138_v50  ;;  %v5140_v44 = vpop.eup %5139 }
 0x18a   : > { %v1444_v56 = vmul.f32 %v1380_v63, %v5944_v41  ;;  %v1985_v57 = vpop.f32.mrf.mxu2  ;;  %v2583_v12 = vadd.f32 1.0, %v5140_v44  ;;  %5143 = vtanh.f32 %v1635_v13 }
 0x18b   : > { %v2393_v5 = vadd.f32 %v2329_v51, %v5936_v61  ;;  %v5961_v7 = vadd.f32 %v1985_v57, %v5849_v19  ;;  %v1027_v8 = vpop.f32.mrf.mxu0  ;;  %v1826_v53 = vmul.f32 %v1762_v42, %v1314_v52  ;;  %v4968_v52 = vld [vmem:[%s5561_s25 + $0x164] sm:$0xf0]  ;;  %v4488_v57 = vld [vmem:[%s5561_s25 + $0x168] sm:$0xf0] }
 0x18c   : > { %v1196_v9 = vpop.f32.mrf.mxu1  ;;  %v1028_v27 = vadd.f32 %v1027_v8, %v5690_v20  ;;  %v1508_v10 = vmul.f32 %v1444_v56, %v5944_v41  ;;  %v5974_v38 = vmul.f32 %v2583_v12, %v2135_v59  ;;  %v4967_v56 = vld [vmem:[%s5561_s25 + $0x164] sm:$0xf]  ;;  %v1315_v8 = vmul.f32 0.5, %v5920_v36 }
 0x18d   : > { %v5142_v6 = vpop.eup %5141  ;;  %v2202_v15 = vmul.f32 0.044715, %v5961_v7  ;;  %v1878_v17 = vpack.c.bf16 %v1826_v53, %v1825_v11  ;;  %v2457_v21 = vmul.f32 0.7978846, %v2393_v5 }
 0x18e   : > { %v5966_v18 = vadd.f32 %v1196_v9, %v1028_v27  ;;  %1066 = vmatmul.bf16.gmra.mxu0 %v4479_v58  ;;  %v1572_v62 = vadd.f32 %v1508_v10, %v5944_v41  ;;  %v2584_v25 = vadd.f32 1.0, %v5142_v6  ;;  %v1316_v9 = vmul.f32 0.5, %v5944_v41 }
 0x18f   : > { %1235 = vmatmul.bf16.gmra.mxu1 %v4483_v4  ;;  %v2266_v29 = vmul.f32 %v2202_v15, %v5961_v7  ;;  %2027 = vmatmul.bf16.gmra.mxu2 %v1878_v17  ;;  %v4487_v10 = vor.u32 %v4968_v52, %v4486_v23  ;;  %v4491_v6 = vor.u32 %v4967_v56, %v4488_v57  ;;  %v6002_v17 = vpop.f32.mrf.mxu3 }
 0x190   : > { %v1381_v32 = vmul.f32 0.044715, %v5966_v18  ;;  %v1636_v49 = vmul.f32 0.7978846, %v1572_v62  ;;  %v5976_v39 = vmul.f32 %v2584_v25, %v2136_v30  ;;  %v5144_v47 = vpop.eup %5143 }
 0x191   : > { %v2330_v35 = vmul.f32 %v2266_v29, %v5961_v7  ;;  %v1763_v58 = vadd.f32 1.0, %v5144_v47 }
 0x192   : > { %v1445_v40 = vmul.f32 %v1381_v32, %v5966_v18  ;;  %v1988_v26 = vpop.f32.mrf.mxu2  ;;  %5145 = vtanh.f32 %v1636_v49 }
 0x193   : > { %v5982_v55 = vadd.f32 %v1988_v26, %v5849_v19  ;;  %v1029_v31 = vpop.f32.mrf.mxu0  ;;  %v2394_v45 = vadd.f32 %v2330_v35, %v5961_v7  ;;  %5147 = vtanh.f32 %v2457_v21  ;;  %v1827_v29 = vmul.f32 %v1763_v58, %v1315_v8 }
 0x194   : > { %v1198_v43 = vpop.f32.mrf.mxu1  ;;  %v1030_v48 = vadd.f32 %v1029_v31, %v5690_v20  ;;  %v1509_v16 = vmul.f32 %v1445_v40, %v5966_v18  ;;  %v2137_v40 = vmul.f32 0.5, %v5936_v61  ;;  %v2138_v26 = vmul.f32 0.5, %v5961_v7 }
 0x195   : > { %v2203_v50 = vmul.f32 0.044715, %v5982_v55  ;;  %v2458_v63 = vmul.f32 0.7978846, %v2394_v45 }
 0x196   : > { %v5990_v51 = vadd.f32 %v1198_v43, %v1030_v48  ;;  %v1573_v42 = vadd.f32 %v1509_v16, %v5966_v18 }
 0x197   : > { %v2267_v44 = vmul.f32 %v2203_v50, %v5982_v55  ;;  %5149 = vtanh.f32 %v2458_v63 }
 0x198   : > { %v5146_v4 = vpop.eup %5145  ;;  %v1382_v13 = vmul.f32 0.044715, %v5990_v51  ;;  %v1637_v15 = vmul.f32 0.7978846, %v1573_v42  ;;  %v1271_v42 = vpop.f32.mrf.mxu3 }
 0x199   : > { %v5148_v5 = vpop.eup %5147  ;;  %v1764_v11 = vadd.f32 1.0, %v5146_v4  ;;  %v2331_v12 = vmul.f32 %v2267_v44, %v5982_v55  ;;  %v6256_v44 = vstv %s4660_s30 }
 0x19a   : > { %v1446_v53 = vmul.f32 %v1382_v13, %v5990_v51  ;;  %v1990_v27 = vpop.f32.mrf.mxu2  ;;  %v2585_v25 = vadd.f32 1.0, %v5148_v5  ;;  %5151 = vtanh.f32 %v1637_v15  ;;  %v4970_v15 = vld [vmem:[%s5561_s25 + $0x174] sm:$0xf0] }
 0x19b   : > { %v6006_v62 = vadd.f32 %v1990_v27, %v5849_v19  ;;  %v1032_v59 = vpop.f32.mrf.mxu0  ;;  %v1828_v36 = vmul.f32 %v1764_v11, %v1316_v9  ;;  %v2395_v47 = vadd.f32 %v2331_v12, %v5982_v55  ;;  %v1103_v27 = vadd.f32 %v5853_v34, %v5690_v20 }
 0x19c   : > { %v1201_v21 = vpop.f32.mrf.mxu1  ;;  %v1033_v41 = vadd.f32 %v1032_v59, %v5690_v20  ;;  %v1510_v30 = vmul.f32 %v1446_v53, %v5990_v51  ;;  %v6019_v63 = vmul.f32 %v2585_v25, %v2137_v40  ;;  %v1105_v59 = vadd.f32 %v5873_v60, %v5690_v20 }
 0x19d   : > { %v5150_v32 = vpop.eup %5149  ;;  %v2204_v49 = vmul.f32 0.044715, %v6006_v62  ;;  %v1879_v35 = vpack.c.bf16 %v1828_v36, %v1827_v29  ;;  %v2459_v56 = vmul.f32 0.7978846, %v2395_v47  ;;  %v4496_v29 = vld [vmem:[%s5561_s25 + $0x178] sm:$0xf0] }
 0x19e   : > { %v6013_v31 = vadd.f32 %v1201_v21, %v1033_v41  ;;  %1071 = vmatmul.bf16.gmra.mxu0 %v4487_v10  ;;  %v1574_v43 = vadd.f32 %v1510_v30, %v5990_v51  ;;  %v2586_v45 = vadd.f32 1.0, %v5150_v32  ;;  %v4969_v21 = vld [vmem:[%s5561_s25 + $0x174] sm:$0xf]  ;;  %v1317_v25 = vmul.f32 0.5, %v5966_v18 }
 0x19f   : > { %1240 = vmatmul.bf16.gmra.mxu1 %v4491_v6  ;;  %v2268_v48 = vmul.f32 %v2204_v49, %v6006_v62  ;;  %2032 = vmatmul.bf16.gmra.mxu2 %v1879_v35  ;;  %v4494_v6 = vld [vmem:[%s5561_s25 + $0x170] sm:$0xf]  ;;  %v1318_v32 = vmul.f32 0.5, %v5990_v51 }
 0x1a0   : > { %v1383_v16 = vmul.f32 0.044715, %v6013_v31  ;;  %v1638_v50 = vmul.f32 0.7978846, %v1574_v43  ;;  %v6021_v61 = vmul.f32 %v2586_v45, %v2138_v26  ;;  %v5152_v5 = vpop.eup %5151  ;;  %v4495_v60 = vor.u32 %v4970_v15, %v4494_v6  ;;  %v1273_v47 = vpop.f32.mrf.mxu3 }
 0x1a1   : > { %v2332_v7 = vmul.f32 %v2268_v48, %v6006_v62  ;;  %v1765_v36 = vadd.f32 1.0, %v5152_v5  ;;  %v4499_v43 = vor.u32 %v4969_v21, %v4496_v29  ;;  %v6050_v45 = vadd.f32 %v1271_v42, %v1103_v27 }
 0x1a2   : > { %v1447_v23 = vmul.f32 %v1383_v16, %v6013_v31  ;;  %v1993_v52 = vpop.f32.mrf.mxu2  ;;  %5153 = vtanh.f32 %v1638_v50  ;;  %v2140_v21 = vmul.f32 0.5, %v6006_v62 }
 0x1a3   : > { %v6028_v57 = vadd.f32 %v1993_v52, %v5849_v19  ;;  %v1034_v58 = vpop.f32.mrf.mxu0  ;;  %v2396_v13 = vadd.f32 %v2332_v7, %v6006_v62  ;;  %5155 = vtanh.f32 %v2459_v56  ;;  %v1829_v50 = vmul.f32 %v1765_v36, %v1317_v25 }
 0x1a4   : > { %v1203_v4 = vpop.f32.mrf.mxu1  ;;  %v1035_v8 = vadd.f32 %v1034_v58, %v5690_v20  ;;  %v1511_v9 = vmul.f32 %v1447_v23, %v6013_v31  ;;  %v6055_v23 = vadd.f32 %v1273_v47, %v1105_v59  ;;  %v1411_v56 = vmul.f32 0.044715, %v6050_v45 }
 0x1a5   : > { %v2205_v11 = vmul.f32 0.044715, %v6028_v57  ;;  %v2460_v53 = vmul.f32 0.7978846, %v2396_v13 }
 0x1a6   : > { %v6036_v10 = vadd.f32 %v1203_v4, %v1035_v8  ;;  %v1575_v12 = vadd.f32 %v1511_v9, %v6013_v31 }
 0x1a7   : > { %5157 = vtanh.f32 %v2460_v53  ;;  %v2269_v34 = vmul.f32 %v2205_v11, %v6028_v57  ;;  %v1475_v11 = vmul.f32 %v1411_v56, %v6050_v45  ;;  %v1412_v53 = vmul.f32 0.044715, %v6055_v23 }
 0x1a8   : > { %v5154_v41 = vpop.eup %5153  ;;  %v1384_v30 = vmul.f32 0.044715, %v6036_v10  ;;  %v1639_v35 = vmul.f32 0.7978846, %v1575_v12 }
 0x1a9   : > { %v1766_v49 = vadd.f32 1.0, %v5154_v41  ;;  %v5156_v58 = vpop.eup %5155  ;;  %v2333_v42 = vmul.f32 %v2269_v34, %v6028_v57  ;;  %v1539_v12 = vmul.f32 %v1475_v11, %v6050_v45  ;;  %v1476_v59 = vmul.f32 %v1412_v53, %v6055_v23 }
 0x1aa   : > { %v1448_v40 = vmul.f32 %v1384_v30, %v6036_v10  ;;  %v1995_v26 = vpop.f32.mrf.mxu2  ;;  %5159 = vtanh.f32 %v1639_v35  ;;  %v2587_v29 = vadd.f32 1.0, %v5156_v58 }
 0x1ab   : > { %v6053_v48 = vadd.f32 %v1995_v26, %v5849_v19  ;;  %v1037_v16 = vpop.f32.mrf.mxu0  ;;  %v1830_v7 = vmul.f32 %v1766_v49, %v1318_v32  ;;  %v2397_v41 = vadd.f32 %v2333_v42, %v6028_v57  ;;  %v1603_v34 = vadd.f32 %v1539_v12, %v6050_v45 }
 0x1ac   : > { %v1206_v18 = vpop.f32.mrf.mxu1  ;;  %v1038_v51 = vadd.f32 %v1037_v16, %v5690_v20  ;;  %v1512_v52 = vmul.f32 %v1448_v40, %v6036_v10  ;;  %v1540_v26 = vmul.f32 %v1476_v59, %v6055_v23  ;;  %v1320_v12 = vmul.f32 0.5, %v6036_v10 }
 0x1ad   : > { %v2206_v4 = vmul.f32 0.044715, %v6053_v48  ;;  %v1880_v13 = vpack.c.bf16 %v1830_v7, %v1829_v50  ;;  %v5158_v5 = vpop.eup %5157  ;;  %v1667_v47 = vmul.f32 0.7978846, %v1603_v34  ;;  %v2461_v58 = vmul.f32 0.7978846, %v2397_v41 }
 0x1ae   : > { %v6062_v8 = vadd.f32 %v1206_v18, %v1038_v51  ;;  %1076 = vmatmul.bf16.gmra.mxu0 %v4495_v60  ;;  %v1576_v9 = vadd.f32 %v1512_v52, %v6036_v10  ;;  %v2588_v36 = vadd.f32 1.0, %v5158_v5  ;;  %v2139_v60 = vmul.f32 0.5, %v5982_v55  ;;  %v6083_v18 = vpop.f32.mrf.mxu3  ;;  %v4502_v51 = vld [vmem:[%s5561_s25 + $0x180] sm:$0xf]  ;;  %v4972_v55 = vld [vmem:[%s5561_s25 + $0x184] sm:$0xf0] }
 0x1af   : > { %1245 = vmatmul.bf16.gmra.mxu1 %v4499_v43  ;;  %v2270_v27 = vmul.f32 %v2206_v4, %v6053_v48  ;;  %2037 = vmatmul.bf16.gmra.mxu2 %v1880_v13  ;;  %v1604_v52 = vadd.f32 %v1540_v26, %v6055_v23  ;;  %v4971_v4 = vld [vmem:[%s5561_s25 + $0x184] sm:$0xf] }
 0x1b0   : > { %v1385_v6 = vmul.f32 0.044715, %v6062_v8  ;;  %v1640_v15 = vmul.f32 0.7978846, %v1576_v9  ;;  %v5160_v32 = vpop.eup %5159  ;;  %v6085_v50 = vmul.f32 %v2588_v36, %v2140_v21  ;;  %v6090_v56 = vmul.f32 %v2587_v29, %v2139_v60  ;;  %v4504_v9 = vld [vmem:[%s5561_s25 + $0x188] sm:$0xf0] }
 0x1b1   : > { %v2334_v49 = vmul.f32 %v2270_v27, %v6053_v48  ;;  %v1767_v5 = vadd.f32 1.0, %v5160_v32  ;;  %v1668_v11 = vmul.f32 0.7978846, %v1604_v52  ;;  %v4507_v34 = vor.u32 %v4971_v4, %v4504_v9 }
 0x1b2   : > { %v1449_v30 = vmul.f32 %v1385_v6, %v6062_v8  ;;  %v1998_v25 = vpop.f32.mrf.mxu2  ;;  %5161 = vtanh.f32 %v1640_v15  ;;  %v1319_v15 = vmul.f32 0.5, %v6013_v31  ;;  %v1108_v32 = vadd.f32 %v5889_v24, %v5690_v20 }
 0x1b3   : > { %v6077_v35 = vadd.f32 %v1998_v25, %v5849_v19  ;;  %v1039_v40 = vpop.f32.mrf.mxu0  ;;  %5163 = vtanh.f32 %v1667_v47  ;;  %v2398_v59 = vadd.f32 %v2334_v49, %v6053_v48  ;;  %v4503_v25 = vor.u32 %v4972_v55, %v4502_v51  ;;  %v6125_v55 = vld [vmem:[%s5561_s25 + $0x194] sm:$0xf0] }
 0x1b4   : > { %v1208_v62 = vpop.f32.mrf.mxu1  ;;  %v1040_v43 = vadd.f32 %v1039_v40, %v5690_v20  ;;  %v1513_v16 = vmul.f32 %v1449_v30, %v6062_v8  ;;  %5165 = vtanh.f32 %v1668_v11  ;;  %v1831_v40 = vmul.f32 %v1767_v5, %v1319_v15 }
 0x1b5   : > { %v2207_v7 = vmul.f32 0.044715, %v6077_v35  ;;  %5167 = vtanh.f32 %v2461_v58  ;;  %v6113_v60 = vadd.f32 %v5911_v54, %v5690_v20  ;;  %v6122_v58 = vld [vmem:[%s5561_s25 + $0x190] sm:$0xf]  ;;  %v1348_v5 = vmul.f32 0.5, %v6055_v23 }
 0x1b6   : > { %v6092_v42 = vadd.f32 %v1208_v62, %v1040_v43  ;;  %v1577_v13 = vadd.f32 %v1513_v16, %v6062_v8  ;;  %v2462_v16 = vmul.f32 0.7978846, %v2398_v59  ;;  %v1278_v4 = vpop.f32.mrf.mxu3  ;;  %v6132_v11 = vadd.f32 %v5933_v37, %v5690_v20 }
 0x1b7   : > { %v2271_v21 = vmul.f32 %v2207_v7, %v6077_v35  ;;  %v6142_v23 = vadd.f32 %v5979_v0, %v5690_v20  ;;  %v4511_v37 = vor.u32 %v6125_v55, %v6122_v58 }
 0x1b8   : > { %v5162_v27 = vpop.eup %5161  ;;  %v1386_v6 = vmul.f32 0.044715, %v6092_v42  ;;  %v1641_v36 = vmul.f32 0.7978846, %v1577_v13  ;;  %v1347_v13 = vmul.f32 0.5, %v6050_v45 }
 0x1b9   : > { %v1768_v29 = vadd.f32 1.0, %v5162_v27  ;;  %v5164_v26 = vpop.eup %5163  ;;  %v2335_v24 = vmul.f32 %v2271_v21, %v6077_v35  ;;  %v6136_v27 = vadd.f32 %v5957_v14, %v5690_v20 }
 0x1ba   : > { %v1450_v41 = vmul.f32 %v1386_v6, %v6092_v42  ;;  %v2000_v30 = vpop.f32.mrf.mxu2  ;;  %5169 = vtanh.f32 %v1641_v36  ;;  %v5166_v9 = vpop.eup %5165  ;;  %v1795_v15 = vadd.f32 1.0, %v5164_v26  ;;  %v4512_v26 = vld [vmem:[%s5561_s25 + $0x198] sm:$0xf0] }
 0x1bb   : > { %v6109_v31 = vadd.f32 %v2000_v30, %v5849_v19  ;;  %v1042_v10 = vpop.f32.mrf.mxu0  ;;  %v1832_v62 = vmul.f32 %v1768_v29, %v1320_v12  ;;  %v5168_v12 = vpop.eup %5167  ;;  %v1796_v45 = vadd.f32 1.0, %v5166_v9  ;;  %5171 = vtanh.f32 %v2462_v16 }
 0x1bc   : > { %v1211_v49 = vpop.f32.mrf.mxu1  ;;  %v1043_v43 = vadd.f32 %v1042_v10, %v5690_v20  ;;  %v1514_v47 = vmul.f32 %v1450_v41, %v6092_v42  ;;  %v1859_v14 = vmul.f32 %v1795_v15, %v1347_v13  ;;  %v2141_v29 = vmul.f32 0.5, %v6028_v57  ;;  %v4973_v57 = vld [vmem:[%s5561_s25 + $0x194] sm:$0xf] }
 0x1bd   : > { %v2208_v7 = vmul.f32 0.044715, %v6109_v31  ;;  %v1881_v51 = vpack.c.bf16 %v1832_v62, %v1831_v40  ;;  %v2399_v36 = vadd.f32 %v2335_v24, %v6077_v35  ;;  %v6155_v62 = vadd.f32 %v6002_v17, %v5690_v20 }
 0x1be   : > { %v6119_v52 = vadd.f32 %v1211_v49, %v1043_v43  ;;  %1081 = vmatmul.bf16.gmra.mxu0 %v4503_v25  ;;  %v1578_v54 = vadd.f32 %v1514_v47, %v6092_v42  ;;  %v1860_v25 = vmul.f32 %v1796_v45, %v1348_v5  ;;  %v2589_v43 = vadd.f32 1.0, %v5168_v12  ;;  %v6183_v45 = vld [vmem:[%s5561_s25 + $0x1a8] sm:$0xf0] }
 0x1bf   : > { %1250 = vmatmul.bf16.gmra.mxu1 %v4507_v34  ;;  %v2272_v6 = vmul.f32 %v2208_v7, %v6109_v31  ;;  %2042 = vmatmul.bf16.gmra.mxu2 %v1881_v51  ;;  %v6161_v16 = vadd.f32 %v6083_v18, %v1108_v32  ;;  %v1321_v17 = vmul.f32 0.5, %v6062_v8  ;;  %v2142_v13 = vmul.f32 0.5, %v6053_v48  ;;  %v6171_v18 = vld [vmem:[%s5561_s25 + $0x1a0] sm:$0xf]  ;;  %v6174_v32 = vld [vmem:[%s5561_s25 + $0x1a4] sm:$0xf0] }
 0x1c0   : > { %v1387_v59 = vmul.f32 0.044715, %v6119_v52  ;;  %v1642_v21 = vmul.f32 0.7978846, %v1578_v54  ;;  %v5170_v34 = vpop.eup %5169  ;;  %v1895_v7 = vpack.c.bf16 %v1860_v25, %v1859_v14  ;;  %v6167_v54 = vmul.f32 0.5, %v6077_v35  ;;  %v1281_v25 = vpop.f32.mrf.mxu3 }
 0x1c1   : > { %v2336_v10 = vmul.f32 %v2272_v6, %v6109_v31  ;;  %v5172_v5 = vpop.eup %5171  ;;  %v2463_v9 = vmul.f32 0.7978846, %v2399_v36  ;;  %v4515_v15 = vor.u32 %v4973_v57, %v4512_v26  ;;  %v1322_v8 = vmul.f32 0.5, %v6092_v42  ;;  %v6180_v35 = vld [vmem:[%s5561_s25 + $0x1a4] sm:$0xf] }
 0x1c2   : > { %v1451_v41 = vmul.f32 %v1387_v59, %v6119_v52  ;;  %v2003_v30 = vpop.f32.mrf.mxu2  ;;  %5173 = vtanh.f32 %v1642_v21  ;;  %2112 = vmatmul.bf16.vlgmr.msra.gmra.mxu3 %v1895_v7  ;;  %v1769_v21 = vadd.f32 1.0, %v5170_v34  ;;  %v2590_v57 = vadd.f32 1.0, %v5172_v5 }
 0x1c3   : > { %v6151_v0 = vadd.f32 %v2003_v30, %v5849_v19  ;;  %v1044_v49 = vpop.f32.mrf.mxu0  ;;  %v2400_v48 = vadd.f32 %v2336_v10, %v6109_v31  ;;  %v6188_v30 = vadd.f32 %v1278_v4, %v6113_v60  ;;  %5175 = vtanh.f32 %v2463_v9 }
 0x1c4   : > { %v1213_v40 = vpop.f32.mrf.mxu1  ;;  %v1045_v47 = vadd.f32 %v1044_v49, %v5690_v20  ;;  %v1515_v24 = vmul.f32 %v1451_v41, %v6119_v52  ;;  %v1413_v41 = vmul.f32 0.044715, %v6161_v16  ;;  %v6190_v49 = vmul.f32 %v2589_v43, %v2141_v29 }
 0x1c5   : > { %v2209_v51 = vmul.f32 0.044715, %v6151_v0  ;;  %v1833_v43 = vmul.f32 %v1769_v21, %v1321_v17  ;;  %v1414_v9 = vmul.f32 0.044715, %v6188_v30  ;;  %v6218_v55 = vadd.f32 %v1281_v25, %v6132_v11 }
 0x1c6   : > { %v1214_v6 = vadd.f32 %v1213_v40, %v1045_v47  ;;  %v1579_v12 = vadd.f32 %v1515_v24, %v6119_v52 }
 0x1c7   : > { %v2273_v59 = vmul.f32 %v2209_v51, %v6151_v0  ;;  %v2464_v51 = vmul.f32 0.7978846, %v2400_v48 }
 0x1c8   : > { %v5174_v14 = vpop.eup %5173  ;;  %v1388_v36 = vmul.f32 0.044715, %v1214_v6  ;;  %v1643_v10 = vmul.f32 0.7978846, %v1579_v12  ;;  %v1283_v25 = vpop.f32.mrf.mxu3 }
 0x1c9   : > { %v2337_v40 = vmul.f32 %v2273_v59, %v6151_v0  ;;  %v1770_v42 = vadd.f32 1.0, %v5174_v14  ;;  %v5176_v48 = vpop.eup %5175 }
 0x1ca   : > { %v1452_v26 = vmul.f32 %v1388_v36, %v1214_v6  ;;  %v2005_v47 = vpop.f32.mrf.mxu2  ;;  %v6203_v36 = vmul.f32 0.5, %v6109_v31  ;;  %5177 = vtanh.f32 %v1643_v10  ;;  %v6214_v31 = vmul.f32 0.5, %v6119_v52  ;;  %v6228_v10 = vld [vmem:[%s5561_s25 + $0x1b0] sm:$0xf] }
 0x1cb   : > { %v6198_v60 = vadd.f32 %v2005_v47, %v5849_v19  ;;  %v1047_v4 = vpop.f32.mrf.mxu0  ;;  %v1834_v7 = vmul.f32 %v1770_v42, %v1322_v8  ;;  %v2401_v59 = vadd.f32 %v2337_v40, %v6151_v0  ;;  %v6207_v47 = vmul.f32 %v2590_v57, %v2142_v13 }
 0x1cc   : > { %v1216_v29 = vpop.f32.mrf.mxu1  ;;  %v1048_v14 = vadd.f32 %v1047_v4, %v5690_v20  ;;  %v1516_v5 = vmul.f32 %v1452_v26, %v1214_v6  ;;  %v2710_v8 = vlaneseq  ;;  %5179 = vtanh.f32 %v2464_v51  ;;  %v6231_v4 = vld [vmem:[%s5561_s25 + $0x1b4] sm:$0xf0] }
 0x1cd   : > { %v2210_v12 = vmul.f32 0.044715, %v6198_v60  ;;  %v1882_v33 = vpack.c.bf16 %v1834_v7, %v1833_v43  ;;  %v1477_v13 = vmul.f32 %v1413_v41, %v6161_v16  ;;  %v2465_v40 = vmul.f32 0.7978846, %v2401_v59 }
 0x1ce   : > { %v1217_v46 = vadd.f32 %v1216_v29, %v1048_v14  ;;  %1086 = vmatmul.bf16.gmra.mxu0 %v4511_v37  ;;  %v1580_v17 = vadd.f32 %v1516_v5, %v1214_v6  ;;  %v1324_v41 = vmul.f32 0.5, %v1214_v6  ;;  %v6233_v11 = vshrl.u32 %v2710_v8, 7 }
 0x1cf   : > { %1255 = vmatmul.bf16.gmra.mxu1 %v4515_v15  ;;  %v2274_v21 = vmul.f32 %v2210_v12, %v6198_v60  ;;  %2047 = vmatmul.bf16.gmra.mxu2 %v1882_v33  ;;  %v6222_v15 = vmul.f32 0.5, %v6151_v0  ;;  %v1478_v33 = vmul.f32 %v1414_v9, %v6188_v30  ;;  %v2591_v51 = vadd.f32 1.0, %v5176_v48 }
 0x1d0   : > { %v1389_v42 = vmul.f32 0.044715, %v1217_v46  ;;  %v1644_v58 = vmul.f32 0.7978846, %v1580_v17  ;;  %v1541_v6 = vmul.f32 %v1477_v13, %v6161_v16  ;;  %v5178_v59 = vpop.eup %5177  ;;  %v6240_v5 = vmul.f32 0.044715, %v6218_v55 }
 0x1d1   : > { %v2338_v37 = vmul.f32 %v2274_v21, %v6198_v60  ;;  %v6246_v21 = vld [vmem:[%s5561_s25 + $0x1b4] sm:$0xf]  ;;  %v6252_v13 = vadd.f32 %v1283_v25, %v6136_v27  ;;  %v1542_v48 = vmul.f32 %v1478_v33, %v6188_v30  ;;  %v6259_v53 = vmul.f32 %v2591_v51, %v6167_v54 }
 0x1d2   : > { %v1453_v57 = vmul.f32 %v1389_v42, %v1217_v46  ;;  %v2008_v26 = vpop.f32.mrf.mxu2  ;;  %5181 = vtanh.f32 %v1644_v58  ;;  %v5180_v9 = vpop.eup %5179  ;;  %v6249_v42 = vld [vmem:[%s5561_s25 + $0x1b8] sm:$0xf0]  ;;  %v6261_v24 = vmul.f32 0.5, %v1217_v46  ;;  %v6266_v33 = vmul.f32 0.5, %v6198_v60 }
 0x1d3   : > { %v2009_v0 = vadd.f32 %v2008_v26, %v5849_v19  ;;  %v1049_v29 = vpop.f32.mrf.mxu0  ;;  %v2402_v7 = vadd.f32 %v2338_v37, %v6198_v60  ;;  %5183 = vtanh.f32 %v2465_v40 }
 0x1d4   : > { %v1218_v43 = vpop.f32.mrf.mxu1  ;;  %v1050_v14 = vadd.f32 %v1049_v29, %v5690_v20  ;;  %v1517_v12 = vmul.f32 %v1453_v57, %v1217_v46  ;;  %v2725_v57 = vadd.s32 112, %v6233_v11  ;;  %v1771_v29 = vadd.f32 1.0, %v5178_v59 }
 0x1d5   : > { %v2211_v17 = vmul.f32 0.044715, %v2009_v0  ;;  %v2466_v26 = vmul.f32 0.7978846, %v2402_v7  ;;  %v2726_v7 = vadd.s32 120, %v6233_v11  ;;  %v2592_v59 = vadd.f32 1.0, %v5180_v9 }
 0x1d6   : > { %v1219_v58 = vadd.f32 %v1218_v43, %v1050_v14  ;;  %v1581_v37 = vadd.f32 %v1517_v12, %v1217_v46  ;;  %v6270_v51 = vadd.s32 %v6256_v44, %v2725_v57  ;;  %v1835_v60 = vmul.f32 %v1771_v29, %v6214_v31 }
 0x1d7   : > { %v2275_v40 = vmul.f32 %v2211_v17, %v2009_v0  ;;  %5185 = vtanh.f32 %v2466_v26  ;;  %v2723_v9 = vadd.s32 96, %v6233_v11  ;;  %v7850_v31 = vor.u32 %v6180_v35, %v6183_v45 }
 0x1d8   : > { %v5182_v52 = vpop.eup %5181  ;;  %v1390_v8 = vmul.f32 0.044715, %v1219_v58  ;;  %v1645_v54 = vmul.f32 0.7978846, %v1581_v37  ;;  %v2724_v29 = vadd.s32 104, %v6233_v11  ;;  %vm2854_vm0 = vcmp.lt.s32.totalorder %v6270_v51, 1024 }
 0x1d9   : > { %v2339_v25 = vmul.f32 %v2275_v40, %v2009_v0  ;;  %v1772_v43 = vadd.f32 1.0, %v5182_v52  ;;  %v5184_v14 = vpop.eup %5183 }
 0x1da   : > { %v1454_v12 = vmul.f32 %v1390_v8, %v1219_v58  ;;  %v2010_v17 = vpop.f32.mrf.mxu2  ;;  %v1605_v8 = vadd.f32 %v1541_v6, %v6161_v16  ;;  %v2593_v22 = vadd.f32 1.0, %v5184_v14  ;;  %5187 = vtanh.f32 %v1645_v54 }
 0x1db   : > { %v2403_v46 = vadd.f32 %v2339_v25, %v2009_v0  ;;  %v2011_v34 = vadd.f32 %v2010_v17, %v5849_v19  ;;  %v1052_v27 = vpop.f32.mrf.mxu0  ;;  %v1836_v40 = vmul.f32 %v1772_v43, %v1324_v41  ;;  %v7849_v25 = vor.u32 %v6174_v32, %v6171_v18 }
 0x1dc   : > { %v1221_v2 = vpop.f32.mrf.mxu1  ;;  %v1053_v52 = vadd.f32 %v1052_v27, %v5690_v20  ;;  %v1518_v1 = vmul.f32 %v1454_v12, %v1219_v58  ;;  %v6286_v27 = vmul.f32 0.5, %v2009_v0  ;;  %v6289_v43 = vadd.s32 %v6256_v44, %v2726_v7 }
 0x1dd   : > { %v2467_v37 = vmul.f32 0.7978846, %v2403_v46  ;;  %v2212_v3 = vmul.f32 0.044715, %v2011_v34  ;;  %v1883_v57 = vpack.c.bf16 %v1836_v40, %v1835_v60  ;;  %v5186_v18 = vpop.eup %5185  ;;  %v1326_v14 = vmul.f32 0.5, %v1219_v58 }
 0x1de   : > { %v6277_v26 = vadd.f32 %v1221_v2, %v1053_v52  ;;  %1091 = vmatmul.bf16.gmra.mxu0 %v7849_v25  ;;  %v1582_v41 = vadd.f32 %v1518_v1, %v1219_v58  ;;  %v6292_v2 = vmul.f32 %v2592_v59, %v6203_v36  ;;  %v6296_v1 = vadd.s32 %v6256_v44, %v2723_v9 }
 0x1df   : > { %1260 = vmatmul.bf16.gmra.mxu1 %v7850_v31  ;;  %v2276_v6 = vmul.f32 %v2212_v3, %v2011_v34  ;;  %2052 = vmatmul.bf16.gmra.mxu2 %v1883_v57  ;;  %5189 = vtanh.f32 %v2467_v37  ;;  %v1606_v0 = vadd.f32 %v1542_v48, %v6188_v30  ;;  %v1669_v3 = vmul.f32 0.7978846, %v1605_v8 }
 0x1e0   : > { %v1391_v32 = vmul.f32 0.044715, %v6277_v26  ;;  %v1646_v35 = vmul.f32 0.7978846, %v1582_v41  ;;  %v6301_v36 = vmul.f32 %v2593_v22, %v6222_v15  ;;  %v6304_v59 = vadd.s32 %v6256_v44, %v2724_v29  ;;  %v5188_v40 = vpop.eup %5187 }
 0x1e1   : > { %v2340_v45 = vmul.f32 %v2276_v6, %v2011_v34  ;;  %v2594_v60 = vadd.f32 1.0, %v5186_v18  ;;  %v4700_v48 = vpack.c.bf16 %v6292_v2, %v6259_v53  ;;  %v2721_v9 = vadd.s32 80, %v6233_v11 }
 0x1e2   : > { %v1455_v12 = vmul.f32 %v1391_v32, %v6277_v26  ;;  %v2013_v7 = vpop.f32.mrf.mxu2  ;;  %5191 = vtanh.f32 %v1646_v35  ;;  %v1349_v15 = vmul.f32 0.5, %v6161_v16  ;;  %v1670_v57 = vmul.f32 0.7978846, %v1606_v0  ;;  %v1286_v35 = vpop.f32.mrf.mxu3 }
 0x1e3   : > { %v2404_v58 = vadd.f32 %v2340_v45, %v2011_v34  ;;  %v6307_v17 = vadd.f32 %v2013_v7, %v5849_v19  ;;  %v1054_v54 = vpop.f32.mrf.mxu0  ;;  %5193 = vtanh.f32 %v1669_v3  ;;  %vm2855_vm1 = vcmp.lt.s32.totalorder %v6289_v43, 1024 }
 0x1e4   : > { %v1223_v46 = vpop.f32.mrf.mxu1  ;;  %v1055_v52 = vadd.f32 %v1054_v54, %v5690_v20  ;;  %v1519_v22 = vmul.f32 %v1455_v12, %v6277_v26  ;;  %v2722_v31 = vadd.s32 88, %v6233_v11  ;;  %v6323_v29 = vmul.f32 0.5, %v6188_v30  ;;  %vm6388_vm6 = vmpackc.low %vm2855_vm1, %vm2854_vm0 }
 0x1e5   : > { %v2468_v8 = vmul.f32 0.7978846, %v2404_v58  ;;  %v2213_v37 = vmul.f32 0.044715, %v6307_v17  ;;  %v5190_v6 = vpop.eup %5189  ;;  %v2148_v16 = vmul.f32 0.5, %v2011_v34  ;;  %v1773_v18 = vadd.f32 1.0, %v5188_v40 }
 0x1e6   : > { %v6316_v25 = vadd.f32 %v1223_v46, %v1055_v52  ;;  %v1583_v41 = vadd.f32 %v1519_v22, %v6277_v26  ;;  %v6326_v32 = vmul.f32 %v2594_v60, %v6266_v33  ;;  %v6330_v3 = vadd.s32 %v6256_v44, %v2721_v9 }
 0x1e7   : > { %5195 = vtanh.f32 %v2468_v8  ;;  %v6333_v12 = vadd.f32 %v1286_v35, %v6142_v23  ;;  %v2277_v30 = vmul.f32 %v2213_v37, %v6307_v17  ;;  %v2719_v34 = vadd.s32 64, %v6233_v11 }
 0x1e8   : > { %v5192_v45 = vpop.eup %5191  ;;  %v1392_v0 = vmul.f32 0.044715, %v6316_v25  ;;  %v1647_v7 = vmul.f32 0.7978846, %v1583_v41  ;;  %5197 = vtanh.f32 %v1670_v57  ;;  %v2595_v54 = vadd.f32 1.0, %v5190_v6 }
 0x1e9   : > { %v1774_v58 = vadd.f32 1.0, %v5192_v45  ;;  %vm2852_vm2 = vcmp.lt.s32.totalorder %v6296_v1, 1024  ;;  %vm2853_vm3 = vcmp.lt.s32.totalorder %v6304_v59, 1024  ;;  %v6341_v60 = vadd.s32 %v6256_v44, %v2722_v31  ;;  %v5194_v40 = vpop.eup %5193 }
 0x1ea   : > { %v1456_v33 = vmul.f32 %v1392_v0, %v6316_v25  ;;  %v2015_v46 = vpop.f32.mrf.mxu2  ;;  %v6344_v23 = vmul.f32 0.5, %v6277_v26  ;;  %v1837_v22 = vmul.f32 %v1773_v18, %v6261_v24  ;;  %v4697_v37 = vpack.c.bf16 %v6326_v32, %v6301_v36  ;;  %vm4696_vm8 = vmpackc.low %vm2853_vm3, %vm2852_vm2 }
 0x1eb   : > { %v1057_v52 = vpop.f32.mrf.mxu0  ;;  %v1838_v8 = vmul.f32 %v1774_v58, %v1326_v14  ;;  %5199 = vtanh.f32 %v1647_v7  ;;  %v6351_v41 = vmul.f32 0.044715, %v6333_v12  ;;  %v1797_v6 = vadd.f32 1.0, %v5194_v40 }
 0x1ec   : > { %v1226_v9 = vpop.f32.mrf.mxu1  ;;  %v1058_v57 = vadd.f32 %v1057_v52, %v5690_v20  ;;  %v1520_v31 = vmul.f32 %v1456_v33, %v6316_v25  ;;  %v2341_v35 = vmul.f32 %v2277_v30, %v6307_v17  ;;  %v2720_v0 = vadd.s32 72, %v6233_v11 }
 0x1ed   : > { %v5196_v26 = vpop.eup %5195  ;;  %v1884_v45 = vpack.c.bf16 %v1838_v8, %v1837_v22  ;;  %v6357_v24 = vadd.s32 %v6256_v44, %v2719_v34  ;;  %v7851_v18 = vor.u32 %v6231_v4, %v6228_v10  ;;  %v7852_v7 = vor.u32 %v6246_v21, %v6249_v42 }
 0x1ee   : > { %v6359_v14 = vadd.f32 %v1226_v9, %v1058_v57  ;;  %v2596_v58 = vadd.f32 1.0, %v5196_v26  ;;  %v2659_v33 = vmul.f32 %v2595_v54, %v6286_v27  ;;  %vm2850_vm4 = vcmp.lt.s32.totalorder %v6330_v3, 1024  ;;  %v5198_v34 = vpop.eup %5197 }
 0x1ef   : > { %1096 = vmatmul.bf16.gmra.mxu0 %v7851_v18  ;;  %1265 = vmatmul.bf16.gmra.mxu1 %v7852_v7  ;;  %vm2851_vm5 = vcmp.lt.s32.totalorder %v6341_v60, 1024  ;;  %v1584_v30 = vadd.f32 %v1520_v31, %v6316_v25  ;;  %v6372_v40 = vadd.f32 %v2015_v46, %v5849_v19  ;;  %v1861_v10 = vmul.f32 %v1797_v6, %v1349_v15 }
 0x1f0   : > { %2057 = vmatmul.bf16.gmra.mxu2 %v1884_v45  ;;  %v6375_v4 = vadd.s32 48, %v6233_v11  ;;  %v6378_v21 = vadd.s32 56, %v6233_v11  ;;  %v1393_v42 = vmul.f32 0.044715, %v6359_v14  ;;  %v2660_v27 = vmul.f32 %v2596_v58, %v2148_v16  ;;  %vm6464_vm12 = vmpackc.low %vm2851_vm5, %vm2850_vm4 }
 0x1f1   : > { %v1648_v54 = vmul.f32 0.7978846, %v1584_v30  ;;  %v1798_v52 = vadd.f32 1.0, %v5198_v34  ;;  %v5200_v9 = vpop.eup %5199  ;;  %v6382_v22 = vadd.f32 %v2341_v35, %v6307_v17  ;;  %v1328_v46 = vmul.f32 0.5, %v6316_v25 }
 0x1f2   : > { %7853 = vst [vmem:[#allocation10_spill] sm:$0xff] %v6375_v4  ;;  %v6394_v8 = vadd.s32 %v6256_v44, %v2720_v0  ;;  %v6397_v16 = vadd.s32 32, %v6233_v11  ;;  %v1457_v57 = vmul.f32 %v1393_v42, %v6359_v14  ;;  %v2018_v31 = vpop.f32.mrf.mxu2  ;;  %v4694_v6 = vpack.c.bf16 %v2660_v27, %v2659_v33  ;;  %v1288_v33 = vpop.f32.mrf.mxu3 }
 0x1f3   : > { %7854 = vst [vmem:[#allocation11_spill] sm:$0xff] %v6378_v21  ;;  %5201 = vtanh.f32 %v1648_v54  ;;  %v1862_v51 = vmul.f32 %v1798_v52, %v6323_v29  ;;  %vm2848_vm7 = vcmp.lt.s32.totalorder %v6357_v24, 1024  ;;  %v2214_v43 = vmul.f32 0.044715, %v6372_v40  ;;  %v1059_v25 = vpop.f32.mrf.mxu0 }
 0x1f4   : > { %v6404_v26 = vadd.f32 %v2018_v31, %v5849_v19  ;;  %v1228_v35 = vpop.f32.mrf.mxu1  ;;  %v6408_v45 = vadd.s32 %v6256_v44, %v6375_v4  ;;  %v6411_v0 = vadd.s32 40, %v6233_v11  ;;  %v1060_v18 = vadd.f32 %v1059_v25, %v5690_v20  ;;  %4695 = vmatpush.bf16.msk.msrb.mxu3 %vm6388_vm6, %v4694_v6 }
 0x1f5   : > { %v1775_v29 = vadd.f32 1.0, %v5200_v9  ;;  %v1896_v7 = vpack.c.bf16 %v1862_v51, %v1861_v10  ;;  %v6418_v58 = vadd.s32 %v6256_v44, %v6378_v21  ;;  %vm2849_vm9 = vcmp.lt.s32.totalorder %v6394_v8, 1024 }
 0x1f6   : > { %v2215_v30 = vmul.f32 0.044715, %v6404_v26  ;;  %v6428_v34 = vadd.s32 %v6256_v44, %v6397_v16  ;;  %v6431_v10 = vadd.s32 16, %v6233_v11  ;;  %v6433_v42 = vadd.f32 %v1228_v35, %v1060_v18  ;;  %vm4702_vm15 = vmpackc.low %vm2849_vm9, %vm2848_vm7 }
 0x1f7   : > { %2117 = vmatmul.bf16.gmra.mxu3 %v1896_v7  ;;  %v6437_v27 = vadd.s32 %v6256_v44, %v6411_v0  ;;  %v6440_v1 = vadd.s32 24, %v6233_v11  ;;  %v1521_v59 = vmul.f32 %v1457_v57, %v6359_v14  ;;  %v6444_v54 = vmul.f32 %v2214_v43, %v6372_v40 }
 0x1f8   : > { %v2279_v52 = vmul.f32 %v2215_v30, %v6404_v26  ;;  %vm2846_vm10 = vcmp.lt.s32.totalorder %v6408_v45, 1024  ;;  %v6449_v9 = vadd.f32 %v1288_v33, %v6155_v62  ;;  %v1394_v31 = vmul.f32 0.044715, %v6433_v42  ;;  %4698 = vmatpush.bf16.msk.msrb.mxu3 %vm4696_vm8, %v4697_v37 }
 0x1f9   : > { %v5202_v15 = vpop.eup %5201  ;;  %v1839_v6 = vmul.f32 %v1775_v29, %v6344_v23  ;;  %vm2847_vm11 = vcmp.lt.s32.totalorder %v6418_v58, 1024  ;;  %v6458_v57 = vmul.f32 0.5, %v6359_v14  ;;  %v6470_v36 = vadd.s32 %v6256_v44, %v6431_v10 }
 0x1fa   : > { %v1776_v51 = vadd.f32 1.0, %v5202_v15  ;;  %v1585_v32 = vadd.f32 %v1521_v59, %v6359_v14  ;;  %v1416_v23 = vmul.f32 0.044715, %v6252_v13  ;;  %v1458_v37 = vmul.f32 %v1394_v31, %v6433_v42  ;;  %v2020_v43 = vpop.f32.mrf.mxu2  ;;  %vm6527_vm1 = vmpackc.low %vm2847_vm11, %vm2846_vm10 }
 0x1fb   : > { %vm2844_vm13 = vcmp.lt.s32.totalorder %v6428_v34, 1024  ;;  %vm2845_vm14 = vcmp.lt.s32.totalorder %v6437_v27, 1024  ;;  %v6479_v3 = vadd.s32 %v6256_v44, %v6440_v1  ;;  %v1479_v60 = vmul.f32 %v6240_v5, %v6218_v55  ;;  %v1062_v35 = vpop.f32.mrf.mxu0 }
 0x1fc   : > { %v2343_v25 = vmul.f32 %v2279_v52, %v6404_v26  ;;  %v6485_v14 = vadd.f32 %v2020_v43, %v5849_v19  ;;  %v1231_v18 = vpop.f32.mrf.mxu1  ;;  %v1840_v29 = vmul.f32 %v1776_v51, %v1328_v46  ;;  %v1649_v7 = vmul.f32 0.7978846, %v1585_v32  ;;  %4701 = vmatpush.bf16.msk.msrb.mxu3 %vm6464_vm12, %v4700_v48  ;;  %vm4708_vm3 = vmpackc.low %vm2845_vm14, %vm2844_vm13 }
 0x1fd   : > { %v1063_v33 = vadd.f32 %v1062_v35, %v5690_v20  ;;  %v1522_v30 = vmul.f32 %v1458_v37, %v6433_v42  ;;  %v1480_v5 = vmul.f32 %v1416_v23, %v6252_v13  ;;  %v1543_v59 = vmul.f32 %v1479_v60, %v6218_v55 }
 0x1fe   : > { %v2216_v52 = vmul.f32 0.044715, %v6485_v14  ;;  %v1885_v15 = vpack.c.bf16 %v1840_v29, %v1839_v6  ;;  %5203 = vtanh.f32 %v1649_v7  ;;  %v6502_v53 = vadd.s32 8, %v6233_v11 }
 0x1ff   : > { %v6504_v2 = vadd.f32 %v1231_v18, %v1063_v33  ;;  %v1586_v48 = vadd.f32 %v1522_v30, %v6433_v42  ;;  %v1544_v46 = vmul.f32 %v1480_v5, %v6252_v13  ;;  %v1607_v31 = vadd.f32 %v1543_v59, %v6218_v55 }
 0x200   : > { %v2280_v62 = vmul.f32 %v2216_v52, %v6485_v14  ;;  %2062 = vmatmul.bf16.gmra.mxu2 %v1885_v15  ;;  %vm2842_vm0 = vcmp.lt.s32.totalorder %v6470_v36, 1024  ;;  %v6512_v24 = vmul.f32 0.5, %v6218_v55  ;;  %v6515_v8 = vmul.f32 0.5, %v6252_v13 }
 0x201   : > { %v1395_v6 = vmul.f32 0.044715, %v6504_v2  ;;  %v7859_v51 = vpack.c.bf16 %v6207_v47, %v6190_v49  ;;  %v1650_v32 = vmul.f32 0.7978846, %v1586_v48  ;;  %v1608_v23 = vadd.f32 %v1544_v46, %v6252_v13 }
 0x202   : > { %v1671_v37 = vmul.f32 0.7978846, %v1607_v31  ;;  %v2407_v43 = vadd.f32 %v2343_v25, %v6404_v26  ;;  %vm2843_vm2 = vcmp.lt.s32.totalorder %v6479_v3, 1024  ;;  %v6534_v49 = vadd.s32 %v6256_v44, %v6233_v11  ;;  %v2023_v60 = vpop.f32.mrf.mxu2 }
 0x203   : > { %4704 = vmatpush.bf16.msk.msrb.mxu3 %vm4702_vm15, %v7859_v51  ;;  %v6538_v47 = vadd.s32 %v6256_v44, %v6502_v53  ;;  %v1459_v13 = vmul.f32 %v1395_v6, %v6504_v2  ;;  %5205 = vtanh.f32 %v1650_v32  ;;  %v1672_v45 = vmul.f32 0.7978846, %v1608_v23  ;;  %v1064_v29 = vpop.f32.mrf.mxu0  ;;  %vm6582_vm6 = vmpackc.low %vm2843_vm2, %vm2842_vm0 }
 0x204   : > { %v1418_v58 = vmul.f32 0.044715, %v6449_v9  ;;  %v5204_v25 = vpop.eup %5203  ;;  %v2344_v35 = vmul.f32 %v2280_v62, %v6485_v14  ;;  %v6544_v18 = vadd.f32 %v2023_v60, %v5849_v19  ;;  %v1233_v7 = vpop.f32.mrf.mxu1  ;;  %5207 = vtanh.f32 %v1671_v37 }
 0x205   : > { %v1481_v33 = vmul.f32 %v6351_v41, %v6333_v12  ;;  %v1065_v30 = vadd.f32 %v1064_v29, %v5690_v20  ;;  %v7862_v5 = vpack.c.bf16 %v6085_v50, %v6090_v56  ;;  %v1777_v59 = vadd.f32 1.0, %v5204_v25 }
 0x206   : > { %5209 = vtanh.f32 %v1672_v45  ;;  %v1523_v52 = vmul.f32 %v1459_v13, %v6504_v2  ;;  %v2471_v15 = vmul.f32 0.7978846, %v2407_v43  ;;  %v2217_v48 = vmul.f32 0.044715, %v6544_v18 }
 0x207   : > { %4707 = vmatpush.bf16.msk.msrb.mxu3 %vm6527_vm1, %v7862_v5  ;;  %v1482_v41 = vmul.f32 %v1418_v58, %v6449_v9  ;;  %v1545_v46 = vmul.f32 %v1481_v33, %v6333_v12  ;;  %v6562_v50 = vadd.f32 %v1233_v7, %v1065_v30  ;;  %v1330_v56 = vmul.f32 0.5, %v6433_v42 }
 0x208   : > { %vm2840_vm4 = vcmp.lt.s32.totalorder %v6534_v49, 1024  ;;  %v1587_v31 = vadd.f32 %v1523_v52, %v6504_v2  ;;  %v2281_v62 = vmul.f32 %v2217_v48, %v6544_v18  ;;  %vm2841_vm5 = vcmp.lt.s32.totalorder %v6538_v47, 1024 }
 0x209   : > { %v1546_v34 = vmul.f32 %v1482_v41, %v6449_v9  ;;  %v1609_v27 = vadd.f32 %v1545_v46, %v6333_v12  ;;  %v5206_v6 = vpop.eup %5205  ;;  %v1396_v51 = vmul.f32 0.044715, %v6562_v50  ;;  %v7863_v32 = vpack.c.bf16 %v6021_v61, %v6019_v63  ;;  %vm4714_vm7 = vmpackc.low %vm2841_vm5, %vm2840_vm4 }
 0x20a   : > { %v1841_v42 = vmul.f32 %v1777_v59, %v6458_v57  ;;  %v1651_v23 = vmul.f32 0.7978846, %v1587_v31  ;;  %v2408_v37 = vadd.f32 %v2344_v35, %v6485_v14  ;;  %v5208_v43 = vpop.eup %5207  ;;  %v2345_v55 = vmul.f32 %v2281_v62, %v6544_v18  ;;  %v2025_v45 = vpop.f32.mrf.mxu2 }
 0x20b   : > { %4710 = vmatpush.bf16.msk.msrb.mxu3 %vm4708_vm3, %v7863_v32  ;;  %v1778_v60 = vadd.f32 1.0, %v5206_v6  ;;  %v1610_v63 = vadd.f32 %v1546_v34, %v6449_v9  ;;  %5211 = vtanh.f32 %v2471_v15  ;;  %v1460_v57 = vmul.f32 %v1396_v51, %v6562_v50  ;;  %v1067_v3 = vpop.f32.mrf.mxu0  ;;  %v7867_v6 = vld [vmem:[#allocation9_spill] sm:$0xff] }
 0x20c   : > { %v5210_v61 = vpop.eup %5209  ;;  %v1799_v58 = vadd.f32 1.0, %v5208_v43  ;;  %5213 = vtanh.f32 %v1651_v23  ;;  %v1673_v25 = vmul.f32 0.7978846, %v1609_v27  ;;  %v2409_v35 = vadd.f32 %v2345_v55, %v6544_v18  ;;  %v1236_v29 = vpop.f32.mrf.mxu1 }
 0x20d   : > { %v6590_v36 = vadd.f32 %v2025_v45, %v5849_v19  ;;  %v1842_v7 = vmul.f32 %v1778_v60, %v1330_v56  ;;  %v1800_v33 = vadd.f32 1.0, %v5210_v61  ;;  %v1068_v30 = vadd.f32 %v1067_v3, %v5690_v20 }
 0x20e   : > { %v7866_v5 = vpack.c.bf16 %v5976_v39, %v5974_v38  ;;  %v1863_v59 = vmul.f32 %v1799_v58, %v6512_v24  ;;  %v1524_v52 = vmul.f32 %v1460_v57, %v6562_v50  ;;  %v1674_v15 = vmul.f32 0.7978846, %v1610_v63 }
 0x20f   : > { %v2218_v48 = vmul.f32 0.044715, %v6590_v36  ;;  %v1886_v41 = vpack.c.bf16 %v1842_v7, %v1841_v42  ;;  %v1864_v46 = vmul.f32 %v1800_v33, %v6515_v8  ;;  %v2472_v56 = vmul.f32 0.7978846, %v2408_v37 }
 0x210   : > { %4713 = vmatpush.bf16.msk.msrb.mxu3 %vm6582_vm6, %v7866_v5  ;;  %v6606_v38 = vadd.f32 %v1236_v29, %v1068_v30  ;;  %v1588_v39 = vadd.f32 %v1524_v52, %v6562_v50  ;;  %5215 = vtanh.f32 %v1673_v25  ;;  %v2473_v31 = vmul.f32 0.7978846, %v2409_v35 }
 0x211   : > { %v5212_v24 = vpop.eup %5211  ;;  %v2282_v62 = vmul.f32 %v2218_v48, %v6590_v36  ;;  %2067 = vmatmul.bf16.gmra.mxu2 %v1886_v41  ;;  %v1897_v34 = vpack.c.bf16 %v1864_v46, %v1863_v59  ;;  %5217 = vtanh.f32 %v1674_v15  ;;  %v2469_v8 = vmul.f32 0.7978846, %v6382_v22 }
 0x212   : > { %v5214_v27 = vpop.eup %5213  ;;  %v2342_v49 = vmul.f32 %v6444_v54, %v6372_v40  ;;  %v1397_v47 = vmul.f32 0.044715, %v6606_v38  ;;  %v7868_v51 = vpack.c.bf16 %v5930_v28, %v7867_v6  ;;  %v1652_v32 = vmul.f32 0.7978846, %v1588_v39  ;;  %v2028_v43 = vpop.f32.mrf.mxu2 }
 0x213   : > { %v2346_v42 = vmul.f32 %v2282_v62, %v6590_v36  ;;  %2122 = vmatmul.bf16.gmra.mxu3 %v1897_v34  ;;  %v1331_v23 = vmul.f32 0.5, %v6504_v2  ;;  %v1353_v37 = vmul.f32 0.5, %v6333_v12  ;;  %5219 = vtanh.f32 %v2472_v56  ;;  %v1069_v13 = vpop.f32.mrf.mxu0 }
 0x214   : > { %4716 = vmatpush.bf16.msk.msrb.mxu3 %vm4714_vm7, %v7868_v51  ;;  %v1461_v22 = vmul.f32 %v1397_v47, %v6606_v38  ;;  %5221 = vtanh.f32 %v1652_v32  ;;  %v1354_v54 = vmul.f32 0.5, %v6449_v9  ;;  %v2151_v55 = vmul.f32 0.5, %v6404_v26  ;;  %v1238_v60 = vpop.f32.mrf.mxu1 }
 0x215   : > { %v6624_v28 = vadd.f32 %v2028_v43, %v5849_v19  ;;  %v2153_v63 = vmul.f32 0.5, %v6544_v18  ;;  %v2410_v2 = vadd.f32 %v2346_v42, %v6590_v36  ;;  %5223 = vtanh.f32 %v2473_v31 }
 0x216   : > { %v5216_v12 = vpop.eup %5215  ;;  %v1070_v61 = vadd.f32 %v1069_v13, %v5690_v20  ;;  %v1525_v57 = vmul.f32 %v1461_v22, %v6606_v38  ;;  %v2599_v45 = vadd.f32 1.0, %v5212_v24  ;;  %v2406_v9 = vadd.f32 %v2342_v49, %v6372_v40 }
 0x217   : > { %v5218_v58 = vpop.eup %5217  ;;  %v2219_v26 = vmul.f32 0.044715, %v6624_v28  ;;  %v1779_v25 = vadd.f32 1.0, %v5214_v27  ;;  %v1801_v35 = vadd.f32 1.0, %v5216_v12  ;;  %v2474_v3 = vmul.f32 0.7978846, %v2410_v2 }
 0x218   : > { %v6632_v29 = vadd.f32 %v1238_v60, %v1070_v61  ;;  %v1802_v18 = vadd.f32 1.0, %v5218_v58  ;;  %v1589_v7 = vadd.f32 %v1525_v57, %v6606_v38  ;;  %5225 = vtanh.f32 %v2469_v8 }
 0x219   : > { %v5220_v33 = vpop.eup %5219  ;;  %v2283_v30 = vmul.f32 %v2219_v26, %v6624_v28  ;;  %v1332_v5 = vmul.f32 0.5, %v6562_v50  ;;  %5227 = vtanh.f32 %v2474_v3  ;;  %v2152_v59 = vmul.f32 0.5, %v6485_v14 }
 0x21a   : > { %v5222_v52 = vpop.eup %5221  ;;  %v1398_v15 = vmul.f32 0.044715, %v6632_v29  ;;  %v1865_v48 = vmul.f32 %v1801_v35, %v1353_v37  ;;  %v1866_v41 = vmul.f32 %v1802_v18, %v1354_v54  ;;  %v2470_v46 = vmul.f32 0.7978846, %v2406_v9  ;;  %v2030_v27 = vpop.f32.mrf.mxu2 }
 0x21b   : > { %v5224_v56 = vpop.eup %5223  ;;  %v2347_v39 = vmul.f32 %v2283_v30, %v6624_v28  ;;  %v1780_v24 = vadd.f32 1.0, %v5222_v52  ;;  %v1653_v31 = vmul.f32 0.7978846, %v1589_v7  ;;  %v2600_v62 = vadd.f32 1.0, %v5220_v33  ;;  %v1072_v6 = vpop.f32.mrf.mxu0 }
 0x21c   : > { %v1462_v34 = vmul.f32 %v1398_v15, %v6632_v29  ;;  %v1843_v8 = vmul.f32 %v1779_v25, %v1331_v23  ;;  %v2154_v50 = vmul.f32 0.5, %v6590_v36  ;;  %v6642_v49 = vmul.f32 %v2599_v45, %v2151_v55  ;;  %v1241_v51 = vpop.f32.mrf.mxu1 }
 0x21d   : > { %v2411_v14 = vadd.f32 %v2347_v39, %v6624_v28  ;;  %v6646_v47 = vadd.f32 %v2030_v27, %v5849_v19  ;;  %v1844_v32 = vmul.f32 %v1780_v24, %v1332_v5  ;;  %v6648_v42 = vmul.f32 %v2600_v62, %v2152_v59 }
 0x21e   : > { %v5226_v37 = vpop.eup %5225  ;;  %v1073_v22 = vadd.f32 %v1072_v6, %v5690_v20  ;;  %v1526_v43 = vmul.f32 %v1462_v34, %v6632_v29  ;;  %v2601_v23 = vadd.f32 1.0, %v5224_v56  ;;  %5229 = vtanh.f32 %v2470_v46 }
 0x21f   : > { %v5228_v36 = vpop.eup %5227  ;;  %v2220_v54 = vmul.f32 0.044715, %v6646_v47  ;;  %v1887_v55 = vpack.c.bf16 %v1844_v32, %v1843_v8  ;;  %v1898_v13 = vpack.c.bf16 %v1866_v41, %v1865_v48  ;;  %5231 = vtanh.f32 %v1653_v31 }
 0x220   : > { %v6653_v60 = vadd.f32 %v1241_v51, %v1073_v22  ;;  %v1590_v2 = vadd.f32 %v1526_v43, %v6632_v29  ;;  %v2602_v12 = vadd.f32 1.0, %v5228_v36  ;;  %v4744_v61 = vpack.c.bf16 %v6648_v42, %v6642_v49 }
 0x221   : > { %v2475_v57 = vmul.f32 0.7978846, %v2411_v14  ;;  %v2284_v45 = vmul.f32 %v2220_v54, %v6646_v47  ;;  %2072 = vmatmul.bf16.gmra.mxu2 %v1887_v55  ;;  %v6660_v26 = vmul.f32 %v2601_v23, %v2153_v63  ;;  %v2597_v3 = vadd.f32 1.0, %v5226_v37 }
 0x222   : > { %v1399_v9 = vmul.f32 0.044715, %v6653_v60  ;;  %v1654_v58 = vmul.f32 0.7978846, %v1590_v2  ;;  %v6662_v25 = vmul.f32 %v2602_v12, %v2154_v50  ;;  %v6666_v33 = vpop.f32.mrf.mxu2  ;;  %v2149_v5 = vmul.f32 0.5, %v6307_v17 }
 0x223   : > { %v2348_v35 = vmul.f32 %v2284_v45, %v6646_v47  ;;  %2127 = vmatmul.bf16.gmra.mxu3 %v1898_v13  ;;  %v1074_v63 = vpop.f32.mrf.mxu0  ;;  %v2150_v48 = vmul.f32 0.5, %v6372_v40  ;;  %v1333_v14 = vmul.f32 0.5, %v6606_v38  ;;  %v1334_v6 = vmul.f32 0.5, %v6632_v29 }
 0x224   : > { %v5230_v18 = vpop.eup %5229  ;;  %v1463_v7 = vmul.f32 %v1399_v9, %v6653_v60  ;;  %5233 = vtanh.f32 %v1654_v58  ;;  %v4741_v30 = vpack.c.bf16 %v6662_v25, %v6660_v26  ;;  %v1243_v52 = vpop.f32.mrf.mxu1  ;;  %v1075_v46 = vadd.f32 %v1074_v63, %v5690_v20 }
 0x225   : > { %v5232_v59 = vpop.eup %5231  ;;  %v2412_v15 = vadd.f32 %v2348_v35, %v6646_v47  ;;  %5235 = vtanh.f32 %v2475_v57  ;;  %v2598_v41 = vadd.f32 1.0, %v5230_v18  ;;  %v6675_v24 = vmul.f32 %v2597_v3, %v2149_v5 }
 0x226   : > { %v1527_v56 = vmul.f32 %v1463_v7, %v6653_v60  ;;  %v1244_v62 = vadd.f32 %v1243_v52, %v1075_v46  ;;  %v1781_v34 = vadd.f32 1.0, %v5232_v59  ;;  %v2155_v45 = vmul.f32 0.5, %v6624_v28 }
 0x227   : > { %v2476_v39 = vmul.f32 0.7978846, %v2412_v15  ;;  %v6677_v31 = vmul.f32 %v2598_v41, %v2150_v48  ;;  %v2156_v38 = vmul.f32 0.5, %v6646_v47 }
 0x228   : > { %v1591_v17 = vadd.f32 %v1527_v56, %v6653_v60  ;;  %v1400_v40 = vmul.f32 0.044715, %v1244_v62  ;;  %v1845_v36 = vmul.f32 %v1781_v34, %v1333_v14  ;;  %v1335_v34 = vmul.f32 0.5, %v6653_v60 }
 0x229   : > { %5237 = vtanh.f32 %v2476_v39  ;;  %v4747_v27 = vpack.c.bf16 %v6677_v31, %v6675_v24 }
 0x22a   : > { %v5234_v8 = vpop.eup %5233  ;;  %v1464_v32 = vmul.f32 %v1400_v40, %v1244_v62  ;;  %v2035_v37 = vpop.f32.mrf.mxu2  ;;  %v1655_v22 = vmul.f32 0.7978846, %v1591_v17 }
 0x22b   : > { %v5236_v50 = vpop.eup %5235  ;;  %v1782_v51 = vadd.f32 1.0, %v5234_v8  ;;  %v1077_v43 = vpop.f32.mrf.mxu0  ;;  %v1336_v8 = vmul.f32 0.5, %v1244_v62  ;;  %v6710_v60 = vadd.f32 %v2035_v37, %v5849_v19 }
 0x22c   : > { %v1246_v23 = vpop.f32.mrf.mxu1  ;;  %v1078_v55 = vadd.f32 %v1077_v43, %v5690_v20  ;;  %v1528_v13 = vmul.f32 %v1464_v32, %v1244_v62  ;;  %v2603_v2 = vadd.f32 1.0, %v5236_v50  ;;  %5239 = vtanh.f32 %v1655_v22 }
 0x22d   : > { %v1846_v54 = vmul.f32 %v1782_v51, %v1334_v6 }
 0x22e   : > { %v6687_v9 = vadd.f32 %v1246_v23, %v1078_v55  ;;  %v1592_v29 = vadd.f32 %v1528_v13, %v1244_v62  ;;  %v6690_v18 = vmul.f32 %v2603_v2, %v2155_v45  ;;  %v6703_v23 = vadd.f32 %v6666_v33, %v5849_v19  ;;  %v6707_v55 = vld [vmem:[%s5556_s17] sm:$0xf] }
 0x22f   : > { %v5238_v12 = vpop.eup %5237  ;;  %v1888_v57 = vpack.c.bf16 %v1846_v54, %v1845_v36  ;;  %v6713_v13 = vperm.slane %v6707_v55, 0 }
 0x230   : > { %v2604_v58 = vadd.f32 1.0, %v5238_v12  ;;  %v1401_v35 = vmul.f32 0.044715, %v6687_v9  ;;  %v1656_v3 = vmul.f32 0.7978846, %v1592_v29 }
 0x231   : > { %2077 = vmatmul.bf16.gmra.mxu2 %v1888_v57  ;;  %vm3133_vm8 = vcmp.eq.s32.totalorder %v6233_v11, %v6713_v13  ;;  %vm3137_vm9 = vcmp.eq.s32.totalorder %v6502_v53, %v6713_v13  ;;  %v2221_v33 = vmul.f32 0.044715, %v6703_v23  ;;  %v2222_v29 = vmul.f32 0.044715, %v6710_v60 }
 0x232   : > { %v6692_v7 = vmul.f32 %v2604_v58, %v2156_v38  ;;  %v1465_v5 = vmul.f32 %v1401_v35, %v6687_v9  ;;  %v2038_v59 = vpop.f32.mrf.mxu2  ;;  %5241 = vtanh.f32 %v1656_v3  ;;  %v5240_v52 = vpop.eup %5239  ;;  %vm4717_vm10 = vmpackc.low %vm3137_vm9, %vm3133_vm8  ;;  %v7839_v3 = vmov 1.0|1.0  }
 0x233   : > { %v1079_v47 = vpop.f32.mrf.mxu0  ;;  %v1783_v56 = vadd.f32 1.0, %v5240_v52  ;;  %v6718_v57 = vadd.f32 %v2038_v59, %v5849_v19  ;;  %4718 = vmatmul.msk.bf16.vlgmr.msrb.gmra.mxu3 %vm4717_vm10, %v7839_v3  ;;  %vm3141_vm11 = vcmp.eq.s32.totalorder %v6431_v10, %v6713_v13  ;;  %vm3145_vm12 = vcmp.eq.s32.totalorder %v6440_v1, %v6713_v13 }
 0x234   : > { %v4738_v28 = vpack.c.bf16 %v6692_v7, %v6690_v18  ;;  %v1248_v63 = vpop.f32.mrf.mxu1  ;;  %v1080_v15 = vadd.f32 %v1079_v47, %v5690_v20  ;;  %v1529_v48 = vmul.f32 %v1465_v5, %v6687_v9  ;;  %vm4719_vm13 = vmpackc.low %vm3145_vm12, %vm3141_vm11  ;;  %vm3149_vm6 = vcmp.eq.s32.totalorder %v6397_v16, %v6713_v13 }
 0x235   : > { %v1847_v22 = vmul.f32 %v1783_v56, %v1335_v34  ;;  %v2223_v5 = vmul.f32 0.044715, %v6718_v57  ;;  %vm3153_vm7 = vcmp.eq.s32.totalorder %v6411_v0, %v6713_v13 }
 0x236   : > { %v1249_v41 = vadd.f32 %v1248_v63, %v1080_v15  ;;  %v1593_v46 = vadd.f32 %v1529_v48, %v6687_v9  ;;  %v2285_v15 = vmul.f32 %v2221_v33, %v6703_v23  ;;  %vm4721_vm8 = vmpackc.low %vm3153_vm7, %vm3149_vm6 }
 0x238   : > { %v5242_v39 = vpop.eup %5241  ;;  %v1402_v17 = vmul.f32 0.044715, %v1249_v41  ;;  %v1657_v6 = vmul.f32 0.7978846, %v1593_v46 }
 0x239   : > { %v1784_v40 = vadd.f32 1.0, %v5242_v39  ;;  %v2286_v39 = vmul.f32 %v2222_v29, %v6710_v60 }
 0x23a   : > { %v1466_v50 = vmul.f32 %v1402_v17, %v1249_v41  ;;  %v2040_v14 = vpop.f32.mrf.mxu2  ;;  %5243 = vtanh.f32 %v1657_v6  ;;  %v2349_v6 = vmul.f32 %v2285_v15, %v6703_v23 }
 0x23b   : > { %v1082_v51 = vpop.f32.mrf.mxu0  ;;  %v1848_v43 = vmul.f32 %v1784_v40, %v1336_v8  ;;  %v6726_v37 = vadd.f32 %v2040_v14, %v5849_v19  ;;  %v2287_v40 = vmul.f32 %v2223_v5, %v6718_v57 }
 0x23c   : > { %v1251_v32 = vpop.f32.mrf.mxu1  ;;  %v1083_v36 = vadd.f32 %v1082_v51, %v5690_v20  ;;  %v1530_v54 = vmul.f32 %v1466_v50, %v1249_v41 }
 0x23d   : > { %v1889_v62 = vpack.c.bf16 %v1848_v43, %v1847_v22  ;;  %v2224_v48 = vmul.f32 0.044715, %v6726_v37  ;;  %v2350_v22 = vmul.f32 %v2286_v39, %v6710_v60  ;;  %v1337_v43 = vmul.f32 0.5, %v6687_v9 }
 0x23e   : > { %v6715_v2 = vadd.f32 %v1251_v32, %v1083_v36  ;;  %v1594_v12 = vadd.f32 %v1530_v54, %v1249_v41  ;;  %v1338_v36 = vmul.f32 0.5, %v1249_v41 }
 0x23f   : > { %v2288_v51 = vmul.f32 %v2224_v48, %v6726_v37 }
 0x240   : > { %v1403_v45 = vmul.f32 0.044715, %v6715_v2  ;;  %v1658_v38 = vmul.f32 0.7978846, %v1594_v12  ;;  %v5244_v52 = vpop.eup %5243 }
 0x241   : > { %2082 = vmatmul.bf16.gmra.mxu2 %v1889_v62  ;;  %v1785_v50 = vadd.f32 1.0, %v5244_v52  ;;  %v2413_v52 = vadd.f32 %v2349_v6, %v6703_v23 }
 0x242   : > { %v1467_v58 = vmul.f32 %v1403_v45, %v6715_v2  ;;  %v2043_v35 = vpop.f32.mrf.mxu2  ;;  %5245 = vtanh.f32 %v1658_v38  ;;  %v2351_v38 = vmul.f32 %v2287_v40, %v6718_v57 }
 0x243   : > { %v6734_v59 = vadd.f32 %v2043_v35, %v5849_v19  ;;  %v1084_v47 = vpop.f32.mrf.mxu0  ;;  %v1849_v5 = vmul.f32 %v1785_v50, %v1337_v43  ;;  %4720 = vmatmul.msk.bf16.gmra.mxu3 %vm4719_vm13, %v7839_v3 }
 0x244   : > { %v1253_v63 = vpop.f32.mrf.mxu1  ;;  %v1085_v46 = vadd.f32 %v1084_v47, %v5690_v20  ;;  %v1531_v56 = vmul.f32 %v1467_v58, %v6715_v2 }
 0x245   : > { %v2225_v17 = vmul.f32 0.044715, %v6734_v59 }
 0x246   : > { %v6742_v34 = vadd.f32 %v1253_v63, %v1085_v46  ;;  %v1595_v8 = vadd.f32 %v1531_v56, %v6715_v2  ;;  %v2352_v63 = vmul.f32 %v2288_v51, %v6726_v37  ;;  %v2414_v46 = vadd.f32 %v2350_v22, %v6710_v60 }
 0x247   : > { %v2289_v62 = vmul.f32 %v2225_v17, %v6734_v59  ;;  %v2477_v51 = vmul.f32 0.7978846, %v2413_v52 }
 0x248   : > { %v5246_v14 = vpop.eup %5245  ;;  %v1404_v32 = vmul.f32 0.044715, %v6742_v34  ;;  %v1659_v45 = vmul.f32 0.7978846, %v1595_v8  ;;  %v2415_v8 = vadd.f32 %v2351_v38, %v6718_v57  ;;  %v2416_v6 = vadd.f32 %v2352_v63, %v6726_v37 }
 0x249   : > { %v1786_v54 = vadd.f32 1.0, %v5246_v14  ;;  %v2353_v56 = vmul.f32 %v2289_v62, %v6734_v59 }
 0x24a   : > { %v1468_v12 = vmul.f32 %v1404_v32, %v6742_v34  ;;  %v2045_v33 = vpop.f32.mrf.mxu2  ;;  %5247 = vtanh.f32 %v1659_v45 }
 0x24b   : > { %v6755_v29 = vadd.f32 %v2045_v33, %v5849_v19  ;;  %v1087_v58 = vpop.f32.mrf.mxu0  ;;  %v1850_v47 = vmul.f32 %v1786_v54, %v1338_v36  ;;  %v2417_v32 = vadd.f32 %v2353_v56, %v6734_v59  ;;  %v2478_v36 = vmul.f32 0.7978846, %v2414_v46 }
 0x24c   : > { %v1256_v35 = vpop.f32.mrf.mxu1  ;;  %v1088_v9 = vadd.f32 %v1087_v58, %v5690_v20  ;;  %v1532_v41 = vmul.f32 %v1468_v12, %v6742_v34  ;;  %v2479_v54 = vmul.f32 0.7978846, %v2415_v8 }
 0x24d   : > { %v2226_v15 = vmul.f32 0.044715, %v6755_v29  ;;  %v1890_v48 = vpack.c.bf16 %v1850_v47, %v1849_v5  ;;  %v2480_v5 = vmul.f32 0.7978846, %v2416_v6  ;;  %v2481_v63 = vmul.f32 0.7978846, %v2417_v32 }
 0x24e   : > { %v6764_v39 = vadd.f32 %v1256_v35, %v1088_v9  ;;  %v1596_v17 = vadd.f32 %v1532_v41, %v6742_v34 }
 0x24f   : > { %v2290_v40 = vmul.f32 %v2226_v15, %v6755_v29  ;;  %v1339_v15 = vmul.f32 0.5, %v6715_v2 }
 0x250   : > { %v1405_v50 = vmul.f32 0.044715, %v6764_v39  ;;  %v1660_v14 = vmul.f32 0.7978846, %v1596_v17  ;;  %v5248_v45 = vpop.eup %5247 }
 0x251   : > { %2087 = vmatmul.bf16.gmra.mxu2 %v1890_v48  ;;  %v2354_v38 = vmul.f32 %v2290_v40, %v6755_v29  ;;  %v1787_v48 = vadd.f32 1.0, %v5248_v45  ;;  %v1340_v40 = vmul.f32 0.5, %v6742_v34 }
 0x252   : > { %v1469_v22 = vmul.f32 %v1405_v50, %v6764_v39  ;;  %v2048_v43 = vpop.f32.mrf.mxu2  ;;  %5249 = vtanh.f32 %v1660_v14 }
 0x253   : > { %v6779_v62 = vadd.f32 %v2048_v43, %v5849_v19  ;;  %v1089_v12 = vpop.f32.mrf.mxu0  ;;  %5251 = vtanh.f32 %v2477_v51  ;;  %v2418_v17 = vadd.f32 %v2354_v38, %v6755_v29  ;;  %4722 = vmatmul.msk.bf16.gmra.mxu3 %vm4721_vm8, %v7839_v3 }
 0x254   : > { %v1258_v33 = vpop.f32.mrf.mxu1  ;;  %v1090_v58 = vadd.f32 %v1089_v12, %v5690_v20  ;;  %v1533_v35 = vmul.f32 %v1469_v22, %v6764_v39  ;;  %5253 = vtanh.f32 %v2478_v36 }
 0x255   : > { %v2227_v47 = vmul.f32 0.044715, %v6779_v62  ;;  %5255 = vtanh.f32 %v2479_v54  ;;  %v1851_v54 = vmul.f32 %v1787_v48, %v1339_v15  ;;  %v2482_v38 = vmul.f32 0.7978846, %v2418_v17 }
 0x256   : > { %v6785_v9 = vadd.f32 %v1258_v33, %v1090_v58  ;;  %v1597_v41 = vadd.f32 %v1533_v35, %v6764_v39  ;;  %5257 = vtanh.f32 %v2480_v5  ;;  %v2157_v15 = vmul.f32 0.5, %v6703_v23 }
 0x257   : > { %v2291_v52 = vmul.f32 %v2227_v47, %v6779_v62  ;;  %5259 = vtanh.f32 %v2481_v63 }
 0x258   : > { %v5250_v46 = vpop.eup %5249  ;;  %v1406_v56 = vmul.f32 0.044715, %v6785_v9  ;;  %v1661_v14 = vmul.f32 0.7978846, %v1597_v41 }
 0x259   : > { %v2355_v8 = vmul.f32 %v2291_v52, %v6779_v62  ;;  %v1788_v50 = vadd.f32 1.0, %v5250_v46  ;;  %v5252_v32 = vpop.eup %5251 }
 0x25a   : > { %v1470_v6 = vmul.f32 %v1406_v56, %v6785_v9  ;;  %v2050_v51 = vpop.f32.mrf.mxu2  ;;  %v5254_v33 = vpop.eup %5253  ;;  %5261 = vtanh.f32 %v1661_v14  ;;  %v2605_v52 = vadd.f32 1.0, %v5252_v32  ;;  %v2158_v14 = vmul.f32 0.5, %v6710_v60 }
 0x25b   : > { %v2419_v2 = vadd.f32 %v2355_v8, %v6779_v62  ;;  %v2051_v22 = vadd.f32 %v2050_v51, %v5849_v19  ;;  %v1092_v43 = vpop.f32.mrf.mxu0  ;;  %v1852_v12 = vmul.f32 %v1788_v50, %v1340_v40  ;;  %v5256_v58 = vpop.eup %5255  ;;  %v2606_v48 = vadd.f32 1.0, %v5254_v33 }
 0x25c   : > { %v1261_v36 = vpop.f32.mrf.mxu1  ;;  %v1093_v45 = vadd.f32 %v1092_v43, %v5690_v20  ;;  %v1534_v34 = vmul.f32 %v1470_v6, %v6785_v9  ;;  %v5258_v63 = vpop.eup %5257  ;;  %5263 = vtanh.f32 %v2482_v38  ;;  %v2607_v17 = vadd.f32 1.0, %v5256_v58 }
 0x25d   : > { %v2483_v35 = vmul.f32 0.7978846, %v2419_v2  ;;  %v2228_v5 = vmul.f32 0.044715, %v2051_v22  ;;  %v1891_v47 = vpack.c.bf16 %v1852_v12, %v1851_v54  ;;  %v5260_v56 = vpop.eup %5259  ;;  %v2741_v6 = vadd.s32 240, %v6233_v11 }
 0x25e   : > { %v1598_v41 = vadd.f32 %v1534_v34, %v6785_v9  ;;  %v6801_v8 = vadd.f32 %v1261_v36, %v1093_v45  ;;  %v2159_v32 = vmul.f32 0.5, %v6718_v57  ;;  %v2608_v2 = vadd.f32 1.0, %v5258_v63 }
 0x25f   : > { %v2292_v46 = vmul.f32 %v2228_v5, %v2051_v22  ;;  %5265 = vtanh.f32 %v2483_v35  ;;  %v6806_v43 = vmul.f32 %v2605_v52, %v2157_v15  ;;  %v2161_v33 = vmul.f32 0.5, %v6734_v59 }
 0x260   : > { %v1662_v40 = vmul.f32 0.7978846, %v1598_v41  ;;  %v5262_v23 = vpop.eup %5261  ;;  %v2160_v45 = vmul.f32 0.5, %v6726_v37  ;;  %v6810_v34 = vmul.f32 %v2606_v48, %v2158_v14  ;;  %v1407_v38 = vmul.f32 0.044715, %v6801_v8 }
 0x261   : > { %2092 = vmatmul.bf16.gmra.mxu2 %v1891_v47  ;;  %v2356_v50 = vmul.f32 %v2292_v46, %v2051_v22  ;;  %v2609_v58 = vadd.f32 1.0, %v5260_v56  ;;  %v6814_v35 = vmul.f32 %v2607_v17, %v2159_v32  ;;  %v2742_v5 = vadd.s32 248, %v6233_v11 }
 0x262   : > { %v2053_v51 = vpop.f32.mrf.mxu2  ;;  %5267 = vtanh.f32 %v1662_v40  ;;  %v2806_v47 = vadd.s32 %v6256_v44, %v2741_v6  ;;  %v2162_v63 = vmul.f32 0.5, %v6755_v29  ;;  %v5264_v41 = vpop.eup %5263  ;;  %v1341_v37 = vmul.f32 0.5, %v6764_v39 }
 0x263   : > { %v2420_v54 = vadd.f32 %v2356_v50, %v2051_v22  ;;  %v1094_v36 = vpop.f32.mrf.mxu0  ;;  %v1789_v52 = vadd.f32 1.0, %v5262_v23  ;;  %v6822_v46 = vmul.f32 %v2608_v2, %v2160_v45  ;;  %v2163_v48 = vmul.f32 0.5, %v6779_v62 }
 0x264   : > { %v1263_v12 = vpop.f32.mrf.mxu1  ;;  %v1095_v60 = vadd.f32 %v1094_v36, %v5690_v20  ;;  %v6826_v56 = vadd.f32 %v2053_v51, %v5849_v19  ;;  %v1342_v40 = vmul.f32 0.5, %v6785_v9  ;;  %v2164_v50 = vmul.f32 0.5, %v2051_v22 }
 0x265   : > { %v2484_v57 = vmul.f32 0.7978846, %v2420_v54  ;;  %v5266_v15 = vpop.eup %5265  ;;  %v1471_v29 = vmul.f32 %v1407_v38, %v6801_v8  ;;  %v6831_v14 = vmul.f32 %v2609_v58, %v2161_v33  ;;  %v2807_v32 = vadd.s32 %v6256_v44, %v2742_v5 }
 0x266   : > { %v6819_v59 = vadd.f32 %v1263_v12, %v1095_v60  ;;  %vm2870_vm14 = vcmp.lt.s32.totalorder %v2806_v47, 1024  ;;  %v2610_v2 = vadd.f32 1.0, %v5264_v41  ;;  %v1853_v51 = vmul.f32 %v1789_v52, %v1341_v37 }
 0x267   : > { %5269 = vtanh.f32 %v2484_v57  ;;  %v2739_v54 = vadd.s32 224, %v6233_v11  ;;  %v2740_v9 = vadd.s32 232, %v6233_v11  ;;  %v2611_v22 = vadd.f32 1.0, %v5266_v15 }
 0x268   : > { %v5268_v17 = vpop.eup %5267  ;;  %v1408_v6 = vmul.f32 0.044715, %v6819_v59  ;;  %v2229_v36 = vmul.f32 0.044715, %v6826_v56  ;;  %v2737_v58 = vadd.s32 208, %v6233_v11  ;;  %v1535_v57 = vmul.f32 %v1471_v29, %v6801_v8 }
 0x269   : > { %v1790_v39 = vadd.f32 1.0, %v5268_v17  ;;  %vm2871_vm15 = vcmp.lt.s32.totalorder %v2807_v32, 1024  ;;  %v2674_v52 = vmul.f32 %v2610_v2, %v2162_v63  ;;  %v2738_v15 = vadd.s32 216, %v6233_v11 }
 0x26a   : > { %v1472_v62 = vmul.f32 %v1408_v6, %v6819_v59  ;;  %v2055_v23 = vpop.f32.mrf.mxu2  ;;  %v2804_v6 = vadd.s32 %v6256_v44, %v2739_v54  ;;  %v2675_v29 = vmul.f32 %v2611_v22, %v2163_v48  ;;  %v2802_v2 = vadd.s32 %v6256_v44, %v2737_v58  ;;  %vm6857_vm0 = vmpackc.low %vm2871_vm15, %vm2870_vm14 }
 0x26b   : > { %v6839_v12 = vadd.f32 %v2055_v23, %v5849_v19  ;;  %v1854_v38 = vmul.f32 %v1790_v39, %v1342_v40  ;;  %v2805_v23 = vadd.s32 %v6256_v44, %v2740_v9  ;;  %v1599_v40 = vadd.f32 %v1535_v57, %v6801_v8 }
 0x26c   : > { %v1097_v33 = vpop.f32.mrf.mxu0  ;;  %v1266_v45 = vpop.f32.mrf.mxu1  ;;  %v1536_v5 = vmul.f32 %v1472_v62, %v6819_v59  ;;  %v2293_v39 = vmul.f32 %v2229_v36, %v6826_v56  ;;  %v2803_v9 = vadd.s32 %v6256_v44, %v2738_v15  ;;  %v2735_v57 = vadd.s32 192, %v6233_v11 }
 0x26d   : > { %v1098_v60 = vadd.f32 %v1097_v33, %v5690_v20  ;;  %v5270_v41 = vpop.eup %5269  ;;  %v1892_v37 = vpack.c.bf16 %v1854_v38, %v1853_v51  ;;  %v2230_v33 = vmul.f32 0.044715, %v6839_v12  ;;  %v1663_v38 = vmul.f32 0.7978846, %v1599_v40 }
 0x26e   : > { %v2612_v17 = vadd.f32 1.0, %v5270_v41  ;;  %v1600_v62 = vadd.f32 %v1536_v5, %v6819_v59  ;;  %v2736_v48 = vadd.s32 200, %v6233_v11  ;;  %vm2868_vm1 = vcmp.lt.s32.totalorder %v2804_v6, 1024 }
 0x26f   : > { %v6852_v51 = vadd.f32 %v1266_v45, %v1098_v60  ;;  %vm2869_vm2 = vcmp.lt.s32.totalorder %v2805_v23, 1024  ;;  %5271 = vtanh.f32 %v1663_v38  ;;  %v2294_v47 = vmul.f32 %v2230_v33, %v6839_v12 }
 0x270   : > { %v2676_v63 = vmul.f32 %v2612_v17, %v2164_v50  ;;  %v1664_v36 = vmul.f32 0.7978846, %v1600_v62  ;;  %v2357_v50 = vmul.f32 %v2293_v39, %v6826_v56  ;;  %v4732_v58 = vpack.c.bf16 %v6822_v46, %v6814_v35  ;;  %vm6874_vm3 = vmpackc.low %vm2869_vm2, %vm2868_vm1 }
 0x271   : > { %2097 = vmatmul.bf16.gmra.mxu2 %v1892_v37  ;;  %v1409_v5 = vmul.f32 0.044715, %v6852_v51  ;;  %v4729_v37 = vpack.c.bf16 %v2674_v52, %v6831_v14  ;;  %v1343_v15 = vmul.f32 0.5, %v6801_v8  ;;  %vm2866_vm4 = vcmp.lt.s32.totalorder %v2802_v2, 1024 }
 0x272   : > { %v4726_v45 = vpack.c.bf16 %v2676_v63, %v2675_v29  ;;  %5273 = vtanh.f32 %v1664_v36  ;;  %vm2867_vm5 = vcmp.lt.s32.totalorder %v2803_v9, 1024  ;;  %v2800_v35 = vadd.s32 %v6256_v44, %v2735_v57 }
 0x273   : > { %v2058_v22 = vpop.f32.mrf.mxu2  ;;  %v2801_v46 = vadd.s32 %v6256_v44, %v2736_v48  ;;  %v2734_v23 = vadd.s32 184, %v6233_v11  ;;  %v2421_v8 = vadd.f32 %v2357_v50, %v6826_v56  ;;  %v2358_v14 = vmul.f32 %v2294_v47, %v6839_v12  ;;  %vm6901_vm9 = vmpackc.low %vm2867_vm5, %vm2866_vm4 }
 0x274   : > { %v1099_v32 = vpop.f32.mrf.mxu0  ;;  %v1268_v60 = vpop.f32.mrf.mxu1  ;;  %4727 = vmatpush.bf16.msk.msra.mxu3 %vm6857_vm0, %v4726_v45  ;;  %v6889_v52 = vadd.f32 %v2058_v22, %v5849_v19  ;;  %v1473_v39 = vmul.f32 %v1409_v5, %v6852_v51  ;;  %v1344_v29 = vmul.f32 0.5, %v6819_v59  ;;  %v2731_v62 = vadd.s32 160, %v6233_v11 }
 0x275   : > { %v1100_v41 = vadd.f32 %v1099_v32, %v5690_v20  ;;  %v2733_v20 = vadd.s32 176, %v6233_v11  ;;  %v5272_v40 = vpop.eup %5271  ;;  %vm2864_vm10 = vcmp.lt.s32.totalorder %v2800_v35, 1024  ;;  %vm2865_vm11 = vcmp.lt.s32.totalorder %v2801_v46, 1024 }
 0x276   : > { %v1791_v54 = vadd.f32 1.0, %v5272_v40  ;;  %v2732_v36 = vadd.s32 168, %v6233_v11  ;;  %v2799_v2 = vadd.s32 %v6256_v44, %v2734_v23  ;;  %v2485_v9 = vmul.f32 0.7978846, %v2421_v8  ;;  %vm4734_vm12 = vmpackc.low %vm2865_vm11, %vm2864_vm10 }
 0x277   : > { %v6880_v6 = vadd.f32 %v1268_v60, %v1100_v41  ;;  %v2798_v22 = vadd.s32 %v6256_v44, %v2733_v20  ;;  %v2422_v45 = vadd.f32 %v2358_v14, %v6839_v12  ;;  %v2231_v50 = vmul.f32 0.044715, %v6889_v52 }
 0x278   : > { %4730 = vmatpush.bf16.msk.msra.mxu3 %vm6874_vm3, %v4729_v37  ;;  %v5274_v63 = vpop.eup %5273  ;;  %v4735_v47 = vpack.c.bf16 %v6810_v34, %v6806_v43  ;;  %v1855_v60 = vmul.f32 %v1791_v54, %v1343_v15  ;;  %v2796_v41 = vadd.s32 %v6256_v44, %v2731_v62  ;;  %v2797_v37 = vadd.s32 %v6256_v44, %v2732_v36 }
 0x279   : > { %v1410_v33 = vmul.f32 0.044715, %v6880_v6  ;;  %v1792_v48 = vadd.f32 1.0, %v5274_v63  ;;  %v2729_v17 = vadd.s32 144, %v6233_v11  ;;  %v2730_v20 = vadd.s32 152, %v6233_v11 }
 0x27a   : > { %v1537_v43 = vmul.f32 %v1473_v39, %v6852_v51  ;;  %vm2862_vm13 = vcmp.lt.s32.totalorder %v2798_v22, 1024  ;;  %vm2863_vm14 = vcmp.lt.s32.totalorder %v2799_v2, 1024  ;;  %v2486_v15 = vmul.f32 0.7978846, %v2422_v45 }
 0x27b   : > { %v1474_v57 = vmul.f32 %v1410_v33, %v6880_v6  ;;  %v2060_v59 = vpop.f32.mrf.mxu2  ;;  %v1856_v5 = vmul.f32 %v1792_v48, %v1344_v29  ;;  %v2295_v35 = vmul.f32 %v2231_v50, %v6889_v52  ;;  %vm2860_vm15 = vcmp.lt.s32.totalorder %v2796_v41, 1024  ;;  %vm4737_vm0 = vmpackc.low %vm2863_vm14, %vm2862_vm13 }
 0x27c   : > { %v6915_v32 = vadd.f32 %v2060_v59, %v5849_v19  ;;  %4733 = vmatpush.bf16.msk.msra.mxu3 %vm6901_vm9, %v4732_v58  ;;  %v1601_v23 = vadd.f32 %v1537_v43, %v6852_v51  ;;  %vm2861_vm1 = vcmp.lt.s32.totalorder %v2797_v37, 1024  ;;  %v2794_v14 = vadd.s32 %v6256_v44, %v2729_v17  ;;  %v6947_v59 = vpop.f32.mrf.mxu3 }
 0x27d   : > { %v1893_v34 = vpack.c.bf16 %v1856_v5, %v1855_v60  ;;  %v1538_v58 = vmul.f32 %v1474_v57, %v6880_v6  ;;  %v2795_v40 = vadd.s32 %v6256_v44, %v2730_v20  ;;  %v2727_v62 = vadd.s32 128, %v6233_v11  ;;  %vm4740_vm2 = vmpackc.low %vm2861_vm1, %vm2860_vm15 }
 0x27e   : > { %v2232_v46 = vmul.f32 0.044715, %v6915_v32  ;;  %v1665_v39 = vmul.f32 0.7978846, %v1601_v23  ;;  %v2728_v63 = vadd.s32 136, %v6233_v11  ;;  %5275 = vtanh.f32 %v2485_v9 }
 0x27f   : > { %v1602_v8 = vadd.f32 %v1538_v58, %v6880_v6  ;;  %v2359_v38 = vmul.f32 %v2295_v35, %v6889_v52  ;;  %vm2858_vm3 = vcmp.lt.s32.totalorder %v2794_v14, 1024  ;;  %vm3157_vm4 = vcmp.eq.s32.totalorder %v6375_v4, %v6713_v13 }
 0x280   : > { %4736 = vmatpush.bf16.msk.msra.mxu3 %vm4734_vm12, %v4735_v47  ;;  %5277 = vtanh.f32 %v1665_v39  ;;  %v2296_v54 = vmul.f32 %v2232_v46, %v6915_v32  ;;  %vm3161_vm5 = vcmp.eq.s32.totalorder %v6378_v21, %v6713_v13  ;;  %vm2859_vm6 = vcmp.lt.s32.totalorder %v2795_v40, 1024 }
 0x281   : > { %2102 = vmatmul.bf16.gmra.mxu2 %v1893_v34  ;;  %v1666_v29 = vmul.f32 0.7978846, %v1602_v8  ;;  %v2792_v36 = vadd.s32 %v6256_v44, %v2727_v62  ;;  %v2793_v57 = vadd.s32 %v6256_v44, %v2728_v63  ;;  %vm4723_vm7 = vmpackc.low %vm3161_vm5, %vm3157_vm4  ;;  %v2423_v7 = vadd.f32 %v2359_v38, %v6889_v52 }
 0x282   : > { %vm4743_vm8 = vmpackc.low %vm2859_vm6, %vm2858_vm3  ;;  %v1345_v22 = vmul.f32 0.5, %v6852_v51  ;;  %4724 = vmatmul.msk.bf16.gmra.mxu3 %vm4723_vm7, %v7839_v3  ;;  %v1346_v26 = vmul.f32 0.5, %v6880_v6  ;;  %v2165_v51 = vmul.f32 0.5, %v6826_v56  ;;  %v2166_v41 = vmul.f32 0.5, %v6839_v12 }
 0x283   : > { %v2063_v33 = vpop.f32.mrf.mxu2  ;;  %5279 = vtanh.f32 %v1666_v29  ;;  %vm2856_vm9 = vcmp.lt.s32.totalorder %v2792_v36, 1024  ;;  %vm2857_vm10 = vcmp.lt.s32.totalorder %v2793_v57, 1024  ;;  %v2487_v60 = vmul.f32 0.7978846, %v2423_v7 }
 0x284   : > { %4739 = vmatpush.bf16.msk.msra.mxu3 %vm4737_vm0, %v4738_v28  ;;  %5281 = vtanh.f32 %v2486_v15  ;;  %v5276_v18 = vpop.eup %5275  ;;  %v2360_v28 = vmul.f32 %v2296_v54, %v6915_v32  ;;  %v6955_v13 = vadd.f32 %v2063_v33, %v5849_v19  ;;  %vm4746_vm11 = vmpackc.low %vm2857_vm10, %vm2856_vm9  ;;  %v6980_v42 = vpop.f32.mrf.mxu3  ;;  %v2167_v62 = vmul.f32 0.5, %v6889_v52 }
 0x285   : > { %5283 = vtanh.f32 %v2487_v60  ;;  %v2168_v63 = vmul.f32 0.5, %v6915_v32 }
 0x286   : > { %v5278_v48 = vpop.eup %5277  ;;  %v2424_v5 = vadd.f32 %v2360_v28, %v6915_v32  ;;  %v2233_v37 = vmul.f32 0.044715, %v6955_v13 }
 0x287   : > { %v1793_v45 = vadd.f32 1.0, %v5278_v48 }
 0x288   : > { %4742 = vmatpush.bf16.msk.msra.mxu3 %vm4740_vm2, %v4741_v30  ;;  %v2613_v30 = vadd.f32 1.0, %v5276_v18  ;;  %v2488_v49 = vmul.f32 0.7978846, %v2424_v5 }
 0x289   : > { %v5280_v2 = vpop.eup %5279  ;;  %v1857_v17 = vmul.f32 %v1793_v45, %v1345_v22 }
 0x28a   : > { %v1794_v25 = vadd.f32 1.0, %v5280_v2  ;;  %v5282_v47 = vpop.eup %5281  ;;  %v6973_v58 = vmul.f32 %v2613_v30, %v2165_v51  ;;  %5285 = vtanh.f32 %v2488_v49 }
 0x28b   : > { %v2065_v9 = vpop.f32.mrf.mxu2  ;;  %v2614_v6 = vadd.f32 1.0, %v5282_v47  ;;  %v5284_v46 = vpop.eup %5283 }
 0x28c   : > { %v6961_v50 = vadd.f32 %v2065_v9, %v5849_v19  ;;  %4745 = vmatpush.bf16.msk.msra.mxu3 %vm4743_vm8, %v4744_v61  ;;  %v1858_v20 = vmul.f32 %v1794_v25, %v1346_v26  ;;  %v2297_v61 = vmul.f32 %v2233_v37, %v6955_v13  ;;  %v2615_v39 = vadd.f32 1.0, %v5284_v46  ;;  %v6993_v33 = vpop.f32.mrf.mxu3 }
 0x28d   : > { %v6975_v15 = vmul.f32 %v2614_v6, %v2166_v41  ;;  %v2169_v37 = vmul.f32 0.5, %v6955_v13 }
 0x28e   : > { %v2234_v43 = vmul.f32 0.044715, %v6961_v50  ;;  %v1894_v34 = vpack.c.bf16 %v1858_v20, %v1857_v17  ;;  %v2361_v35 = vmul.f32 %v2297_v61, %v6955_v13  ;;  %v7004_v57 = vmul.f32 %v2615_v39, %v2167_v62 }
 0x28f   : > { %v2170_v17 = vmul.f32 0.5, %v6961_v50 }
 0x290   : > { %4748 = vmatpush.bf16.msk.msra.mxu3 %vm4746_vm11, %v4747_v27  ;;  %v2298_v23 = vmul.f32 %v2234_v43, %v6961_v50  ;;  %v2425_v31 = vadd.f32 %v2361_v35, %v6955_v13  ;;  %v6991_v27 = vperm.slane %v6707_v55, 1  ;;  %v5286_v14 = vpop.eup %5285 }
 0x291   : > { %2107 = vmatmul.bf16.gmra.mxu2 %v1894_v34  ;;  %v2616_v55 = vadd.f32 1.0, %v5286_v14 }
 0x292   : > { %v2362_v8 = vmul.f32 %v2298_v23, %v6961_v50  ;;  %vm3134_vm12 = vcmp.eq.s32.totalorder %v6233_v11, %v6991_v27  ;;  %vm3138_vm13 = vcmp.eq.s32.totalorder %v6502_v53, %v6991_v27  ;;  %v2489_v36 = vmul.f32 0.7978846, %v2425_v31 }
 0x293   : > { %vm4749_vm14 = vmpackc.low %vm3138_vm13, %vm3134_vm12  ;;  %v7006_v18 = vmul.f32 %v2616_v55, %v2168_v63  ;;  %vm3142_vm15 = vcmp.eq.s32.totalorder %v6431_v10, %v6991_v27  ;;  %vm3146_vm0 = vcmp.eq.s32.totalorder %v6440_v1, %v6991_v27  ;;  %vm3150_vm2 = vcmp.eq.s32.totalorder %v6397_v16, %v6991_v27 }
 0x294   : > { %v2068_v12 = vpop.f32.mrf.mxu2  ;;  %v2426_v29 = vadd.f32 %v2362_v8, %v6961_v50  ;;  %4750 = vmatmul.msk.bf16.vlgmr.msra.gmra.mxu3 %vm4749_vm14, %v7839_v3  ;;  %5287 = vtanh.f32 %v2489_v36  ;;  %v7010_v9 = vpop.f32.mrf.mxu3  ;;  %vm4751_vm1 = vmpackc.low %vm3146_vm0, %vm3142_vm15  ;;  %vm3154_vm3 = vcmp.eq.s32.totalorder %v6411_v0, %v6991_v27  ;;  %vm3158_vm5 = vcmp.eq.s32.totalorder %v6375_v4, %v6991_v27 }
 0x295   : > { %v2069_v24 = vadd.f32 %v2068_v12, %v5849_v19  ;;  %vm4753_vm4 = vmpackc.low %vm3154_vm3, %vm3150_vm2  ;;  %vm3162_vm6 = vcmp.eq.s32.totalorder %v6378_v21, %v6991_v27 }
 0x296   : > { %v2490_v7 = vmul.f32 0.7978846, %v2426_v29  ;;  %vm4755_vm7 = vmpackc.low %vm3162_vm6, %vm3158_vm5 }
 0x297   : > { %v2235_v38 = vmul.f32 0.044715, %v2069_v24  ;;  %v2171_v46 = vmul.f32 0.5, %v2069_v24 }
 0x298   : > { %5289 = vtanh.f32 %v2490_v7 }
 0x299   : > { %v2299_v28 = vmul.f32 %v2235_v38, %v2069_v24 }
 0x29a   : > { %v5288_v45 = vpop.eup %5287 }
 0x29b   : > { %v2363_v22 = vmul.f32 %v2299_v28, %v2069_v24  ;;  %v2617_v60 = vadd.f32 1.0, %v5288_v45 }
 0x29c   : > { %v2070_v40 = vpop.f32.mrf.mxu2  ;;  %v2123_v43 = vpop.f32.mrf.mxu3 }
 0x29d   : > { %v2071_v54 = vadd.f32 %v2070_v40, %v5849_v19  ;;  %v2427_v26 = vadd.f32 %v2363_v22, %v2069_v24  ;;  %v7019_v20 = vmul.f32 %v2617_v60, %v2169_v37 }
 0x29e   : > { %v5290_v30 = vpop.eup %5289 }
 0x29f   : > { %v2236_v52 = vmul.f32 0.044715, %v2071_v54  ;;  %v2618_v5 = vadd.f32 1.0, %v5290_v30  ;;  %v2491_v51 = vmul.f32 0.7978846, %v2427_v26  ;;  %v2172_v8 = vmul.f32 0.5, %v2071_v54 }
 0x2a1   : > { %v2300_v2 = vmul.f32 %v2236_v52, %v2071_v54  ;;  %v7021_v6 = vmul.f32 %v2618_v5, %v2170_v17  ;;  %5291 = vtanh.f32 %v2491_v51 }
 0x2a3   : > { %v2364_v25 = vmul.f32 %v2300_v2, %v2071_v54 }
 0x2a4   : > { %v2073_v48 = vpop.f32.mrf.mxu2  ;;  %4752 = vmatmul.msk.bf16.gmra.mxu3 %vm4751_vm1, %v7839_v3  ;;  %v2125_v13 = vpop.f32.mrf.mxu3 }
 0x2a5   : > { %v2428_v41 = vadd.f32 %v2364_v25, %v2071_v54  ;;  %v7067_v27 = vadd.f32 %v2073_v48, %v5849_v19 }
 0x2a7   : > { %v2492_v34 = vmul.f32 0.7978846, %v2428_v41  ;;  %v5292_v12 = vpop.eup %5291  ;;  %v2237_v37 = vmul.f32 0.044715, %v7067_v27 }
 0x2a8   : > { %v2619_v50 = vadd.f32 1.0, %v5292_v12 }
 0x2a9   : > { %5293 = vtanh.f32 %v2492_v34  ;;  %v7086_v34 = vadd.f32 %v6980_v42, %v5849_v19 }
 0x2aa   : > { %v7029_v14 = vmul.f32 %v2619_v50, %v2171_v46 }
 0x2ac   : > { %v2075_v47 = vpop.f32.mrf.mxu2  ;;  %v7036_v62 = vpop.f32.mrf.mxu3 }
 0x2ad   : > { %v7061_v2 = vadd.f32 %v2075_v47, %v5849_v19  ;;  %v7078_v47 = vadd.f32 %v6947_v59, %v5849_v19 }
 0x2af   : > { %v5294_v23 = vpop.eup %5293  ;;  %v2238_v41 = vmul.f32 0.044715, %v7061_v2  ;;  %v2253_v46 = vmul.f32 0.044715, %v7078_v47 }
 0x2b0   : > { %v2620_v31 = vadd.f32 1.0, %v5294_v23 }
 0x2b2   : > { %v7031_v40 = vmul.f32 %v2620_v31, %v2172_v8  ;;  %v2302_v8 = vmul.f32 %v2238_v41, %v7061_v2 }
 0x2b4   : > { %v2078_v61 = vpop.f32.mrf.mxu2  ;;  %4754 = vmatmul.msk.bf16.gmra.mxu3 %vm4753_vm4, %v7839_v3  ;;  %v7041_v55 = vpop.f32.mrf.mxu3 }
 0x2b5   : > { %v7057_v28 = vadd.f32 %v2078_v61, %v5849_v19  ;;  %v7089_v61 = vadd.f32 %v2123_v43, %v5849_v19  ;;  %v7103_v43 = vadd.f32 %v6993_v33, %v5849_v19 }
 0x2b7   : > { %v2239_v5 = vmul.f32 0.044715, %v7057_v28 }
 0x2b9   : > { %v2303_v50 = vmul.f32 %v2239_v5, %v7057_v28  ;;  %v2317_v5 = vmul.f32 %v2253_v46, %v7078_v47 }
 0x2bb   : > { %v2367_v33 = vmul.f32 %v2303_v50, %v7057_v28 }
 0x2bc   : > { %v2080_v35 = vpop.f32.mrf.mxu2  ;;  %v7072_v60 = vpop.f32.mrf.mxu3 }
 0x2bd   : > { %v7044_v24 = vadd.f32 %v2080_v35, %v5849_v19  ;;  %7875 = vst [vmem:[#allocation9_spill] sm:$0xff] %v7072_v60 }
 0x2bf   : > { %v2240_v7 = vmul.f32 0.044715, %v7044_v24 }
 0x2c1   : > { %v2304_v25 = vmul.f32 %v2240_v7, %v7044_v24  ;;  %v2254_v7 = vmul.f32 0.044715, %v7086_v34 }
 0x2c3   : > { %v2368_v12 = vmul.f32 %v2304_v25, %v7044_v24  ;;  %v7116_v25 = vadd.f32 %v2125_v13, %v5849_v19 }
 0x2c4   : > { %v2083_v29 = vpop.f32.mrf.mxu2  ;;  %4756 = vmatmul.msk.bf16.gmra.mxu3 %vm4755_vm7, %v7839_v3 }
 0x2c5   : > { %v7047_v54 = vadd.f32 %v2083_v29, %v5849_v19  ;;  %v7107_v29 = vadd.f32 %v7010_v9, %v5849_v19  ;;  %v2258_v46 = vmul.f32 0.044715, %v7116_v25 }
 0x2c7   : > { %v2241_v52 = vmul.f32 0.044715, %v7047_v54 }
 0x2c9   : > { %v2305_v51 = vmul.f32 %v2241_v52, %v7047_v54  ;;  %v2257_v52 = vmul.f32 0.044715, %v7089_v61 }
 0x2cb   : > { %v2369_v23 = vmul.f32 %v2305_v51, %v7047_v54  ;;  %v2366_v51 = vmul.f32 %v2302_v8, %v7061_v2  ;;  %v2321_v50 = vmul.f32 %v2257_v52, %v7089_v61  ;;  %v7134_v8 = vadd.f32 %v7036_v62, %v5849_v19 }
 0x2cc   : > { %v2085_v63 = vpop.f32.mrf.mxu2 }
 0x2cd   : > { %v7039_v38 = vadd.f32 %v2085_v63, %v5849_v19  ;;  %v2301_v63 = vmul.f32 %v2237_v37, %v7067_v27  ;;  %v2433_v9 = vadd.f32 %v2369_v23, %v7047_v54  ;;  %v2255_v37 = vmul.f32 0.044715, %v7103_v43 }
 0x2cf   : > { %v2242_v36 = vmul.f32 0.044715, %v7039_v38  ;;  %v2365_v13 = vmul.f32 %v2301_v63, %v7067_v27  ;;  %v2430_v63 = vadd.f32 %v2366_v51, %v7061_v2  ;;  %v2319_v52 = vmul.f32 %v2255_v37, %v7103_v43 }
 0x2d0   : > { %v2322_v51 = vmul.f32 %v2258_v46, %v7116_v25 }
 0x2d1   : > { %v2306_v26 = vmul.f32 %v2242_v36, %v7039_v38  ;;  %v2429_v62 = vadd.f32 %v2365_v13, %v7067_v27  ;;  %v2494_v37 = vmul.f32 0.7978846, %v2430_v63  ;;  %v7155_v13 = vmul.f32 %v2317_v5, %v7078_v47 }
 0x2d2   : > { %v2755_v63 = vadd.s32 352, %v6233_v11  ;;  %v2386_v32 = vmul.f32 %v2322_v51, %v7116_v25 }
 0x2d3   : > { %v2370_v17 = vmul.f32 %v2306_v26, %v7039_v38 }
 0x2d4   : > { %v2088_v22 = vpop.f32.mrf.mxu2 }
 0x2d5   : > { %v7064_v45 = vadd.f32 %v2088_v22, %v5849_v19  ;;  %v2434_v36 = vadd.f32 %v2370_v17, %v7039_v38  ;;  %v2432_v22 = vadd.f32 %v2368_v12, %v7044_v24  ;;  %v2256_v17 = vmul.f32 0.044715, %v7107_v29 }
 0x2d7   : > { %v2243_v30 = vmul.f32 0.044715, %v7064_v45  ;;  %v2498_v12 = vmul.f32 0.7978846, %v2434_v36  ;;  %v2496_v23 = vmul.f32 0.7978846, %v2432_v22  ;;  %v7142_v36 = vadd.f32 %v7041_v55, %v5849_v19 }
 0x2d8   : > { %v2320_v22 = vmul.f32 %v2256_v17, %v7107_v29 }
 0x2d9   : > { %v2307_v48 = vmul.f32 %v2243_v30, %v7064_v45  ;;  %v7120_v30 = vpop.f32.mrf.mxu3  ;;  %v2260_v17 = vmul.f32 0.044715, %v7142_v36 }
 0x2da   : > { %7876 = vst [vmem:[#allocation12_spill] sm:$0xff] %v7120_v30  ;;  %v7169_v5 = vmul.f32 %v2320_v22, %v7107_v29  ;;  %v2179_v22 = vmul.f32 0.5, %v7064_v45 }
 0x2db   : > { %v2371_v59 = vmul.f32 %v2307_v48, %v7064_v45  ;;  %v2324_v49 = vmul.f32 %v2260_v17, %v7142_v36 }
 0x2dc   : > { %v2090_v35 = vpop.f32.mrf.mxu2 }
 0x2dd   : > { %v2435_v31 = vadd.f32 %v2371_v59, %v7064_v45  ;;  %v7099_v42 = vadd.f32 %v2090_v35, %v5849_v19  ;;  %v2318_v59 = vmul.f32 %v2254_v7, %v7086_v34  ;;  %v2388_v45 = vmul.f32 %v2324_v49, %v7142_v36 }
 0x2de   : > { %v2752_v49 = vadd.s32 328, %v6233_v11 }
 0x2df   : > { %v2244_v26 = vmul.f32 0.044715, %v7099_v42  ;;  %v2499_v41 = vmul.f32 0.7978846, %v2435_v31  ;;  %v2431_v31 = vadd.f32 %v2367_v33, %v7057_v28  ;;  %v2385_v33 = vmul.f32 %v2321_v50, %v7089_v61 }
 0x2e0   : > { %v2493_v50 = vmul.f32 0.7978846, %v2429_v62 }
 0x2e1   : > { %v2308_v48 = vmul.f32 %v2244_v26, %v7099_v42  ;;  %v2497_v26 = vmul.f32 0.7978846, %v2433_v9  ;;  %5295 = vtanh.f32 %v2499_v41  ;;  %v2495_v55 = vmul.f32 0.7978846, %v2431_v31 }
 0x2e2   : > { %5297 = vtanh.f32 %v2498_v12  ;;  %v2758_v41 = vadd.s32 376, %v6233_v11  ;;  %v7158_v12 = vmul.f32 %v2318_v59, %v7086_v34  ;;  %v7163_v31 = vmul.f32 %v2319_v52, %v7103_v43 }
 0x2e3   : > { %v2372_v35 = vmul.f32 %v2308_v48, %v7099_v42  ;;  %v2757_v48 = vadd.s32 368, %v6233_v11  ;;  %5299 = vtanh.f32 %v2496_v23  ;;  %v7160_v23 = vpop.f32.mrf.mxu3  ;;  %v7172_v59 = vadd.f32 %v2385_v33, %v7089_v61 }
 0x2e4   : > { %v7137_v3 = vpop.f32.mrf.mxu2  ;;  %5301 = vtanh.f32 %v2497_v26  ;;  %7877 = vst [vmem:[#allocation13_spill] sm:$0xff] %v7160_v23  ;;  %v2823_v56 = vadd.s32 %v6256_v44, %v2758_v41  ;;  %v2180_v33 = vmul.f32 0.5, %v7099_v42 }
 0x2e5   : > { %v2436_v7 = vadd.f32 %v2372_v35, %v7099_v42  ;;  %v2259_v35 = vmul.f32 0.044715, %v7134_v8  ;;  %v2822_v26 = vadd.s32 %v6256_v44, %v2757_v48  ;;  %v2178_v42 = vmul.f32 0.5, %v7039_v38 }
 0x2e6   : > { %vm2887_vm9 = vcmp.lt.s32.totalorder %v2823_v56, 1024 }
 0x2e7   : > { %v2500_v9 = vmul.f32 0.7978846, %v2436_v7  ;;  %v5296_v46 = vpop.eup %5295  ;;  %v2756_v7 = vadd.s32 360, %v6233_v11  ;;  %v2323_v48 = vmul.f32 %v2259_v35, %v7134_v8  ;;  %vm2886_vm8 = vcmp.lt.s32.totalorder %v2822_v26, 1024 }
 0x2e8   : > { %v2627_v23 = vadd.f32 1.0, %v5296_v46  ;;  %v2753_v35 = vadd.s32 336, %v6233_v11  ;;  %vm7191_vm10 = vmpackc.low %vm2887_vm9, %vm2886_vm8 }
 0x2e9   : > { %5303 = vtanh.f32 %v2500_v9  ;;  %v5298_v9 = vpop.eup %5297  ;;  %v2821_v41 = vadd.s32 %v6256_v44, %v2756_v7  ;;  %v2387_v17 = vmul.f32 %v2323_v48, %v7134_v8  ;;  %v2751_v48 = vadd.s32 320, %v6233_v11 }
 0x2ea   : > { %5305 = vtanh.f32 %v2495_v55  ;;  %v5300_v52 = vpop.eup %5299  ;;  %v2626_v60 = vadd.f32 1.0, %v5298_v9  ;;  %v2820_v55 = vadd.s32 %v6256_v44, %v2755_v63  ;;  %v2691_v21 = vmul.f32 %v2627_v23, %v2179_v22 }
 0x2eb   : > { %5307 = vtanh.f32 %v2494_v37  ;;  %v5302_v39 = vpop.eup %5301  ;;  %v2754_v37 = vadd.s32 344, %v6233_v11  ;;  %v2177_v63 = vmul.f32 0.5, %v7047_v54  ;;  %v2624_v4 = vadd.f32 1.0, %v5300_v52  ;;  %v7201_v26 = vpop.f32.mrf.mxu3 }
 0x2ec   : > { %v7174_v62 = vpop.f32.mrf.mxu2  ;;  %5309 = vtanh.f32 %v2493_v50  ;;  %v2625_v50 = vadd.f32 1.0, %v5302_v39  ;;  %vm2884_vm11 = vcmp.lt.s32.totalorder %v2820_v55, 1024  ;;  %vm2885_vm12 = vcmp.lt.s32.totalorder %v2821_v41, 1024 }
 0x2ed   : > { %v2818_v54 = vadd.s32 %v6256_v44, %v2753_v35  ;;  %v2819_v52 = vadd.s32 %v6256_v44, %v2754_v37  ;;  %v2451_v22 = vadd.f32 %v2387_v17, %v7134_v8  ;;  %v2450_v35 = vadd.f32 %v2386_v32, %v7116_v25  ;;  %vm7211_vm13 = vmpackc.low %vm2885_vm12, %vm2884_vm11 }
 0x2ee   : > { %v2174_v32 = vmul.f32 0.5, %v7061_v2  ;;  %v2747_v2 = vadd.s32 288, %v6233_v11  ;;  %v2446_v37 = vadd.f32 %v7158_v12, %v7086_v34 }
 0x2ef   : > { %v5304_v30 = vpop.eup %5303  ;;  %vm2882_vm14 = vcmp.lt.s32.totalorder %v2818_v54, 1024  ;;  %vm2883_vm15 = vcmp.lt.s32.totalorder %v2819_v52, 1024  ;;  %v2514_v52 = vmul.f32 0.7978846, %v2450_v35 }
 0x2f0   : > { %v2628_v51 = vadd.f32 1.0, %v5304_v30  ;;  %v5306_v46 = vpop.eup %5305  ;;  %v2690_v30 = vmul.f32 %v2626_v60, %v2178_v42  ;;  %v2176_v60 = vmul.f32 0.5, %v7044_v24  ;;  %v2452_v42 = vadd.f32 %v2388_v45, %v7142_v36  ;;  %vm7226_vm0 = vmpackc.low %vm2883_vm15, %vm2882_vm14 }
 0x2f1   : > { %v5308_v7 = vpop.eup %5307  ;;  %v2816_v24 = vadd.s32 %v6256_v44, %v2751_v48  ;;  %v2749_v45 = vadd.s32 304, %v6233_v11 }
 0x2f2   : > { %v2692_v9 = vmul.f32 %v2628_v51, %v2180_v33  ;;  %v5310_v38 = vpop.eup %5309  ;;  %v2689_v33 = vmul.f32 %v2625_v50, %v2177_v63  ;;  %v2623_v51 = vadd.f32 1.0, %v5306_v46  ;;  %v2622_v41 = vadd.f32 1.0, %v5308_v7 }
 0x2f3   : > { %v2688_v50 = vmul.f32 %v2624_v4, %v2176_v60  ;;  %v2817_v46 = vadd.s32 %v6256_v44, %v2752_v49  ;;  %v2621_v55 = vadd.f32 1.0, %v5310_v38  ;;  %v2447_v7 = vadd.f32 %v7163_v31, %v7103_v43 }
 0x2f4   : > { %v7197_v39 = vpop.f32.mrf.mxu2  ;;  %v4758_v23 = vpack.c.bf16 %v2692_v9, %v2691_v21  ;;  %v2175_v21 = vmul.f32 0.5, %v7057_v28  ;;  %v4761_v17 = vpack.c.bf16 %v2690_v30, %v2689_v33  ;;  %v2750_v28 = vadd.s32 312, %v6233_v11 }
 0x2f5   : > { %v2515_v9 = vmul.f32 0.7978846, %v2451_v22  ;;  %v2513_v4 = vmul.f32 0.7978846, %v7172_v59  ;;  %v2516_v56 = vmul.f32 0.7978846, %v2452_v42  ;;  %v2814_v31 = vadd.s32 %v6256_v44, %v2749_v45 }
 0x2f6   : > { %4759 = vmatpush.bf16.msk.msrb.mxu3 %vm7191_vm10, %v4758_v23  ;;  %v2687_v63 = vmul.f32 %v2623_v51, %v2175_v21  ;;  %v2173_v30 = vmul.f32 0.5, %v7067_v27  ;;  %v2686_v23 = vmul.f32 %v2622_v41, %v2174_v32  ;;  %v2748_v38 = vadd.s32 296, %v6233_v11  ;;  %v7242_v51 = vpop.f32.mrf.mxu3 }
 0x2f7   : > { %vm2880_vm1 = vcmp.lt.s32.totalorder %v2816_v24, 1024  ;;  %vm2881_vm2 = vcmp.lt.s32.totalorder %v2817_v46, 1024  ;;  %v2815_v59 = vadd.s32 %v6256_v44, %v2750_v28  ;;  %5311 = vtanh.f32 %v2515_v9 }
 0x2f8   : > { %v4764_v49 = vpack.c.bf16 %v2688_v50, %v2687_v63  ;;  %v2685_v27 = vmul.f32 %v2621_v55, %v2173_v30  ;;  %v2448_v22 = vadd.f32 %v7169_v5, %v7107_v29  ;;  %v2445_v33 = vadd.f32 %v7155_v13, %v7078_v47  ;;  %vm4766_vm3 = vmpackc.low %vm2881_vm2, %vm2880_vm1 }
 0x2f9   : > { %v2511_v60 = vmul.f32 0.7978846, %v2447_v7  ;;  %5313 = vtanh.f32 %v2516_v56  ;;  %v2812_v21 = vadd.s32 %v6256_v44, %v2747_v2  ;;  %v2813_v41 = vadd.s32 %v6256_v44, %v2748_v38 }
 0x2fa   : > { %4762 = vmatpush.bf16.msk.msrb.mxu3 %vm7211_vm13, %v4761_v17  ;;  %v4767_v42 = vpack.c.bf16 %v2686_v23, %v2685_v27  ;;  %5315 = vtanh.f32 %v2513_v4  ;;  %vm2878_vm4 = vcmp.lt.s32.totalorder %v2814_v31, 1024  ;;  %vm2879_vm5 = vcmp.lt.s32.totalorder %v2815_v59, 1024 }
 0x2fb   : > { %v2745_v5 = vadd.s32 272, %v6233_v11  ;;  %v2746_v13 = vadd.s32 280, %v6233_v11  ;;  %5317 = vtanh.f32 %v2514_v52  ;;  %v2512_v35 = vmul.f32 0.7978846, %v2448_v22  ;;  %vm7250_vm6 = vmpackc.low %vm2879_vm5, %vm2878_vm4 }
 0x2fc   : > { %v7232_v54 = vpop.f32.mrf.mxu2  ;;  %v2509_v17 = vmul.f32 0.7978846, %v2445_v33  ;;  %vm2876_vm7 = vcmp.lt.s32.totalorder %v2812_v21, 1024  ;;  %v2743_v46 = vadd.s32 256, %v6233_v11  ;;  %5319 = vtanh.f32 %v2511_v60 }
 0x2fd   : > { %v5312_v50 = vpop.eup %5311  ;;  %vm2877_vm8 = vcmp.lt.s32.totalorder %v2813_v41, 1024  ;;  %v2810_v28 = vadd.s32 %v6256_v44, %v2745_v5  ;;  %v2811_v9 = vadd.s32 %v6256_v44, %v2746_v13  ;;  %v2744_v63 = vadd.s32 264, %v6233_v11  ;;  %v7286_v13 = vld [vmem:[%s5556_s17] sm:$0xf] }
 0x2fe   : > { %4765 = vmatpush.bf16.msk.msrb.mxu3 %vm7226_vm0, %v4764_v49  ;;  %v2773_v55 = vadd.s32 496, %v6233_v11  ;;  %v2774_v7 = vadd.s32 504, %v6233_v11  ;;  %5321 = vtanh.f32 %v2512_v35  ;;  %v2510_v4 = vmul.f32 0.7978846, %v2446_v37  ;;  %v7268_v48 = vpop.f32.mrf.mxu3  ;;  %vm4772_vm9 = vmpackc.low %vm2877_vm8, %vm2876_vm7 }
 0x2ff   : > { %v5314_v45 = vpop.eup %5313  ;;  %v2195_v56 = vmul.f32 0.5, %v7134_v8  ;;  %v7886_v30 = vpack.c.bf16 %v7031_v40, %v7029_v14  ;;  %5323 = vtanh.f32 %v2509_v17  ;;  %v2643_v23 = vadd.f32 1.0, %v5312_v50 }
 0x300   : > { %v5316_v12 = vpop.eup %5315  ;;  %v2196_v2 = vmul.f32 0.5, %v7142_v36  ;;  %v2808_v38 = vadd.s32 %v6256_v44, %v2743_v46  ;;  %v2644_v31 = vadd.f32 1.0, %v5314_v45  ;;  %vm2874_vm10 = vcmp.lt.s32.totalorder %v2810_v28, 1024 }
 0x301   : > { %v5318_v49 = vpop.eup %5317  ;;  %vm2875_vm11 = vcmp.lt.s32.totalorder %v2811_v9, 1024  ;;  %v2809_v14 = vadd.s32 %v6256_v44, %v2744_v63  ;;  %v2771_v40 = vadd.s32 480, %v6233_v11  ;;  %v2838_v59 = vadd.s32 %v6256_v44, %v2773_v55 }
 0x302   : > { %4768 = vmatpush.bf16.msk.msrb.mxu3 %vm4766_vm3, %v4767_v42  ;;  %v5320_v8 = vpop.eup %5319  ;;  %v2839_v27 = vadd.s32 %v6256_v44, %v2774_v7  ;;  %v2772_v36 = vadd.s32 488, %v6233_v11  ;;  %5325 = vtanh.f32 %v2510_v4  ;;  %v7887_v52 = vpack.c.bf16 %v7021_v6, %v7019_v20  ;;  %vm4775_vm12 = vmpackc.low %vm2875_vm11, %vm2874_vm10 }
 0x303   : > { %v2193_v22 = vmul.f32 0.5, %v7089_v61  ;;  %v2194_v33 = vmul.f32 0.5, %v7116_v25  ;;  %v2641_v60 = vadd.f32 1.0, %v5316_v12  ;;  %v2642_v42 = vadd.f32 1.0, %v5318_v49 }
 0x304   : > { %v7258_v32 = vpop.f32.mrf.mxu2  ;;  %v5322_v21 = vpop.eup %5321  ;;  %vm2872_vm13 = vcmp.lt.s32.totalorder %v2808_v38, 1024  ;;  %v2707_v41 = vmul.f32 %v2643_v23, %v2195_v56  ;;  %v2708_v5 = vmul.f32 %v2644_v31, %v2196_v2  ;;  %v7289_v35 = vperm.slane %v7286_v13, 2 }
 0x305   : > { %v5324_v37 = vpop.eup %5323  ;;  %vm2873_vm14 = vcmp.lt.s32.totalorder %v2809_v14, 1024  ;;  %v2836_v20 = vadd.s32 %v6256_v44, %v2771_v40  ;;  %v2769_v6 = vadd.s32 464, %v6233_v11  ;;  %v2770_v61 = vadd.s32 472, %v6233_v11 }
 0x306   : > { %4771 = vmatpush.bf16.msk.msrb.mxu3 %vm7250_vm6, %v7886_v30  ;;  %vm2902_vm15 = vcmp.lt.s32.totalorder %v2838_v59, 1024  ;;  %vm2903_vm0 = vcmp.lt.s32.totalorder %v2839_v27, 1024  ;;  %v2837_v17 = vadd.s32 %v6256_v44, %v2772_v36  ;;  %v7888_v50 = vpack.c.bf16 %v7006_v18, %v7004_v57  ;;  %vm7301_vm1 = vmpackc.low %vm2873_vm14, %vm2872_vm13  ;;  %v7309_v12 = vpop.f32.mrf.mxu3 }
 0x307   : > { %v2191_v24 = vmul.f32 0.5, %v7103_v43  ;;  %v2192_v46 = vmul.f32 0.5, %v7107_v29  ;;  %v2639_v45 = vadd.f32 1.0, %v5320_v8  ;;  %v2640_v28 = vadd.f32 1.0, %v5322_v21  ;;  %vm4789_vm4 = vmpackc.low %vm2903_vm0, %vm2902_vm15 }
 0x308   : > { %v5326_v9 = vpop.eup %5325  ;;  %vm3135_vm2 = vcmp.eq.s32.totalorder %v6233_v11, %v7289_v35  ;;  %vm3139_vm3 = vcmp.eq.s32.totalorder %v6502_v53, %v7289_v35  ;;  %v2705_v57 = vmul.f32 %v2641_v60, %v2193_v22  ;;  %v2706_v18 = vmul.f32 %v2642_v42, %v2194_v33 }
 0x309   : > { %v4790_v43 = vpack.c.bf16 %v2708_v5, %v2707_v41  ;;  %vm2900_vm5 = vcmp.lt.s32.totalorder %v2836_v20, 1024  ;;  %v2834_v29 = vadd.s32 %v6256_v44, %v2769_v6  ;;  %v2835_v55 = vadd.s32 %v6256_v44, %v2770_v61  ;;  %vm4781_vm7 = vmpackc.low %vm3139_vm3, %vm3135_vm2 }
 0x30a   : > { %4774 = vmatpush.bf16.msk.msrb.mxu3 %vm4772_vm9, %v7887_v52  ;;  %vm2901_vm6 = vcmp.lt.s32.totalorder %v2837_v17, 1024  ;;  %v2767_v4 = vadd.s32 448, %v6233_v11  ;;  %v2768_v56 = vadd.s32 456, %v6233_v11  ;;  %v7321_v30 = vadd.f32 %v7258_v32, %v5849_v19 }
 0x30b   : > { %v7891_v49 = vpack.c.bf16 %v6975_v15, %v6973_v58  ;;  %v2189_v23 = vmul.f32 0.5, %v7078_v47  ;;  %v2703_v2 = vmul.f32 %v2639_v45, %v2191_v24  ;;  %v2190_v32 = vmul.f32 0.5, %v7086_v34  ;;  %vm4792_vm8 = vmpackc.low %vm2901_vm6, %vm2900_vm5 }
 0x30c   : > { %v2105_v25 = vpop.f32.mrf.mxu2  ;;  %v2637_v38 = vadd.f32 1.0, %v5324_v37  ;;  %v2638_v31 = vadd.f32 1.0, %v5326_v9  ;;  %v7338_v58 = vadd.f32 %v7232_v54, %v5849_v19  ;;  %v4793_v15 = vpack.c.bf16 %v2706_v18, %v2705_v57 }
 0x30d   : > { %v7315_v7 = vadd.f32 %v2105_v25, %v5849_v19  ;;  %v2704_v14 = vmul.f32 %v2640_v28, %v2192_v46  ;;  %vm2898_vm9 = vcmp.lt.s32.totalorder %v2834_v29, 1024  ;;  %v7892_v8 = vmov 1.0|1.0  }
 0x30e   : > { %4777 = vmatpush.bf16.msk.msrb.mxu3 %vm4775_vm12, %v7888_v50  ;;  %vm2899_vm10 = vcmp.lt.s32.totalorder %v2835_v55, 1024  ;;  %v2832_v47 = vadd.s32 %v6256_v44, %v2767_v4  ;;  %v2833_v34 = vadd.s32 %v6256_v44, %v2768_v56  ;;  %v7347_v59 = vadd.f32 %v7197_v39, %v5849_v19  ;;  %v7360_v41 = vpop.f32.mrf.mxu3 }
 0x30f   : > { %v2250_v40 = vmul.f32 0.044715, %v7315_v7  ;;  %v2249_v54 = vmul.f32 0.044715, %v7321_v30  ;;  %v2701_v52 = vmul.f32 %v2637_v38, %v2189_v23  ;;  %v7355_v22 = vadd.f32 %v7174_v62, %v5849_v19  ;;  %vm4795_vm11 = vmpackc.low %vm2899_vm10, %vm2898_vm9 }
 0x310   : > { %v2248_v33 = vmul.f32 0.044715, %v7338_v58  ;;  %v4796_v60 = vpack.c.bf16 %v2704_v14, %v2703_v2  ;;  %v2702_v42 = vmul.f32 %v2638_v31, %v2190_v32  ;;  %vm2896_vm12 = vcmp.lt.s32.totalorder %v2832_v47, 1024 }
 0x311   : > { %v2314_v39 = vmul.f32 %v2250_v40, %v7315_v7  ;;  %vm2897_vm13 = vcmp.lt.s32.totalorder %v2833_v34, 1024  ;;  %v7364_v5 = vadd.f32 %v7137_v3, %v5849_v19  ;;  %v2247_v62 = vmul.f32 0.044715, %v7347_v59 }
 0x312   : > { %4780 = vmatpush.bf16.msk.msrb.mxu3 %vm7301_vm1, %v7891_v49  ;;  %v2313_v37 = vmul.f32 %v2249_v54, %v7321_v30  ;;  %v2246_v6 = vmul.f32 0.044715, %v7355_v22  ;;  %v2312_v61 = vmul.f32 %v2248_v33, %v7338_v58  ;;  %vm4798_vm14 = vmpackc.low %vm2897_vm13, %vm2896_vm12  ;;  %v4799_v50 = vpack.c.bf16 %v2702_v42, %v2701_v52 }
 0x313   : > { %v2378_v25 = vmul.f32 %v2314_v39, %v7315_v7  ;;  %v2245_v3 = vmul.f32 0.044715, %v7364_v5  ;;  %v2311_v24 = vmul.f32 %v2247_v62, %v7347_v59  ;;  %vm3143_vm15 = vcmp.eq.s32.totalorder %v6431_v10, %v7289_v35 }
 0x314   : > { %v2108_v27 = vpop.f32.mrf.mxu2  ;;  %v2377_v46 = vmul.f32 %v2313_v37, %v7321_v30  ;;  %vm3147_vm0 = vcmp.eq.s32.totalorder %v6440_v1, %v7289_v35  ;;  %v2310_v63 = vmul.f32 %v2246_v6, %v7355_v22  ;;  %v2376_v57 = vmul.f32 %v2312_v61, %v7338_v58 }
 0x315   : > { %4782 = vmatmul.msk.bf16.vlgmr.msrb.gmra.mxu3 %vm4781_vm7, %v7892_v8  ;;  %v7351_v36 = vadd.f32 %v2108_v27, %v5849_v19  ;;  %v2442_v18 = vadd.f32 %v2378_v25, %v7315_v7  ;;  %vm4783_vm1 = vmpackc.low %vm3147_vm0, %vm3143_vm15  ;;  %v2309_v55 = vmul.f32 %v2245_v3, %v7364_v5  ;;  %v2765_v27 = vadd.s32 432, %v6233_v11 }
 0x316   : > { %4791 = vmatpush.bf16.msk.msra.mxu3 %vm4789_vm4, %v4790_v43  ;;  %v2441_v29 = vadd.f32 %v2377_v46, %v7321_v30  ;;  %v2374_v23 = vmul.f32 %v2310_v63, %v7355_v22  ;;  %v2440_v2 = vadd.f32 %v2376_v57, %v7338_v58  ;;  %v2766_v52 = vadd.s32 440, %v6233_v11 }
 0x317   : > { %v2251_v21 = vmul.f32 0.044715, %v7351_v36  ;;  %v7388_v49 = vpop.f32.mrf.mxu3  ;;  %v2506_v32 = vmul.f32 0.7978846, %v2442_v18  ;;  %v2830_v37 = vadd.s32 %v6256_v44, %v2765_v27  ;;  %vm3151_vm2 = vcmp.eq.s32.totalorder %v6397_v16, %v7289_v35 }
 0x318   : > { %v2505_v31 = vmul.f32 0.7978846, %v2441_v29  ;;  %v2438_v47 = vadd.f32 %v2374_v23, %v7355_v22  ;;  %v2504_v34 = vmul.f32 0.7978846, %v2440_v2  ;;  %v2831_v6 = vadd.s32 %v6256_v44, %v2766_v52 }
 0x319   : > { %v2315_v20 = vmul.f32 %v2251_v21, %v7351_v36  ;;  %v2763_v21 = vadd.s32 416, %v6233_v11  ;;  %vm3155_vm3 = vcmp.eq.s32.totalorder %v6411_v0, %v7289_v35  ;;  %vm2894_vm4 = vcmp.lt.s32.totalorder %v2830_v37, 1024 }
 0x31a   : > { %4794 = vmatpush.bf16.msk.msra.mxu3 %vm4792_vm8, %v4793_v15  ;;  %v2373_v15 = vmul.f32 %v2309_v55, %v7364_v5  ;;  %v2502_v39 = vmul.f32 0.7978846, %v2438_v47  ;;  %v2762_v63 = vadd.s32 408, %v6233_v11  ;;  %vm4785_vm5 = vmpackc.low %vm3155_vm3, %vm3151_vm2  ;;  %vm2895_vm6 = vcmp.lt.s32.totalorder %v2831_v6, 1024 }
 0x31b   : > { %v2379_v17 = vmul.f32 %v2315_v20, %v7351_v36  ;;  %v2764_v20 = vadd.s32 424, %v6233_v11  ;;  %v2186_v55 = vmul.f32 0.5, %v7315_v7  ;;  %vm4801_vm8 = vmpackc.low %vm2895_vm6, %vm2894_vm4  ;;  %v2183_v27 = vmul.f32 0.5, %v7347_v59 }
 0x31c   : > { %v2110_v45 = vpop.f32.mrf.mxu2  ;;  %v2437_v33 = vadd.f32 %v2373_v15, %v7364_v5  ;;  %v2759_v15 = vadd.s32 384, %v6233_v11  ;;  %v2182_v37 = vmul.f32 0.5, %v7355_v22  ;;  %v2181_v6 = vmul.f32 0.5, %v7364_v5 }
 0x31d   : > { %v2443_v28 = vadd.f32 %v2379_v17, %v7351_v36  ;;  %v2111_v9 = vadd.f32 %v2110_v45, %v5849_v19  ;;  %v2375_v19 = vmul.f32 %v2311_v24, %v7347_v59  ;;  %v2828_v24 = vadd.s32 %v6256_v44, %v2763_v21 }
 0x31e   : > { %4797 = vmatpush.bf16.msk.msra.mxu3 %vm4795_vm11, %v4796_v60  ;;  %v2501_v25 = vmul.f32 0.7978846, %v2437_v33  ;;  %v2829_v45 = vadd.s32 %v6256_v44, %v2764_v20  ;;  %v3132_v5 = vperm.slane %v7286_v13, 3 }
 0x31f   : > { %v2252_v43 = vmul.f32 0.044715, %v2111_v9  ;;  %v2507_v4 = vmul.f32 0.7978846, %v2443_v28  ;;  %v2439_v14 = vadd.f32 %v2375_v19, %v7347_v59  ;;  %v7399_v42 = vpop.f32.mrf.mxu3  ;;  %v2761_v28 = vadd.s32 400, %v6233_v11 }
 0x320   : > { %v2188_v18 = vmul.f32 0.5, %v2111_v9  ;;  %vm2892_vm7 = vcmp.lt.s32.totalorder %v2828_v24, 1024  ;;  %vm2893_vm9 = vcmp.lt.s32.totalorder %v2829_v45, 1024  ;;  %vm3136_vm4 = vcmp.eq.s32.totalorder %v6233_v11, %v3132_v5 }
 0x321   : > { %v2316_v56 = vmul.f32 %v2252_v43, %v2111_v9  ;;  %5327 = vtanh.f32 %v2507_v4  ;;  %v2503_v60 = vmul.f32 0.7978846, %v2439_v14  ;;  %v2760_v14 = vadd.s32 392, %v6233_v11  ;;  %vm4804_vm10 = vmpackc.low %vm2893_vm9, %vm2892_vm7 }
 0x322   : > { %4800 = vmatpush.bf16.msk.msra.mxu3 %vm4798_vm14, %v4799_v50  ;;  %5329 = vtanh.f32 %v2506_v32  ;;  %v2187_v50 = vmul.f32 0.5, %v7351_v36  ;;  %v2185_v36 = vmul.f32 0.5, %v7321_v30  ;;  %v2826_v32 = vadd.s32 %v6256_v44, %v2761_v28 }
 0x323   : > { %v2380_v38 = vmul.f32 %v2316_v56, %v2111_v9  ;;  %5331 = vtanh.f32 %v2505_v31  ;;  %v2827_v30 = vadd.s32 %v6256_v44, %v2762_v63  ;;  %v2825_v21 = vadd.s32 %v6256_v44, %v2760_v14  ;;  %v3248_v14 = vld [vmem:[#allocation2 + $0x10] sm:$0xff] }
 0x324   : > { %vm2890_vm11 = vcmp.lt.s32.totalorder %v2826_v32, 1024  ;;  %vm3144_vm7 = vcmp.eq.s32.totalorder %v6431_v10, %v3132_v5 }
 0x325   : > { %4784 = vmatmul.msk.bf16.gmra.mxu3 %vm4783_vm1, %v7892_v8  ;;  %v2444_v40 = vadd.f32 %v2380_v38, %v2111_v9  ;;  %vm2891_vm12 = vcmp.lt.s32.totalorder %v2827_v30, 1024  ;;  %vm2889_vm15 = vcmp.lt.s32.totalorder %v2825_v21, 1024  ;;  %v3250_v21 = vld [vmem:[#allocation2 + $0x20] sm:$0xff] }
 0x326   : > { %vm4807_vm13 = vmpackc.low %vm2891_vm12, %vm2890_vm11  ;;  %vm3156_vm11 = vcmp.eq.s32.totalorder %v6411_v0, %v3132_v5  ;;  %v7895_v0 = vld [vmem:[#allocation9_spill] sm:$0xff] }
 0x327   : > { %v2508_v54 = vmul.f32 0.7978846, %v2444_v40  ;;  %v5328_v62 = vpop.eup %5327  ;;  %v7416_v19 = vpop.f32.mrf.mxu3  ;;  %v2184_v40 = vmul.f32 0.5, %v7338_v58  ;;  %v3292_v28 = vadd.f32 %v7388_v49, %v7895_v0  ;;  %v3247_v49 = vld [vmem:[#allocation2 + $0x18] sm:$0xff] }
 0x328   : > { %v5330_v61 = vpop.eup %5329  ;;  %v2635_v3 = vadd.f32 1.0, %v5328_v62 }
 0x329   : > { %5333 = vtanh.f32 %v2508_v54  ;;  %v5332_v17 = vpop.eup %5331  ;;  %v2634_v29 = vadd.f32 1.0, %v5330_v61 }
 0x32a   : > { %5335 = vtanh.f32 %v2504_v34  ;;  %v2699_v4 = vmul.f32 %v2635_v3, %v2187_v50  ;;  %v2633_v23 = vadd.f32 1.0, %v5332_v17  ;;  %v7894_v17 = vld [vmem:[#allocation11_spill] sm:$0xff] }
 0x32b   : > { %5337 = vtanh.f32 %v2503_v60  ;;  %v2698_v31 = vmul.f32 %v2634_v29, %v2186_v55  ;;  %vm3163_vm1 = vcmp.eq.s32.totalorder %v7894_v17, %v7289_v35 }
 0x32c   : > { %5339 = vtanh.f32 %v2502_v39  ;;  %v2697_v47 = vmul.f32 %v2633_v23, %v2185_v36  ;;  %v2824_v39 = vadd.s32 %v6256_v44, %v2759_v15  ;;  %v7896_v36 = vld [vmem:[#allocation12_spill] sm:$0xff] }
 0x32d   : > { %5341 = vtanh.f32 %v2501_v25  ;;  %v7893_v25 = vld [vmem:[#allocation10_spill] sm:$0xff] }
 0x32e   : > { %v4805_v60 = vpack.c.bf16 %v2698_v31, %v2697_v47  ;;  %vm2888_vm14 = vcmp.lt.s32.totalorder %v2824_v39, 1024  ;;  %vm3159_vm0 = vcmp.eq.s32.totalorder %v7893_v25, %v7289_v35 }
 0x32f   : > { %v5334_v46 = vpop.eup %5333  ;;  %v7429_v62 = vpop.f32.mrf.mxu3  ;;  %vm4810_vm2 = vmpackc.low %vm2889_vm15, %vm2888_vm14  ;;  %vm3164_vm14 = vcmp.eq.s32.totalorder %v7894_v17, %v3132_v5 }
 0x330   : > { %v5336_v57 = vpop.eup %5335  ;;  %v2636_v43 = vadd.f32 1.0, %v5334_v46  ;;  %vm4787_vm3 = vmpackc.low %vm3163_vm1, %vm3159_vm0  ;;  %v3299_v15 = vadd.f32 %v7429_v62, %v7201_v26 }
 0x331   : > { %v5338_v2 = vpop.eup %5337  ;;  %v2632_v9 = vadd.f32 1.0, %v5336_v57  ;;  %v3245_v57 = vld [vmem:[#allocation2 + $0x30] sm:$0xff] }
 0x332   : > { %v2700_v56 = vmul.f32 %v2636_v43, %v2188_v18  ;;  %v5340_v38 = vpop.eup %5339  ;;  %v2631_v34 = vadd.f32 1.0, %v5338_v2 }
 0x333   : > { %v5342_v54 = vpop.eup %5341  ;;  %v2696_v52 = vmul.f32 %v2632_v9, %v2184_v40  ;;  %v2630_v33 = vadd.f32 1.0, %v5340_v38  ;;  %v7897_v9 = vld [vmem:[#allocation13_spill] sm:$0xff] }
 0x334   : > { %v4802_v7 = vpack.c.bf16 %v2700_v56, %v2699_v4  ;;  %v2695_v58 = vmul.f32 %v2631_v34, %v2183_v27  ;;  %v2629_v20 = vadd.f32 1.0, %v5342_v54  ;;  %v3246_v4 = vld [vmem:[#allocation2] sm:$0xff]  ;;  %v3297_v32 = vadd.f32 %v7416_v19, %v7897_v9  ;;  %v3249_v27 = vld [vmem:[#allocation2 + $0x8] sm:$0xff] }
 0x335   : > { %4786 = vmatmul.msk.bf16.gmra.mxu3 %vm4785_vm5, %v7892_v8  ;;  %v2694_v61 = vmul.f32 %v2630_v33, %v2182_v37  ;;  %vm3140_vm5 = vcmp.eq.s32.totalorder %v6502_v53, %v3132_v5 }
 0x336   : > { %4803 = vmatpush.bf16.msk.msra.mxu3 %vm4801_vm8, %v4802_v7  ;;  %v4808_v59 = vpack.c.bf16 %v2696_v52, %v2695_v58  ;;  %v2693_v44 = vmul.f32 %v2629_v20, %v2181_v6  ;;  %vm4813_vm6 = vmpackc.low %vm3140_vm5, %vm3136_vm4  ;;  %vm3148_vm8 = vcmp.eq.s32.totalorder %v6440_v1, %v3132_v5  ;;  %v3251_v20 = vld [vmem:[#allocation2 + $0x28] sm:$0xff] }
 0x337   : > { %v3301_v22 = vpop.f32.mrf.mxu3  ;;  %vm4815_vm9 = vmpackc.low %vm3148_vm8, %vm3144_vm7 }
 0x338   : > { %v4811_v50 = vpack.c.bf16 %v2694_v61, %v2693_v44  ;;  %v3302_v3 = vadd.f32 %v3301_v22, %v7242_v51  ;;  %v3252_v44 = vld [vmem:[#allocation2 + $0x38] sm:$0xff] }
 0x33a   : > { %4806 = vmatpush.bf16.msk.msra.mxu3 %vm4804_vm10, %v4805_v60  ;;  %vm3152_vm10 = vcmp.eq.s32.totalorder %v6397_v16, %v3132_v5 }
 0x33b   : > { %vm4817_vm12 = vmpackc.low %vm3156_vm11, %vm3152_vm10 }
 0x33e   : > { %4809 = vmatpush.bf16.msk.msra.mxu3 %vm4807_vm13, %v4808_v59  ;;  %vm3160_vm13 = vcmp.eq.s32.totalorder %v7893_v25, %v3132_v5 }
 0x33f   : > { %v3303_v24 = vpop.f32.mrf.mxu3  ;;  %vm4819_vm15 = vmpackc.low %vm3164_vm14, %vm3160_vm13 }
 0x340   : > { %v3304_v60 = vadd.f32 %v3303_v24, %v7268_v48 }
 0x342   : > { %4812 = vmatpush.bf16.msk.msra.mxu3 %vm4810_vm2, %v4811_v50 }
 0x345   : > { %4788 = vmatmul.msk.bf16.gmra.mxu3 %vm4787_vm3, %v7892_v8 }
 0x347   : > { %v3306_v35 = vpop.f32.mrf.mxu3 }
 0x348   : > { %v7444_v46 = vadd.f32 %v3306_v35, %v7309_v12 }
 0x34f   : > { %v3308_v11 = vpop.f32.mrf.mxu3 }
 0x350   : > { %v3309_v25 = vadd.f32 %v3308_v11, %v7360_v41 }
 0x355   : > { %4814 = vmatmul.msk.bf16.vlgmr.msra.gmra.mxu3 %vm4813_vm6, %v7892_v8 }
 0x365   : > { %4816 = vmatmul.msk.bf16.gmra.mxu3 %vm4815_vm9, %v7892_v8 }
 0x375   : > { %4818 = vmatmul.msk.bf16.gmra.mxu3 %vm4817_vm12, %v7892_v8 }
 0x385   : > { %4820 = vmatmul.msk.bf16.gmra.mxu3 %vm4819_vm15, %v7892_v8  ;;  %v3294_v8 = vadd.f32 %v7399_v42, %v7896_v36 }
 0x398   : > { %v3320_v10 = vpop.f32.mrf.mxu3 }
 0x399   : > { %v3321_v63 = vadd.f32 %v3320_v10, %v3292_v28 }
 0x3a0   : > { %v3322_v1 = vpop.f32.mrf.mxu3 }
 0x3a1   : > { %v3323_v55 = vadd.f32 %v3322_v1, %v3294_v8 }
 0x3a8   : > { %v3325_v53 = vpop.f32.mrf.mxu3 }
 0x3a9   : > { %v3326_v30 = vadd.f32 %v3325_v53, %v3297_v32 }
 0x3b0   : > { %v3327_v51 = vpop.f32.mrf.mxu3 }
 0x3b1   : > { %v3328_v42 = vadd.f32 %v3327_v51, %v3299_v15 }
 0x3b8   : > { %v3330_v13 = vpop.f32.mrf.mxu3 }
 0x3b9   : > { %v3331_v54 = vadd.f32 %v3330_v13, %v3302_v3 }
 0x3c0   : > { %v3332_v12 = vpop.f32.mrf.mxu3 }
 0x3c1   : > { %v3333_v39 = vadd.f32 %v3332_v12, %v3304_v60 }
 0x3c8   : > { %v3335_v16 = vpop.f32.mrf.mxu3 }
 0x3c9   : > { %v3336_v62 = vadd.f32 %v3335_v16, %v7444_v46 }
 0x3d0   : > { %v3337_v45 = vpop.f32.mrf.mxu3 }
 0x3d1   : > { %v3338_v17 = vadd.f32 %v3337_v45, %v3309_v25 }
 0x3d8   : > { %v3349_v18 = vpop.f32.mrf.mxu3 }
 0x3d9   : > { %v3350_v43 = vadd.f32 %v3349_v18, %v3321_v63 }
 0x3db   : > { %v3369_v29 = vadd.f32 %v3350_v43, %v3245_v57 }
 0x3dd   : > { %3377 = vst [vmem:[#allocation2 + $0x30] sm:$0xff] %v3369_v29 }
 0x3e0   : > { %v3351_v56 = vpop.f32.mrf.mxu3 }
 0x3e1   : > { %v3352_v23 = vadd.f32 %v3351_v56, %v3323_v55 }
 0x3e3   : > { %v3370_v2 = vadd.f32 %v3352_v23, %v3246_v4 }
 0x3e5   : > { %3378 = vst [vmem:[#allocation2] sm:$0xff] %v3370_v2 }
 0x3e8   : > { %v3354_v38 = vpop.f32.mrf.mxu3 }
 0x3e9   : > { %v3355_v7 = vadd.f32 %v3354_v38, %v3326_v30 }
 0x3eb   : > { %v3371_v31 = vadd.f32 %v3355_v7, %v3247_v49 }
 0x3ed   : > { %3379 = vst [vmem:[#allocation2 + $0x18] sm:$0xff] %v3371_v31 }
 0x3f0   : > { %v3356_v40 = vpop.f32.mrf.mxu3 }
 0x3f1   : > { %v3357_v47 = vadd.f32 %v3356_v40, %v3328_v42 }
 0x3f3   : > { %v3372_v34 = vadd.f32 %v3357_v47, %v3248_v14 }
 0x3f5   : > { %3380 = vst [vmem:[#allocation2 + $0x10] sm:$0xff] %v3372_v34 }
 0x3f8   : > { %v3359_v52 = vpop.f32.mrf.mxu3 }
 0x3f9   : > { %v3360_v19 = vadd.f32 %v3359_v52, %v3331_v54 }
 0x3fb   : > { %v3373_v33 = vadd.f32 %v3360_v19, %v3249_v27 }
 0x3fd   : > { %3381 = vst [vmem:[#allocation2 + $0x8] sm:$0xff] %v3373_v33 }
 0x400   : > { %v3361_v58 = vpop.f32.mrf.mxu3 }
 0x401   : > { %v3362_v37 = vadd.f32 %v3361_v58, %v3333_v39 }
 0x403   : > { %v3374_v26 = vadd.f32 %v3362_v37, %v3250_v21 }
 0x405   : > { %3382 = vst [vmem:[#allocation2 + $0x20] sm:$0xff] %v3374_v26 }
 0x408   : > { %v3364_v6 = vpop.f32.mrf.mxu3 }
 0x409   : > { %v3365_v59 = vadd.f32 %v3364_v6, %v3336_v62 }
 0x40b   : > { %v3375_v61 = vadd.f32 %v3365_v59, %v3251_v20 }
 0x40d   : > { %3383 = vst [vmem:[#allocation2 + $0x28] sm:$0xff] %v3375_v61 }
 0x410   : > { %v3366_v50 = vpop.f32.mrf.mxu3 }
 0x411   : > { %v3367_v48 = vadd.f32 %v3366_v50, %v3338_v17  ;;  %3388 = sbr.rel (%p4821_p6) target bundleno = 2107 (0x83b), region = 76 }
 0x413   : > { %v3376_v22 = vadd.f32 %v3367_v48, %v3252_v44 }
 0x415   : > { %3384 = vst [vmem:[#allocation2 + $0x38] sm:$0xff] %v3376_v22 }
 0x416   : > { %v3393_v3 = vld [vmem:[%s7825_s2 + $0x20] sm:$0xff]  ;;  %v3401_v5 = vld [vmem:[#allocation2 + $0x8] sm:$0xff]  ;;  %v3391_v24 = vld [vmem:[%s7825_s2 + $0x10] sm:$0xff]  ;;  %v5452_v49 = vmov 128.0  }
 0x417   : > { %v3409_v41 = vmul.f32 0.033333335, %v3401_v5  ;;  %v3399_v35 = vld [vmem:[#allocation2 + $0x18] sm:$0xff]  ;;  %v3389_v46 = vld [vmem:[%s7825_s2] sm:$0xff]  ;;  %v3397_v11 = vld [vmem:[#allocation2 + $0x30] sm:$0xff]  ;;  %5344 = vrcp.f32 %v5452_v49 }
 0x418   : > { %v3407_v10 = vmul.f32 0.033333335, %v3399_v35  ;;  %v3405_v1 = vmul.f32 0.033333335, %v3397_v11  ;;  %v3402_v53 = vld [vmem:[#allocation2 + $0x20] sm:$0xff]  ;;  %v3400_v13 = vld [vmem:[#allocation2 + $0x10] sm:$0xff] }
 0x419   : > { %v7476_v51 = vadd.f32 %v3409_v41, %v3393_v3  ;;  %v3398_v45 = vld [vmem:[#allocation2] sm:$0xff]  ;;  %v3410_v0 = vmul.f32 0.033333335, %v3402_v53  ;;  %v3394_v28 = vld [vmem:[%s7825_s2 + $0x28] sm:$0xff]  ;;  %v3408_v63 = vmul.f32 0.033333335, %v3400_v13 }
 0x41a   : > { %v3415_v12 = vadd.f32 %v3407_v10, %v3391_v24  ;;  %v3413_v16 = vadd.f32 %v3405_v1, %v3389_v46  ;;  %v3406_v57 = vmul.f32 0.033333335, %v3398_v45  ;;  %v3392_v18 = vld [vmem:[%s7825_s2 + $0x18] sm:$0xff]  ;;  %v3390_v43 = vld [vmem:[%s7825_s2 + $0x8] sm:$0xff]  ;;  %v3395_v2 = vld [vmem:[%s7825_s2 + $0x30] sm:$0xff] }
 0x41b   : > { %3429 = vadd.xlane.f32.xlu2 %v7476_v51  ;;  %v3418_v29 = vadd.f32 %v3410_v0, %v3394_v28  ;;  %v3416_v36 = vadd.f32 %v3408_v63, %v3392_v18  ;;  %v3403_v55 = vld [vmem:[#allocation2 + $0x28] sm:$0xff]  ;;  %v3396_v9 = vld [vmem:[%s7825_s2 + $0x38] sm:$0xff]  ;;  %v5017_v1 = vld [vmem:[%s7829_s6 + $0x30] sm:$0xff] }
 0x41c   : > { %3425 = vadd.xlane.f32.xlu1 %v3415_v12  ;;  %3421 = vadd.xlane.f32.xlu0 %v3413_v16  ;;  %v3414_v8 = vadd.f32 %v3406_v57, %v3390_v43  ;;  %v3404_v4 = vld [vmem:[#allocation2 + $0x38] sm:$0xff]  ;;  %v3411_v56 = vmul.f32 0.033333335, %v3403_v55  ;;  %v5016_v53 = vld [vmem:[%s7829_s6 + $0x28] sm:$0xff]  ;;  %v5011_v43 = vld [vmem:[%s7829_s6] sm:$0xff] }
 0x41d   : > { %v3412_v23 = vmul.f32 0.033333335, %v3404_v4  ;;  %v5345_v38 = vpop.eup %5344  ;;  %v5018_v10 = vld [vmem:[%s7829_s6 + $0x38] sm:$0xff]  ;;  %v5012_v0 = vld [vmem:[%s7829_s6 + $0x8] sm:$0xff] }
 0x41e   : > { %v3419_v32 = vadd.f32 %v3411_v56, %v3395_v2  ;;  %v3438_v7 = vmul.f32 128.0, %v5345_v38  ;;  %vm3442_vm0 = vweird.f32 %v5345_v38  ;;  %3675 = vmatpush.bf16.msra.mxu0 %v5018_v10  ;;  %5059 = vmatpush.bf16.msra.mxu3 %v5018_v10  ;;  %v5014_v13 = vld [vmem:[%s7829_s6 + $0x18] sm:$0xff] }
 0x41f   : > { %v3420_v30 = vadd.f32 %v3412_v23, %v3396_v9 }
 0x420   : > { %v3439_v31 = vsub.f32 1.0, %v3438_v7 }
 0x422   : > { %v3440_v15 = vmul.f32 %v5345_v38, %v3439_v31  ;;  %3676 = vmatpush.bf16.msra.mxu0 %v5017_v1  ;;  %5060 = vmatpush.bf16.msra.mxu3 %v5017_v1 }
 0x423   : > { %3431 = vadd.xlane.f32.xlu2 %v3418_v29 }
 0x424   : > { %3427 = vadd.xlane.f32.xlu1 %v3416_v36  ;;  %3423 = vadd.xlane.f32.xlu0 %v3414_v8  ;;  %v3441_v42 = vadd.f32 %v5345_v38, %v3440_v15 }
 0x426   : > { %v7494_v14 = vsel %vm3442_vm0, %v5345_v38, %v3441_v42  ;;  %3677 = vmatpush.bf16.msra.mxu0 %v5016_v53  ;;  %5061 = vmatpush.bf16.msra.mxu3 %v5016_v53 }
 0x42c   : > { %3433 = vadd.xlane.f32.xlu0 %v3419_v32  ;;  %3435 = vadd.xlane.f32.xlu1 %v3420_v30 }
 0x48e   : > { %v3430_v40 = vpop.xlane.xlu2 %3429 }
 0x48f   : > { %v3426_v47 = vpop.xlane.xlu1 %3425  ;;  %v3422_v34 = vpop.xlane.xlu0 %3421  ;;  %v3448_v61 = vmul.f32 %v7494_v14, %v3430_v40 }
 0x490   : > { %v3446_v54 = vmul.f32 %v7494_v14, %v3426_v47  ;;  %v3444_v27 = vmul.f32 %v7494_v14, %v3422_v34 }
 0x491   : > { %v7523_v50 = vsub.f32 %v7476_v51, %v3448_v61  ;;  %v5015_v51 = vld [vmem:[%s7829_s6 + $0x20] sm:$0xff] }
 0x492   : > { %v7498_v52 = vsub.f32 %v3415_v12, %v3446_v54  ;;  %v7500_v19 = vsub.f32 %v3413_v16, %v3444_v27  ;;  %3678 = vmatpush.bf16.msra.mxu0 %v5015_v51  ;;  %5062 = vmatpush.bf16.msra.mxu3 %v5015_v51  ;;  %v5013_v12 = vld [vmem:[%s7829_s6 + $0x10] sm:$0xff] }
 0x493   : > { %v3464_v24 = vmul.f32 %v7523_v50, %v7523_v50 }
 0x494   : > { %v3462_v33 = vmul.f32 %v7498_v52, %v7498_v52  ;;  %v3460_v60 = vmul.f32 %v7500_v19, %v7500_v19 }
 0x496   : > { %3472 = vadd.xlane.f32.xlu1 %v3462_v33  ;;  %3468 = vadd.xlane.f32.xlu2 %v3460_v60  ;;  %v3432_v39 = vpop.xlane.xlu2 %3431 }
 0x497   : > { %v3449_v21 = vmul.f32 %v7494_v14, %v3432_v39  ;;  %v3428_v58 = vpop.xlane.xlu1 %3427  ;;  %v3424_v37 = vpop.xlane.xlu0 %3423  ;;  %3679 = vmatpush.bf16.msra.mxu0 %v5014_v13  ;;  %5063 = vmatpush.bf16.msra.mxu3 %v5014_v13  ;;  %v7902_v13 = vld [vmem:[#allocation8_spill] sm:$0xff] }
 0x498   : > { %v3447_v26 = vmul.f32 %v7494_v14, %v3428_v58  ;;  %v3445_v62 = vmul.f32 %v7494_v14, %v3424_v37 }
 0x499   : > { %v7509_v20 = vsub.f32 %v3418_v29, %v3449_v21 }
 0x49a   : > { %v7511_v6 = vsub.f32 %v3416_v36, %v3447_v26  ;;  %v7513_v59 = vsub.f32 %v3414_v8, %v3445_v62 }
 0x49b   : > { %v3465_v25 = vmul.f32 %v7509_v20, %v7509_v20  ;;  %3680 = vmatpush.bf16.msra.mxu0 %v5013_v12  ;;  %5064 = vmatpush.bf16.msra.mxu3 %v5013_v12  ;;  %v7595_v12 = vperm.slane %v7902_v13, 0 }
 0x49c   : > { %v3463_v17 = vmul.f32 %v7511_v6, %v7511_v6  ;;  %v3461_v44 = vmul.f32 %v7513_v59, %v7513_v59 }
 0x49e   : > { %3478 = vadd.xlane.f32.xlu1 %v3465_v25  ;;  %3474 = vadd.xlane.f32.xlu2 %v3463_v17 }
 0x49f   : > { %3470 = vadd.xlane.f32.xlu0 %v3461_v44  ;;  %v3434_v48 = vpop.xlane.xlu0 %3433  ;;  %v3436_v3 = vpop.xlane.xlu1 %3435  ;;  %3681 = vmatpush.bf16.msra.mxu0 %v5012_v0 }
 0x4a0   : > { %v3450_v22 = vmul.f32 %v7494_v14, %v3434_v48  ;;  %v3451_v41 = vmul.f32 %v7494_v14, %v3436_v3  ;;  %5065 = vmatpush.bf16.msra.mxu3 %v5012_v0 }
 0x4a2   : > { %v7526_v5 = vsub.f32 %v3419_v32, %v3450_v22  ;;  %v7533_v46 = vsub.f32 %v3420_v30, %v3451_v41 }
 0x4a3   : > { %3682 = vmatpush.bf16.msra.mxu0 %v5011_v43 }
 0x4a4   : > { %v3466_v35 = vmul.f32 %v7526_v5, %v7526_v5  ;;  %v3467_v11 = vmul.f32 %v7533_v46, %v7533_v46  ;;  %5066 = vmatpush.bf16.msra.mxu3 %v5011_v43 }
 0x4a6   : > { %3480 = vadd.xlane.f32.xlu2 %v3466_v35 }
 0x4a7   : > { %3476 = vadd.xlane.f32.xlu0 %v3464_v24 }
 0x4af   : > { %3482 = vadd.xlane.f32.xlu0 %v3467_v11 }
 0x509   : > { %v3473_v16 = vpop.xlane.xlu1 %3472  ;;  %v3469_v45 = vpop.xlane.xlu2 %3468 }
 0x50a   : > { %v3486_v28 = vmul.f32 %v3473_v16, %v7494_v14  ;;  %v3484_v63 = vmul.f32 %v3469_v45, %v7494_v14 }
 0x50c   : > { %v3494_v57 = vadd.f32 1e-05, %v3486_v28  ;;  %v3492_v18 = vadd.f32 1e-05, %v3484_v63 }
 0x50e   : > { %5346 = vrsqrt.f32 %v3494_v57  ;;  %vm3526_vm1 = vweird.f32 %v3494_v57  ;;  %vm3506_vm5 = vweird.f32 %v3492_v18 }
 0x50f   : > { %5348 = vrsqrt.f32 %v3492_v18 }
 0x511   : > { %v3479_v29 = vpop.xlane.xlu1 %3478  ;;  %v3475_v36 = vpop.xlane.xlu2 %3474 }
 0x512   : > { %v3489_v8 = vmul.f32 %v3479_v29, %v7494_v14  ;;  %v3487_v55 = vmul.f32 %v3475_v36, %v7494_v14  ;;  %v3471_v4 = vpop.xlane.xlu0 %3470  ;;  %v7602_v36 = vperm.slane %v7902_v13, 1 }
 0x513   : > { %v3485_v56 = vmul.f32 %v3471_v4, %v7494_v14 }
 0x514   : > { %v5347_v23 = vpop.eup %5346  ;;  %v7566_v2 = vadd.f32 1e-05, %v3489_v8  ;;  %v3495_v9 = vadd.f32 1e-05, %v3487_v55 }
 0x515   : > { %v5349_v32 = vpop.eup %5348  ;;  %v3521_v30 = vmul.f32 %v5347_v23, %v3494_v57  ;;  %v3493_v49 = vadd.f32 1e-05, %v3485_v56  ;;  %vm3527_vm2 = vweird.f32 %v5347_v23 }
 0x516   : > { %v3501_v38 = vmul.f32 %v5349_v32, %v3492_v18  ;;  %5350 = vrsqrt.f32 %v7566_v2  ;;  %vm3507_vm3 = vweird.f32 %v5349_v32  ;;  %vm7578_vm4 = vmor %vm3526_vm1, %vm3527_vm2  ;;  %vm3536_vm7 = vweird.f32 %v3495_v9 }
 0x517   : > { %v3522_v7 = vmul.f32 %v5347_v23, %v3521_v30  ;;  %5352 = vrsqrt.f32 %v3495_v9  ;;  %vm7584_vm6 = vmor %vm3506_vm5, %vm3507_vm3  ;;  %vm3516_vm11 = vweird.f32 %v3493_v49  ;;  %vm3556_vm13 = vweird.f32 %v7566_v2 }
 0x518   : > { %v3502_v31 = vmul.f32 %v5349_v32, %v3501_v38  ;;  %5354 = vrsqrt.f32 %v3493_v49 }
 0x519   : > { %v3523_v15 = vmul.f32 0.5, %v3522_v7  ;;  %v3481_v40 = vpop.xlane.xlu2 %3480 }
 0x51a   : > { %v3503_v42 = vmul.f32 0.5, %v3502_v31  ;;  %v3477_v47 = vpop.xlane.xlu0 %3476  ;;  %v3490_v39 = vmul.f32 %v3481_v40, %v7494_v14 }
 0x51b   : > { %v3524_v34 = vsub.f32 1.5, %v3523_v15  ;;  %v3488_v54 = vmul.f32 %v3477_v47, %v7494_v14 }
 0x51c   : > { %v7570_v27 = vpop.eup %5350  ;;  %v3504_v33 = vsub.f32 1.5, %v3503_v42  ;;  %v7582_v22 = vadd.f32 1e-05, %v3490_v39 }
 0x51d   : > { %v5353_v60 = vpop.eup %5352  ;;  %v7573_v21 = vadd.f32 1e-05, %v3488_v54  ;;  %v3525_v37 = vmul.f32 %v5347_v23, %v3524_v34  ;;  %v3551_v26 = vmul.f32 %v7570_v27, %v7566_v2  ;;  %vm3557_vm14 = vweird.f32 %v7570_v27 }
 0x51e   : > { %v5355_v58 = vpop.eup %5354  ;;  %v3531_v62 = vmul.f32 %v5353_v60, %v3495_v9  ;;  %v3505_v61 = vmul.f32 %v5349_v32, %v3504_v33  ;;  %vm3537_vm8 = vweird.f32 %v5353_v60  ;;  %vm3558_vm1 = vmor %vm3556_vm13, %vm3557_vm14  ;;  %vm3566_vm5 = vweird.f32 %v7582_v22 }
 0x51f   : > { %v3511_v25 = vmul.f32 %v5355_v58, %v3493_v49  ;;  %5356 = vrsqrt.f32 %v7573_v21  ;;  %v3552_v24 = vmul.f32 %v7570_v27, %v3551_v26  ;;  %v3529_v11 = vsel %vm7578_vm4, %v5347_v23, %v3525_v37  ;;  %vm3538_vm10 = vmor %vm3536_vm7, %vm3537_vm8 }
 0x520   : > { %v3532_v17 = vmul.f32 %v5353_v60, %v3531_v62  ;;  %v3509_v53 = vsel %vm7584_vm6, %v5349_v32, %v3505_v61  ;;  %vm3517_vm9 = vweird.f32 %v5355_v58  ;;  %5358 = vrsqrt.f32 %v7582_v22 }
 0x521   : > { %v3512_v48 = vmul.f32 %v5355_v58, %v3511_v25  ;;  %v3582_v45 = vmul.f32 %v3529_v11, %v7498_v52  ;;  %v3553_v28 = vmul.f32 0.5, %v3552_v24  ;;  %v3580_v18 = vmul.f32 %v3509_v53, %v7500_v19  ;;  %vm3518_vm12 = vmor %vm3516_vm11, %vm3517_vm9 }
 0x522   : > { %v3533_v41 = vmul.f32 0.5, %v3532_v17  ;;  %v3483_v35 = vpop.xlane.xlu0 %3482  ;;  %vm3546_vm15 = vweird.f32 %v7573_v21 }
 0x523   : > { %v3513_v10 = vmul.f32 0.5, %v3512_v48  ;;  %v3491_v1 = vmul.f32 %v3483_v35, %v7494_v14  ;;  %v3591_v56 = vmul.f32 %v7595_v12, %v3582_v45  ;;  %v3554_v23 = vsub.f32 1.5, %v3553_v28  ;;  %v5023_v45 = vld [vmem:[%s7830_s7 + $0x20] sm:$0xff]  ;;  %v5021_v28 = vld [vmem:[%s7830_s7 + $0x10] sm:$0xff] }
 0x524   : > { %v3534_v51 = vsub.f32 1.5, %v3533_v41  ;;  %v3589_v9 = vmul.f32 %v7595_v12, %v3580_v18 }
 0x525   : > { %v3514_v16 = vsub.f32 1.5, %v3513_v10  ;;  %v5357_v0 = vpop.eup %5356  ;;  %v3499_v57 = vadd.f32 1e-05, %v3491_v1  ;;  %v7614_v7 = vadd.f32 %v7602_v36, %v3591_v56  ;;  %v3555_v15 = vmul.f32 %v7570_v27, %v3554_v23 }
 0x526   : > { %v3535_v63 = vmul.f32 %v5353_v60, %v3534_v51  ;;  %v3541_v29 = vmul.f32 %v5357_v0, %v7573_v21  ;;  %v5359_v32 = vpop.eup %5358  ;;  %vm3547_vm0 = vweird.f32 %v5357_v0  ;;  %v7622_v2 = vadd.f32 %v7602_v36, %v3589_v9 }
 0x527   : > { %v3515_v43 = vmul.f32 %v5355_v58, %v3514_v16  ;;  %5360 = vrsqrt.f32 %v3499_v57  ;;  %v3561_v42 = vmul.f32 %v5359_v32, %v7582_v22  ;;  %vm3548_vm2 = vmor %vm3546_vm15, %vm3547_vm0  ;;  %v3559_v37 = vsel %vm3558_vm1, %v7570_v27, %v3555_v15 }
 0x528   : > { %v3539_v8 = vsel %vm3538_vm10, %v5353_v60, %v3535_v63  ;;  %v3542_v55 = vmul.f32 %v5357_v0, %v3541_v29  ;;  %v3585_v61 = vmul.f32 %v3559_v37, %v7509_v20  ;;  %vm3576_vm3 = vweird.f32 %v3499_v57  ;;  %v5020_v63 = vld [vmem:[%s7830_s7 + $0x8] sm:$0xff] }
 0x529   : > { %v3519_v4 = vsel %vm3518_vm12, %v5355_v58, %v3515_v43  ;;  %v3583_v52 = vmul.f32 %v3539_v8, %v7511_v6  ;;  %v3562_v58 = vmul.f32 %v5359_v32, %v3561_v42  ;;  %vm3567_vm6 = vweird.f32 %v5359_v32  ;;  %v5019_v43 = vld [vmem:[%s7830_s7] sm:$0xff] }
 0x52a   : > { %v3581_v19 = vmul.f32 %v3519_v4, %v7513_v59  ;;  %v3543_v30 = vmul.f32 0.5, %v3542_v55  ;;  %v3594_v44 = vmul.f32 %v7595_v12, %v3585_v61  ;;  %vm3568_vm8 = vmor %vm3566_vm5, %vm3567_vm6 }
 0x52b   : > { %v3592_v49 = vmul.f32 %v7595_v12, %v3583_v52  ;;  %v3563_v25 = vmul.f32 0.5, %v3562_v58 }
 0x52c   : > { %v3590_v38 = vmul.f32 %v7595_v12, %v3581_v19  ;;  %v3544_v6 = vsub.f32 1.5, %v3543_v30 }
 0x52d   : > { %v7617_v59 = vadd.f32 %v7602_v36, %v3592_v49  ;;  %v5361_v31 = vpop.eup %5360  ;;  %v3564_v48 = vsub.f32 1.5, %v3563_v25 }
 0x52e   : > { %v7625_v40 = vadd.f32 %v7602_v36, %v3590_v38  ;;  %v3545_v47 = vmul.f32 %v5357_v0, %v3544_v6  ;;  %v3571_v34 = vmul.f32 %v5361_v31, %v3499_v57  ;;  %vm3577_vm4 = vweird.f32 %v5361_v31  ;;  %v7903_v57 = vld [vmem:[#allocation6_spill] sm:$0xff] }
 0x52f   : > { %v3607_v54 = vpack.c.bf16 %v7617_v59, %v7614_v7  ;;  %vm3578_vm7 = vmor %vm3576_vm3, %vm3577_vm4  ;;  %v3565_v20 = vmul.f32 %v5359_v32, %v3564_v48  ;;  %v7681_v18 = vperm.slane %v7903_v57, 0 }
 0x530   : > { %v3606_v33 = vpack.c.bf16 %v7625_v40, %v7622_v2  ;;  %v3572_v60 = vmul.f32 %v5361_v31, %v3571_v34  ;;  %v3549_v39 = vsel %vm3548_vm2, %v5357_v0, %v3545_v47  ;;  %v5022_v0 = vld [vmem:[%s7830_s7 + $0x18] sm:$0xff] }
 0x531   : > { %3688 = vmatmul.bf16.vlgmr.msra.gmra.mxu3 %v3607_v54  ;;  %v3584_v26 = vmul.f32 %v3549_v39, %v7523_v50  ;;  %v7643_v50 = vadd.f32 %v7602_v36, %v3594_v44  ;;  %v3569_v35 = vsel %vm3568_vm8, %v5359_v32, %v3565_v20 }
 0x532   : > { %3683 = vmatmul.bf16.vlgmr.msra.gmra.mxu0 %v3606_v33  ;;  %v3573_v62 = vmul.f32 0.5, %v3572_v60  ;;  %v3586_v10 = vmul.f32 %v3569_v35, %v7526_v5  ;;  %v5025_v5 = vld [vmem:[%s7830_s7 + $0x30] sm:$0xff] }
 0x533   : > { %v3593_v17 = vmul.f32 %v7595_v12, %v3584_v26 }
 0x534   : > { %v3574_v21 = vsub.f32 1.5, %v3573_v62  ;;  %v3595_v1 = vmul.f32 %v7595_v12, %v3586_v10 }
 0x535   : > { %v7639_v3 = vadd.f32 %v7602_v36, %v3593_v17 }
 0x536   : > { %v3575_v27 = vmul.f32 %v5361_v31, %v3574_v21  ;;  %v7655_v51 = vadd.f32 %v7602_v36, %v3595_v1 }
 0x537   : > { %v3608_v24 = vpack.c.bf16 %v7643_v50, %v7639_v3 }
 0x538   : > { %v3579_v41 = vsel %vm3578_vm7, %v5361_v31, %v3575_v27 }
 0x539   : > { %v3587_v11 = vmul.f32 %v3579_v41, %v7533_v46  ;;  %v5026_v46 = vld [vmem:[%s7830_s7 + $0x38] sm:$0xff] }
 0x53a   : > { %3845 = vmatpush.bf16.msra.mxu1 %v5026_v46 }
 0x53b   : > { %v3596_v22 = vmul.f32 %v7595_v12, %v3587_v11  ;;  %v5024_v12 = vld [vmem:[%s7830_s7 + $0x28] sm:$0xff] }
 0x53d   : > { %v7652_v53 = vadd.f32 %v7602_v36, %v3596_v22 }
 0x53e   : > { %3846 = vmatpush.bf16.msra.mxu1 %v5025_v5 }
 0x53f   : > { %v3609_v16 = vpack.c.bf16 %v7652_v53, %v7655_v51 }
 0x541   : > { %3693 = vmatmul.bf16.gmra.mxu3 %v3608_v24 }
 0x542   : > { %3847 = vmatpush.bf16.msra.mxu1 %v5024_v12 }
 0x546   : > { %3848 = vmatpush.bf16.msra.mxu1 %v5023_v45 }
 0x54a   : > { %3849 = vmatpush.bf16.msra.mxu1 %v5022_v0 }
 0x54e   : > { %3850 = vmatpush.bf16.msra.mxu1 %v5021_v28 }
 0x551   : > { %3698 = vmatmul.bf16.gmra.mxu3 %v3609_v16 }
 0x552   : > { %3851 = vmatpush.bf16.msra.mxu1 %v5020_v63 }
 0x556   : > { %3852 = vmatpush.bf16.msra.mxu1 %v5019_v43 }
 0x5af   : > { %v3684_v29 = vpop.f32.mrf.mxu0 }
 0x5b0   : > { %v3685_v36 = vadd.f32 %v3684_v29, %v7681_v18 }
 0x5b2   : > { %v3712_v8 = vmul.f32 0.044715, %v3685_v36  ;;  %v3704_v44 = vmul.f32 0.5, %v3685_v36 }
 0x5b4   : > { %v3689_v55 = vpop.f32.mrf.mxu3  ;;  %v3720_v4 = vmul.f32 %v3712_v8, %v3685_v36 }
 0x5b5   : > { %v3690_v23 = vadd.f32 %v3689_v55, %v7681_v18 }
 0x5b6   : > { %v3728_v52 = vmul.f32 %v3720_v4, %v3685_v36 }
 0x5b7   : > { %v3686_v56 = vpop.f32.mrf.mxu0  ;;  %v3714_v30 = vmul.f32 0.044715, %v3690_v23 }
 0x5b8   : > { %v3687_v19 = vadd.f32 %v3686_v56, %v7681_v18  ;;  %v3736_v9 = vadd.f32 %v3728_v52, %v3685_v36  ;;  %v3706_v52 = vmul.f32 0.5, %v3690_v23 }
 0x5b9   : > { %v3722_v34 = vmul.f32 %v3714_v30, %v3690_v23 }
 0x5ba   : > { %v3713_v32 = vmul.f32 0.044715, %v3687_v19  ;;  %v3744_v6 = vmul.f32 0.7978846, %v3736_v9  ;;  %v3705_v48 = vmul.f32 0.5, %v3687_v19 }
 0x5bb   : > { %v3730_v58 = vmul.f32 %v3722_v34, %v3690_v23 }
 0x5bc   : > { %v3691_v49 = vpop.f32.mrf.mxu3  ;;  %v3721_v38 = vmul.f32 %v3713_v32, %v3687_v19  ;;  %5362 = vtanh.f32 %v3744_v6 }
 0x5bd   : > { %v3692_v31 = vadd.f32 %v3691_v49, %v7681_v18  ;;  %v3738_v61 = vadd.f32 %v3730_v58, %v3690_v23 }
 0x5be   : > { %v3729_v15 = vmul.f32 %v3721_v38, %v3687_v19 }
 0x5bf   : > { %v3715_v42 = vmul.f32 0.044715, %v3692_v31  ;;  %v3746_v41 = vmul.f32 0.7978846, %v3738_v61  ;;  %v3707_v8 = vmul.f32 0.5, %v3692_v31 }
 0x5c0   : > { %v3737_v47 = vadd.f32 %v3729_v15, %v3687_v19 }
 0x5c1   : > { %v3723_v54 = vmul.f32 %v3715_v42, %v3692_v31 }
 0x5c2   : > { %v3745_v33 = vmul.f32 0.7978846, %v3737_v47  ;;  %v5363_v37 = vpop.eup %5362 }
 0x5c3   : > { %v3731_v60 = vmul.f32 %v3723_v54, %v3692_v31  ;;  %v3760_v25 = vadd.f32 1.0, %v5363_v37 }
 0x5c4   : > { %v3694_v39 = vpop.f32.mrf.mxu3  ;;  %5364 = vtanh.f32 %v3745_v33 }
 0x5c5   : > { %v3739_v26 = vadd.f32 %v3731_v60, %v3692_v31  ;;  %v3695_v62 = vadd.f32 %v3694_v39, %v7681_v18  ;;  %v3768_v11 = vmul.f32 %v3760_v25, %v3704_v44 }
 0x5c7   : > { %v3747_v21 = vmul.f32 0.7978846, %v3739_v26  ;;  %v3716_v20 = vmul.f32 0.044715, %v3695_v62  ;;  %v3708_v26 = vmul.f32 0.5, %v3695_v62 }
 0x5c9   : > { %5366 = vtanh.f32 %v3747_v21  ;;  %v3724_v16 = vmul.f32 %v3716_v20, %v3695_v62 }
 0x5ca   : > { %v5365_v17 = vpop.eup %5364  ;;  %5368 = vtanh.f32 %v3746_v41 }
 0x5cb   : > { %v3761_v27 = vadd.f32 1.0, %v5365_v17  ;;  %v3732_v0 = vmul.f32 %v3724_v16, %v3695_v62  ;;  %v5030_v16 = vld [vmem:[%s7832_s9 + $0x18] sm:$0xff] }
 0x5cc   : > { %v3696_v24 = vpop.f32.mrf.mxu3 }
 0x5cd   : > { %v3697_v35 = vadd.f32 %v3696_v24, %v7681_v18  ;;  %v3769_v10 = vmul.f32 %v3761_v27, %v3705_v48  ;;  %v3740_v36 = vadd.f32 %v3732_v0, %v3695_v62  ;;  %v5034_v62 = vld [vmem:[%s7832_s9 + $0x38] sm:$0xff] }
 0x5ce   : > { %4017 = vmatpush.bf16.msra.mxu2 %v5034_v62 }
 0x5cf   : > { %v3717_v22 = vmul.f32 0.044715, %v3697_v35  ;;  %v3776_v1 = vpack.c.bf16 %v3769_v10, %v3768_v11  ;;  %v5367_v12 = vpop.eup %5366  ;;  %v3748_v32 = vmul.f32 0.7978846, %v3740_v36  ;;  %v3709_v39 = vmul.f32 0.5, %v3697_v35 }
 0x5d0   : > { %v5369_v28 = vpop.eup %5368  ;;  %v3763_v43 = vadd.f32 1.0, %v5367_v12  ;;  %v5027_v12 = vld [vmem:[%s7832_s9] sm:$0xff] }
 0x5d1   : > { %3853 = vmatmul.bf16.vlgmr.msra.gmra.mxu1 %v3776_v1  ;;  %v3725_v46 = vmul.f32 %v3717_v22, %v3697_v35  ;;  %v3762_v55 = vadd.f32 1.0, %v5369_v28  ;;  %v5032_v22 = vld [vmem:[%s7832_s9 + $0x28] sm:$0xff]  ;;  %v5031_v1 = vld [vmem:[%s7832_s9 + $0x20] sm:$0xff] }
 0x5d2   : > { %v3771_v56 = vmul.f32 %v3763_v43, %v3707_v8 }
 0x5d3   : > { %v3733_v5 = vmul.f32 %v3725_v46, %v3697_v35  ;;  %v3770_v49 = vmul.f32 %v3762_v55, %v3706_v52  ;;  %v5029_v46 = vld [vmem:[%s7832_s9 + $0x10] sm:$0xff] }
 0x5d4   : > { %v3699_v45 = vpop.f32.mrf.mxu3 }
 0x5d5   : > { %v3741_v63 = vadd.f32 %v3733_v5, %v3697_v35  ;;  %v3700_v29 = vadd.f32 %v3699_v45, %v7681_v18  ;;  %v3777_v6 = vpack.c.bf16 %v3771_v56, %v3770_v49  ;;  %v5033_v35 = vld [vmem:[%s7832_s9 + $0x30] sm:$0xff]  ;;  %v5028_v5 = vld [vmem:[%s7832_s9 + $0x8] sm:$0xff]  ;;  %v7719_v45 = vperm.slane %v7903_v57, 1 }
 0x5d6   : > { %4018 = vmatpush.bf16.msra.mxu2 %v5033_v35 }
 0x5d7   : > { %v3749_v4 = vmul.f32 0.7978846, %v3741_v63  ;;  %v3718_v19 = vmul.f32 0.044715, %v3700_v29  ;;  %v3710_v24 = vmul.f32 0.5, %v3700_v29 }
 0x5d9   : > { %5370 = vtanh.f32 %v3749_v4  ;;  %v3726_v15 = vmul.f32 %v3718_v19, %v3700_v29 }
 0x5da   : > { %5372 = vtanh.f32 %v3748_v32  ;;  %4019 = vmatpush.bf16.msra.mxu2 %v5032_v22 }
 0x5db   : > { %v3734_v31 = vmul.f32 %v3726_v15, %v3700_v29 }
 0x5dc   : > { %v3701_v9 = vpop.f32.mrf.mxu3 }
 0x5dd   : > { %v3702_v30 = vadd.f32 %v3701_v9, %v7681_v18  ;;  %v3742_v60 = vadd.f32 %v3734_v31, %v3700_v29 }
 0x5de   : > { %4020 = vmatpush.bf16.msra.mxu2 %v5031_v1 }
 0x5df   : > { %v3719_v38 = vmul.f32 0.044715, %v3702_v30  ;;  %v5371_v34 = vpop.eup %5370  ;;  %v3750_v61 = vmul.f32 0.7978846, %v3742_v60  ;;  %v3711_v27 = vmul.f32 0.5, %v3702_v30 }
 0x5e0   : > { %v5373_v54 = vpop.eup %5372  ;;  %v3765_v23 = vadd.f32 1.0, %v5371_v34 }
 0x5e1   : > { %3858 = vmatmul.bf16.gmra.mxu1 %v3777_v6  ;;  %v3727_v42 = vmul.f32 %v3719_v38, %v3702_v30  ;;  %v3764_v58 = vadd.f32 1.0, %v5373_v54 }
 0x5e2   : > { %v3773_v18 = vmul.f32 %v3765_v23, %v3709_v39  ;;  %4021 = vmatpush.bf16.msra.mxu2 %v5030_v16 }
 0x5e3   : > { %v3735_v47 = vmul.f32 %v3727_v42, %v3702_v30  ;;  %v3772_v25 = vmul.f32 %v3764_v58, %v3708_v26 }
 0x5e5   : > { %v3743_v33 = vadd.f32 %v3735_v47, %v3702_v30  ;;  %v3778_v17 = vpack.c.bf16 %v3773_v18, %v3772_v25 }
 0x5e6   : > { %4022 = vmatpush.bf16.msra.mxu2 %v5029_v46 }
 0x5e7   : > { %v3751_v37 = vmul.f32 0.7978846, %v3743_v33 }
 0x5e9   : > { %5374 = vtanh.f32 %v3751_v37 }
 0x5ea   : > { %5376 = vtanh.f32 %v3750_v61  ;;  %4023 = vmatpush.bf16.msra.mxu2 %v5028_v5 }
 0x5ee   : > { %4024 = vmatpush.bf16.msra.mxu2 %v5027_v12 }
 0x5ef   : > { %v5375_v21 = vpop.eup %5374 }
 0x5f0   : > { %v5377_v44 = vpop.eup %5376  ;;  %v3767_v48 = vadd.f32 1.0, %v5375_v21 }
 0x5f1   : > { %3863 = vmatmul.bf16.gmra.mxu1 %v3778_v17  ;;  %v3766_v20 = vadd.f32 1.0, %v5377_v44 }
 0x5f2   : > { %v3775_v41 = vmul.f32 %v3767_v48, %v3711_v27 }
 0x5f3   : > { %v3774_v11 = vmul.f32 %v3766_v20, %v3710_v24 }
 0x5f5   : > { %v3779_v10 = vpack.c.bf16 %v3775_v41, %v3774_v11 }
 0x601   : > { %3868 = vmatmul.bf16.gmra.mxu1 %v3779_v10 }
 0x64e   : > { %v3854_v0 = vpop.f32.mrf.mxu1 }
 0x64f   : > { %v3855_v28 = vadd.f32 %v3854_v0, %v7719_v45 }
 0x651   : > { %v3882_v63 = vmul.f32 0.044715, %v3855_v28  ;;  %v3874_v23 = vmul.f32 0.5, %v3855_v28 }
 0x653   : > { %v3890_v43 = vmul.f32 %v3882_v63, %v3855_v28 }
 0x655   : > { %v3898_v29 = vmul.f32 %v3890_v43, %v3855_v28 }
 0x656   : > { %v3856_v36 = vpop.f32.mrf.mxu1 }
 0x657   : > { %v3857_v8 = vadd.f32 %v3856_v36, %v7719_v45  ;;  %v3906_v55 = vadd.f32 %v3898_v29, %v3855_v28 }
 0x659   : > { %v3883_v4 = vmul.f32 0.044715, %v3857_v8  ;;  %v3914_v56 = vmul.f32 0.7978846, %v3906_v55  ;;  %v3875_v60 = vmul.f32 0.5, %v3857_v8 }
 0x65b   : > { %v3891_v52 = vmul.f32 %v3883_v4, %v3857_v8  ;;  %5378 = vtanh.f32 %v3914_v56 }
 0x65d   : > { %v3899_v19 = vmul.f32 %v3891_v52, %v3857_v8 }
 0x65e   : > { %v3859_v9 = vpop.f32.mrf.mxu1 }
 0x65f   : > { %v3860_v32 = vadd.f32 %v3859_v9, %v7719_v45  ;;  %v3907_v57 = vadd.f32 %v3899_v19, %v3857_v8 }
 0x661   : > { %v3884_v30 = vmul.f32 0.044715, %v3860_v32  ;;  %v3915_v49 = vmul.f32 0.7978846, %v3907_v57  ;;  %v5379_v6 = vpop.eup %5378  ;;  %v3876_v16 = vmul.f32 0.5, %v3860_v32 }
 0x662   : > { %v3930_v31 = vadd.f32 1.0, %v5379_v6 }
 0x663   : > { %5380 = vtanh.f32 %v3915_v49  ;;  %v3892_v38 = vmul.f32 %v3884_v30, %v3860_v32 }
 0x664   : > { %v3938_v26 = vmul.f32 %v3930_v31, %v3874_v23 }
 0x665   : > { %v3900_v15 = vmul.f32 %v3892_v38, %v3860_v32 }
 0x666   : > { %v3861_v42 = vpop.f32.mrf.mxu1 }
 0x667   : > { %v3862_v47 = vadd.f32 %v3861_v42, %v7719_v45  ;;  %v3908_v34 = vadd.f32 %v3900_v15, %v3860_v32 }
 0x669   : > { %v5381_v54 = vpop.eup %5380  ;;  %v3885_v33 = vmul.f32 0.044715, %v3862_v47  ;;  %v3916_v37 = vmul.f32 0.7978846, %v3908_v34  ;;  %v3877_v46 = vmul.f32 0.5, %v3862_v47 }
 0x66a   : > { %v3931_v39 = vadd.f32 1.0, %v5381_v54 }
 0x66b   : > { %v3893_v58 = vmul.f32 %v3885_v33, %v3862_v47  ;;  %5382 = vtanh.f32 %v3916_v37 }
 0x66c   : > { %v3939_v18 = vmul.f32 %v3931_v39, %v3875_v60 }
 0x66d   : > { %v3901_v61 = vmul.f32 %v3893_v58, %v3862_v47 }
 0x66e   : > { %v3864_v25 = vpop.f32.mrf.mxu1  ;;  %v3946_v17 = vpack.c.bf16 %v3939_v18, %v3938_v26 }
 0x66f   : > { %v3865_v21 = vadd.f32 %v3864_v25, %v7719_v45  ;;  %v3909_v44 = vadd.f32 %v3901_v61, %v3862_v47 }
 0x670   : > { %4025 = vmatmul.bf16.vlgmr.msra.gmra.mxu2 %v3946_v17 }
 0x671   : > { %v3886_v48 = vmul.f32 0.044715, %v3865_v21  ;;  %v3917_v27 = vmul.f32 0.7978846, %v3909_v44  ;;  %v5383_v24 = vpop.eup %5382  ;;  %v3878_v15 = vmul.f32 0.5, %v3865_v21 }
 0x672   : > { %v3932_v35 = vadd.f32 1.0, %v5383_v24 }
 0x673   : > { %5384 = vtanh.f32 %v3917_v27  ;;  %v3894_v20 = vmul.f32 %v3886_v48, %v3865_v21  ;;  %v7904_v48 = vld [vmem:[#allocation7_spill] sm:$0xff] }
 0x674   : > { %v3940_v28 = vmul.f32 %v3932_v35, %v3876_v16  ;;  %v3967_v27 = vperm.slane %v7904_v48, 0 }
 0x675   : > { %v3902_v41 = vmul.f32 %v3894_v20, %v3865_v21 }
 0x676   : > { %v3866_v11 = vpop.f32.mrf.mxu1 }
 0x677   : > { %v3867_v10 = vadd.f32 %v3866_v11, %v7719_v45  ;;  %v3910_v62 = vadd.f32 %v3902_v41, %v3865_v21 }
 0x679   : > { %v5385_v22 = vpop.eup %5384  ;;  %v3887_v1 = vmul.f32 0.044715, %v3867_v10  ;;  %v3918_v0 = vmul.f32 0.7978846, %v3910_v62  ;;  %v3879_v42 = vmul.f32 0.5, %v3867_v10 }
 0x67a   : > { %v3933_v5 = vadd.f32 1.0, %v5385_v22 }
 0x67b   : > { %v3895_v12 = vmul.f32 %v3887_v1, %v3867_v10  ;;  %5386 = vtanh.f32 %v3918_v0 }
 0x67c   : > { %v3941_v63 = vmul.f32 %v3933_v5, %v3877_v46 }
 0x67d   : > { %v3903_v43 = vmul.f32 %v3895_v12, %v3867_v10 }
 0x67e   : > { %v3869_v29 = vpop.f32.mrf.mxu1  ;;  %v3947_v36 = vpack.c.bf16 %v3941_v63, %v3940_v28 }
 0x67f   : > { %v3870_v8 = vadd.f32 %v3869_v29, %v7719_v45  ;;  %v3911_v55 = vadd.f32 %v3903_v43, %v3867_v10 }
 0x680   : > { %4030 = vmatmul.bf16.gmra.mxu2 %v3947_v36 }
 0x681   : > { %v3888_v4 = vmul.f32 0.044715, %v3870_v8  ;;  %v3919_v52 = vmul.f32 0.7978846, %v3911_v55  ;;  %v5387_v19 = vpop.eup %5386  ;;  %v3880_v18 = vmul.f32 0.5, %v3870_v8 }
 0x682   : > { %v3934_v49 = vadd.f32 1.0, %v5387_v19 }
 0x683   : > { %5388 = vtanh.f32 %v3919_v52  ;;  %v3896_v56 = vmul.f32 %v3888_v4, %v3870_v8 }
 0x684   : > { %v3942_v54 = vmul.f32 %v3934_v49, %v3878_v15 }
 0x685   : > { %v3904_v9 = vmul.f32 %v3896_v56, %v3870_v8 }
 0x686   : > { %v3871_v32 = vpop.f32.mrf.mxu1 }
 0x687   : > { %v3872_v57 = vadd.f32 %v3871_v32, %v7719_v45  ;;  %v3912_v30 = vadd.f32 %v3904_v9, %v3870_v8 }
 0x689   : > { %v5389_v38 = vpop.eup %5388  ;;  %v3889_v6 = vmul.f32 0.044715, %v3872_v57  ;;  %v3920_v31 = vmul.f32 0.7978846, %v3912_v30  ;;  %v3881_v61 = vmul.f32 0.5, %v3872_v57 }
 0x68a   : > { %v3935_v47 = vadd.f32 1.0, %v5389_v38 }
 0x68b   : > { %v3897_v34 = vmul.f32 %v3889_v6, %v3872_v57  ;;  %5390 = vtanh.f32 %v3920_v31 }
 0x68c   : > { %v3943_v33 = vmul.f32 %v3935_v47, %v3879_v42 }
 0x68d   : > { %v3905_v23 = vmul.f32 %v3897_v34, %v3872_v57 }
 0x68e   : > { %v3948_v60 = vpack.c.bf16 %v3943_v33, %v3942_v54 }
 0x68f   : > { %v3913_v39 = vadd.f32 %v3905_v23, %v3872_v57 }
 0x690   : > { %4035 = vmatmul.bf16.gmra.mxu2 %v3948_v60 }
 0x691   : > { %v3921_v58 = vmul.f32 0.7978846, %v3913_v39  ;;  %v5391_v37 = vpop.eup %5390 }
 0x692   : > { %v3936_v45 = vadd.f32 1.0, %v5391_v37 }
 0x693   : > { %5392 = vtanh.f32 %v3921_v58 }
 0x694   : > { %v3944_v17 = vmul.f32 %v3936_v45, %v3880_v18 }
 0x699   : > { %v5393_v26 = vpop.eup %5392 }
 0x69a   : > { %v3937_v25 = vadd.f32 1.0, %v5393_v26 }
 0x69c   : > { %v3945_v21 = vmul.f32 %v3937_v25, %v3881_v61 }
 0x69e   : > { %v3949_v44 = vpack.c.bf16 %v3945_v21, %v3944_v17 }
 0x6a0   : > { %4040 = vmatmul.bf16.gmra.mxu2 %v3949_v44 }
 0x6f3   : > { %v4026_v20 = vpop.f32.mrf.mxu2 }
 0x6f4   : > { %v4027_v24 = vadd.f32 %v4026_v20, %v3967_v27 }
 0x6f6   : > { %v4046_v41 = vadd.f32 %v4027_v24, %v7622_v2 }
 0x6f8   : > { %4054 = vadd.xlane.f32.xlu1 %v4046_v41 }
 0x6fb   : > { %v4028_v11 = vpop.f32.mrf.mxu2 }
 0x6fc   : > { %v4029_v10 = vadd.f32 %v4028_v11, %v3967_v27 }
 0x6fe   : > { %v4047_v62 = vadd.f32 %v4029_v10, %v7625_v40 }
 0x700   : > { %4056 = vadd.xlane.f32.xlu2 %v4047_v62 }
 0x703   : > { %v4031_v35 = vpop.f32.mrf.mxu2 }
 0x704   : > { %v4032_v22 = vadd.f32 %v4031_v35, %v3967_v27 }
 0x706   : > { %v4048_v1 = vadd.f32 %v4032_v22, %v7614_v7 }
 0x708   : > { %4058 = vadd.xlane.f32.xlu0 %v4048_v1 }
 0x70b   : > { %v4033_v16 = vpop.f32.mrf.mxu2 }
 0x70c   : > { %v4034_v46 = vadd.f32 %v4033_v16, %v3967_v27 }
 0x70e   : > { %v4049_v5 = vadd.f32 %v4034_v46, %v7617_v59 }
 0x710   : > { %4060 = vadd.xlane.f32.xlu1 %v4049_v5 }
 0x713   : > { %v4036_v12 = vpop.f32.mrf.mxu2 }
 0x714   : > { %v4037_v0 = vadd.f32 %v4036_v12, %v3967_v27 }
 0x716   : > { %v4050_v2 = vadd.f32 %v4037_v0, %v7639_v3 }
 0x718   : > { %4062 = vadd.xlane.f32.xlu2 %v4050_v2 }
 0x71b   : > { %v4038_v28 = vpop.f32.mrf.mxu2 }
 0x71c   : > { %v4039_v63 = vadd.f32 %v4038_v28, %v3967_v27 }
 0x71e   : > { %v4051_v40 = vadd.f32 %v4039_v63, %v7643_v50 }
 0x720   : > { %4064 = vadd.xlane.f32.xlu0 %v4051_v40 }
 0x723   : > { %v4041_v43 = vpop.f32.mrf.mxu2 }
 0x724   : > { %v4042_v29 = vadd.f32 %v4041_v43, %v3967_v27 }
 0x726   : > { %v4052_v7 = vadd.f32 %v4042_v29, %v7655_v51 }
 0x728   : > { %4066 = vadd.xlane.f32.xlu1 %v4052_v7 }
 0x72b   : > { %v4043_v36 = vpop.f32.mrf.mxu2 }
 0x72c   : > { %v4044_v8 = vadd.f32 %v4043_v36, %v3967_v27 }
 0x72e   : > { %v4053_v59 = vadd.f32 %v4044_v8, %v7652_v53 }
 0x730   : > { %4068 = vadd.xlane.f32.xlu2 %v4053_v59 }
 0x76b   : > { %v4055_v55 = vpop.xlane.xlu1 %4054 }
 0x76c   : > { %v4070_v4 = vmul.f32 %v4055_v55, %v7494_v14 }
 0x76e   : > { %v7739_v3 = vsub.f32 %v4046_v41, %v4070_v4 }
 0x770   : > { %v4086_v52 = vmul.f32 %v7739_v3, %v7739_v3 }
 0x772   : > { %4094 = vadd.xlane.f32.xlu0 %v4086_v52 }
 0x773   : > { %v4057_v50 = vpop.xlane.xlu2 %4056 }
 0x774   : > { %v4071_v56 = vmul.f32 %v4057_v50, %v7494_v14 }
 0x776   : > { %v7744_v19 = vsub.f32 %v4047_v62, %v4071_v56 }
 0x778   : > { %v4087_v51 = vmul.f32 %v7744_v19, %v7744_v19 }
 0x77a   : > { %4096 = vadd.xlane.f32.xlu1 %v4087_v51 }
 0x77b   : > { %v4059_v53 = vpop.xlane.xlu0 %4058 }
 0x77c   : > { %v4072_v9 = vmul.f32 %v4059_v53, %v7494_v14 }
 0x77e   : > { %v7749_v32 = vsub.f32 %v4048_v1, %v4072_v9 }
 0x780   : > { %v4088_v57 = vmul.f32 %v7749_v32, %v7749_v32 }
 0x782   : > { %4098 = vadd.xlane.f32.xlu2 %v4088_v57 }
 0x783   : > { %v4061_v30 = vpop.xlane.xlu1 %4060 }
 0x784   : > { %v4073_v49 = vmul.f32 %v4061_v30, %v7494_v14 }
 0x786   : > { %v7754_v38 = vsub.f32 %v4049_v5, %v4073_v49  ;;  %v7782_v5 = vperm.slane %v7902_v13, 2 }
 0x788   : > { %v4089_v6 = vmul.f32 %v7754_v38, %v7754_v38 }
 0x78a   : > { %4100 = vadd.xlane.f32.xlu0 %v4089_v6 }
 0x78b   : > { %v4063_v15 = vpop.xlane.xlu2 %4062 }
 0x78c   : > { %v4074_v42 = vmul.f32 %v4063_v15, %v7494_v14 }
 0x78e   : > { %v7759_v47 = vsub.f32 %v4050_v2, %v4074_v42  ;;  %v7785_v2 = vperm.slane %v7902_v13, 3 }
 0x790   : > { %v4090_v34 = vmul.f32 %v7759_v47, %v7759_v47 }
 0x792   : > { %4102 = vadd.xlane.f32.xlu1 %v4090_v34 }
 0x793   : > { %v4065_v31 = vpop.xlane.xlu0 %4064 }
 0x794   : > { %v4075_v54 = vmul.f32 %v4065_v31, %v7494_v14 }
 0x796   : > { %v7764_v33 = vsub.f32 %v4051_v40, %v4075_v54 }
 0x798   : > { %v4091_v23 = vmul.f32 %v7764_v33, %v7764_v33 }
 0x79a   : > { %4104 = vadd.xlane.f32.xlu2 %v4091_v23 }
 0x79b   : > { %v4067_v60 = vpop.xlane.xlu1 %4066 }
 0x79c   : > { %v4076_v39 = vmul.f32 %v4067_v60, %v7494_v14 }
 0x79e   : > { %v7769_v58 = vsub.f32 %v4052_v7, %v4076_v39 }
 0x7a0   : > { %v4092_v37 = vmul.f32 %v7769_v58, %v7769_v58 }
 0x7a2   : > { %4106 = vadd.xlane.f32.xlu0 %v4092_v37 }
 0x7a3   : > { %v4069_v45 = vpop.xlane.xlu2 %4068 }
 0x7a4   : > { %v4077_v26 = vmul.f32 %v4069_v45, %v7494_v14 }
 0x7a6   : > { %v7774_v18 = vsub.f32 %v4053_v59, %v4077_v26 }
 0x7a8   : > { %v4093_v61 = vmul.f32 %v7774_v18, %v7774_v18 }
 0x7aa   : > { %4108 = vadd.xlane.f32.xlu1 %v4093_v61 }
 0x7e5   : > { %v4095_v25 = vpop.xlane.xlu0 %4094 }
 0x7e6   : > { %v4110_v17 = vmul.f32 %v4095_v25, %v7494_v14 }
 0x7e8   : > { %v4118_v21 = vadd.f32 1e-05, %v4110_v17 }
 0x7ea   : > { %5394 = vrsqrt.f32 %v4118_v21  ;;  %vm4132_vm10 = vweird.f32 %v4118_v21 }
 0x7ed   : > { %v4097_v44 = vpop.xlane.xlu1 %4096 }
 0x7ee   : > { %v4111_v48 = vmul.f32 %v4097_v44, %v7494_v14 }
 0x7f0   : > { %v5395_v27 = vpop.eup %5394  ;;  %v4119_v20 = vadd.f32 1e-05, %v4111_v48 }
 0x7f1   : > { %v4127_v24 = vmul.f32 %v5395_v27, %v4118_v21  ;;  %vm4133_vm9 = vweird.f32 %v5395_v27 }
 0x7f2   : > { %5396 = vrsqrt.f32 %v4119_v20  ;;  %vm4134_vm11 = vmor %vm4132_vm10, %vm4133_vm9  ;;  %vm4142_vm13 = vweird.f32 %v4119_v20 }
 0x7f3   : > { %v4128_v41 = vmul.f32 %v5395_v27, %v4127_v24 }
 0x7f5   : > { %v4129_v11 = vmul.f32 0.5, %v4128_v41  ;;  %v4099_v10 = vpop.xlane.xlu2 %4098 }
 0x7f6   : > { %v4112_v62 = vmul.f32 %v4099_v10, %v7494_v14 }
 0x7f7   : > { %v4130_v35 = vsub.f32 1.5, %v4129_v11 }
 0x7f8   : > { %v5397_v22 = vpop.eup %5396  ;;  %v4120_v1 = vadd.f32 1e-05, %v4112_v62 }
 0x7f9   : > { %v4131_v16 = vmul.f32 %v5395_v27, %v4130_v35  ;;  %v4137_v46 = vmul.f32 %v5397_v22, %v4119_v20  ;;  %vm4143_vm12 = vweird.f32 %v5397_v22 }
 0x7fa   : > { %5398 = vrsqrt.f32 %v4120_v1  ;;  %vm4144_vm14 = vmor %vm4142_vm13, %vm4143_vm12  ;;  %vm4152_vm0 = vweird.f32 %v4120_v1 }
 0x7fb   : > { %v4135_v12 = vsel %vm4134_vm11, %v5395_v27, %v4131_v16  ;;  %v4138_v0 = vmul.f32 %v5397_v22, %v4137_v46 }
 0x7fc   : > { %v4206_v28 = vmul.f32 %v4135_v12, %v7739_v3 }
 0x7fd   : > { %v4139_v63 = vmul.f32 0.5, %v4138_v0  ;;  %v4101_v40 = vpop.xlane.xlu0 %4100 }
 0x7fe   : > { %v4215_v43 = vmul.f32 %v7782_v5, %v4206_v28  ;;  %v4113_v29 = vmul.f32 %v4101_v40, %v7494_v14 }
 0x7ff   : > { %v4140_v7 = vsub.f32 1.5, %v4139_v63 }
 0x800   : > { %v5399_v36 = vpop.eup %5398  ;;  %v4224_v8 = vadd.f32 %v7785_v2, %v4215_v43  ;;  %v4121_v59 = vadd.f32 1e-05, %v4113_v29 }
 0x801   : > { %v4141_v55 = vmul.f32 %v5397_v22, %v4140_v7  ;;  %v4147_v4 = vmul.f32 %v5399_v36, %v4120_v1  ;;  %vm4153_vm15 = vweird.f32 %v5399_v36 }
 0x802   : > { %4232 = vst [vmem:[#allocation3] sm:$0xff] %v4224_v8  ;;  %5400 = vrsqrt.f32 %v4121_v59  ;;  %vm4154_vm1 = vmor %vm4152_vm0, %vm4153_vm15  ;;  %vm4162_vm3 = vweird.f32 %v4121_v59 }
 0x803   : > { %v4145_v13 = vsel %vm4144_vm14, %v5397_v22, %v4141_v55  ;;  %v4148_v3 = vmul.f32 %v5399_v36, %v4147_v4 }
 0x804   : > { %v4207_v52 = vmul.f32 %v4145_v13, %v7744_v19 }
 0x805   : > { %v4149_v50 = vmul.f32 0.5, %v4148_v3  ;;  %v4103_v56 = vpop.xlane.xlu1 %4102 }
 0x806   : > { %v4216_v51 = vmul.f32 %v7782_v5, %v4207_v52  ;;  %v4114_v53 = vmul.f32 %v4103_v56, %v7494_v14 }
 0x807   : > { %v4150_v9 = vsub.f32 1.5, %v4149_v50 }
 0x808   : > { %v5401_v57 = vpop.eup %5400  ;;  %v4225_v30 = vadd.f32 %v7785_v2, %v4216_v51  ;;  %v4122_v49 = vadd.f32 1e-05, %v4114_v53 }
 0x809   : > { %v4151_v6 = vmul.f32 %v5399_v36, %v4150_v9  ;;  %v4157_v15 = vmul.f32 %v5401_v57, %v4121_v59  ;;  %vm4163_vm2 = vweird.f32 %v5401_v57 }
 0x80a   : > { %4233 = vst [vmem:[#allocation3 + $0x8] sm:$0xff] %v4225_v30  ;;  %5402 = vrsqrt.f32 %v4122_v49  ;;  %vm4164_vm4 = vmor %vm4162_vm3, %vm4163_vm2  ;;  %vm4172_vm6 = vweird.f32 %v4122_v49 }
 0x80b   : > { %v4155_v42 = vsel %vm4154_vm1, %v5399_v36, %v4151_v6  ;;  %v4158_v19 = vmul.f32 %v5401_v57, %v4157_v15 }
 0x80c   : > { %v4208_v34 = vmul.f32 %v4155_v42, %v7749_v32 }
 0x80d   : > { %v4159_v31 = vmul.f32 0.5, %v4158_v19  ;;  %v4105_v54 = vpop.xlane.xlu2 %4104 }
 0x80e   : > { %v4217_v23 = vmul.f32 %v7782_v5, %v4208_v34  ;;  %v4115_v60 = vmul.f32 %v4105_v54, %v7494_v14 }
 0x80f   : > { %v4160_v39 = vsub.f32 1.5, %v4159_v31 }
 0x810   : > { %v5403_v37 = vpop.eup %5402  ;;  %v4226_v45 = vadd.f32 %v7785_v2, %v4217_v23  ;;  %v4123_v26 = vadd.f32 1e-05, %v4115_v60 }
 0x811   : > { %v4161_v61 = vmul.f32 %v5401_v57, %v4160_v39  ;;  %v4167_v25 = vmul.f32 %v5403_v37, %v4122_v49  ;;  %vm4173_vm5 = vweird.f32 %v5403_v37 }
 0x812   : > { %4234 = vst [vmem:[#allocation3 + $0x10] sm:$0xff] %v4226_v45  ;;  %5404 = vrsqrt.f32 %v4123_v26  ;;  %vm4174_vm7 = vmor %vm4172_vm6, %vm4173_vm5  ;;  %vm4182_vm9 = vweird.f32 %v4123_v26 }
 0x813   : > { %v4165_v17 = vsel %vm4164_vm4, %v5401_v57, %v4161_v61  ;;  %v4168_v32 = vmul.f32 %v5403_v37, %v4167_v25 }
 0x814   : > { %v4209_v21 = vmul.f32 %v4165_v17, %v7754_v38 }
 0x815   : > { %v4169_v44 = vmul.f32 0.5, %v4168_v32  ;;  %v4107_v48 = vpop.xlane.xlu0 %4106 }
 0x816   : > { %v4218_v27 = vmul.f32 %v7782_v5, %v4209_v21  ;;  %v4116_v20 = vmul.f32 %v4107_v48, %v7494_v14 }
 0x817   : > { %v4170_v24 = vsub.f32 1.5, %v4169_v44 }
 0x818   : > { %v5405_v41 = vpop.eup %5404  ;;  %v4227_v11 = vadd.f32 %v7785_v2, %v4218_v27  ;;  %v4124_v10 = vadd.f32 1e-05, %v4116_v20 }
 0x819   : > { %v4171_v62 = vmul.f32 %v5403_v37, %v4170_v24  ;;  %v4177_v35 = vmul.f32 %v5405_v41, %v4123_v26  ;;  %vm4183_vm8 = vweird.f32 %v5405_v41 }
 0x81a   : > { %4235 = vst [vmem:[#allocation3 + $0x18] sm:$0xff] %v4227_v11  ;;  %5406 = vrsqrt.f32 %v4124_v10  ;;  %vm4184_vm10 = vmor %vm4182_vm9, %vm4183_vm8  ;;  %vm4192_vm12 = vweird.f32 %v4124_v10 }
 0x81b   : > { %v4175_v22 = vsel %vm4174_vm7, %v5403_v37, %v4171_v62  ;;  %v4178_v38 = vmul.f32 %v5405_v41, %v4177_v35 }
 0x81c   : > { %v4210_v1 = vmul.f32 %v4175_v22, %v7759_v47 }
 0x81d   : > { %v4179_v16 = vmul.f32 0.5, %v4178_v38  ;;  %v4109_v46 = vpop.xlane.xlu1 %4108 }
 0x81e   : > { %v4219_v12 = vmul.f32 %v7782_v5, %v4210_v1  ;;  %v4117_v0 = vmul.f32 %v4109_v46, %v7494_v14 }
 0x81f   : > { %v4180_v28 = vsub.f32 1.5, %v4179_v16 }
 0x820   : > { %v5407_v63 = vpop.eup %5406  ;;  %v4228_v40 = vadd.f32 %v7785_v2, %v4219_v12  ;;  %v4125_v43 = vadd.f32 1e-05, %v4117_v0 }
 0x821   : > { %v4181_v29 = vmul.f32 %v5405_v41, %v4180_v28  ;;  %v4187_v7 = vmul.f32 %v5407_v63, %v4124_v10  ;;  %vm4193_vm11 = vweird.f32 %v5407_v63 }
 0x822   : > { %4236 = vst [vmem:[#allocation3 + $0x20] sm:$0xff] %v4228_v40  ;;  %5408 = vrsqrt.f32 %v4125_v43  ;;  %vm4194_vm13 = vmor %vm4192_vm12, %vm4193_vm11  ;;  %vm4202_vm15 = vweird.f32 %v4125_v43 }
 0x823   : > { %v4185_v36 = vsel %vm4184_vm10, %v5405_v41, %v4181_v29  ;;  %v4188_v47 = vmul.f32 %v5407_v63, %v4187_v7 }
 0x824   : > { %v4211_v8 = vmul.f32 %v4185_v36, %v7764_v33 }
 0x825   : > { %v4189_v59 = vmul.f32 0.5, %v4188_v47 }
 0x826   : > { %v4220_v55 = vmul.f32 %v7782_v5, %v4211_v8 }
 0x827   : > { %v4190_v14 = vsub.f32 1.5, %v4189_v59 }
 0x828   : > { %v5409_v4 = vpop.eup %5408  ;;  %v4229_v13 = vadd.f32 %v7785_v2, %v4220_v55 }
 0x829   : > { %v4191_v3 = vmul.f32 %v5407_v63, %v4190_v14  ;;  %v4197_v52 = vmul.f32 %v5409_v4, %v4125_v43  ;;  %vm4203_vm14 = vweird.f32 %v5409_v4 }
 0x82a   : > { %4237 = vst [vmem:[#allocation3 + $0x28] sm:$0xff] %v4229_v13  ;;  %vm4204_vm0 = vmor %vm4202_vm15, %vm4203_vm14 }
 0x82b   : > { %v4195_v50 = vsel %vm4194_vm13, %v5407_v63, %v4191_v3  ;;  %v4198_v56 = vmul.f32 %v5409_v4, %v4197_v52 }
 0x82c   : > { %v4212_v51 = vmul.f32 %v4195_v50, %v7769_v58 }
 0x82d   : > { %v4199_v53 = vmul.f32 0.5, %v4198_v56 }
 0x82e   : > { %v4221_v33 = vmul.f32 %v7782_v5, %v4212_v51 }
 0x82f   : > { %v4200_v9 = vsub.f32 1.5, %v4199_v53 }
 0x830   : > { %v4230_v57 = vadd.f32 %v7785_v2, %v4221_v33 }
 0x831   : > { %v4201_v30 = vmul.f32 %v5409_v4, %v4200_v9 }
 0x832   : > { %4238 = vst [vmem:[#allocation3 + $0x30] sm:$0xff] %v4230_v57 }
 0x833   : > { %v4205_v49 = vsel %vm4204_vm0, %v5409_v4, %v4201_v30 }
 0x834   : > { %v4213_v6 = vmul.f32 %v4205_v49, %v7774_v18 }
 0x836   : > { %v4222_v15 = vmul.f32 %v7782_v5, %v4213_v6 }
 0x838   : > { %v4231_v42 = vadd.f32 %v7785_v2, %v4222_v15 }
 0x83a   : > { %4239 = vst [vmem:[#allocation3 + $0x38] sm:$0xff] %v4231_v42 }
 0x83b PF: > { %p5071_p7 = scmp.eq.s32.totalorder %s5527_s22, 1  ;;  %s5453_s17 = smov [#allocation3]  }
 0x83c   : > { %s4245_s25 = sshll.u32 %s5453_s17, 4  ;;  %s4247_s15 = sshll.u32 %s7835_s12, 4  ;;  %s4246_s25 = int_to_ptr.vmem [resolvable:$true] %s4245_s25  ;;  %s4248_s15 = int_to_ptr.hbm [resolvable:$true] %s4247_s15 }
 0x83d   : > { %s5454_s16 = smov 128   ;;  %s5455_s18 = smov 8  }
 0x83e   : > { %5068 = dma.vmem_to_hbm [thread:$0]  (%p5071_p7), %s4246_s25, 1024, %s4248_s15, [#allocation4], %s5454_s16, %s5454_s16, %s5455_s18  }
 0x83f   : > { %5443 = dma.done.wait (%p5071_p7), [#allocation4], 1024  }
 0x840   : > { %5445 = vsyncadd (%p5071_p7), [#allocation4], 4294966272 }
 0x841 PF: > { %s23_s21 = sadd.s32 1, %s5448_s21  }
 0x842   : > { %p20_p8 = scmp.ge.s32.totalorder %s23_s21, 4  }
 0x844   :  { %22 = sbr.rel (!%p20_p8) target bundleno = 1 (0x1), region = 106 }
 0x849   :  { %4264 = vsyncpa [#allocation4], 1 }
 0x84a   :  { %4266 = vsyncpa [#allocation4 + $0x1], 1 }

</bundles_post_ra>
